<compile_context>
chip_gen: v7x
topology: tpu7x:2x2x1
jax: 0.10.0
libtpu: 0.0.40
codegen_flags: <defaults>
</compile_context>

<pallas_src>
import functools

import numpy as np
import jax
import jax.numpy as jnp
from jax.experimental import pallas as pl
from jax.experimental.pallas import tpu as pltpu

TAU = 2.0      # neuron.LIFNode default tau
V_TH = 1.0     # default v_threshold
BN_EPS = 1e-5  # BatchNorm2d default eps


def basic_block_kernel(x_ref, wb1_ref, wb2_ref, thr1_ref, thr2_ref, out_ref,
                       *, B, H, WC, WP, connect_f):
    """B images per grid step; everything lane-dense.

    x_ref:    (B, H, W*Cin)   input slab (NHWC with W,C merged; W*Cin = 512)
    wb1_ref:  (3*W*Cin, W*P)  conv1 banded weights (BN1 scale folded in)
    wb2_ref:  (3*W*P,  W*P)   conv2 banded weights (BN2 scale folded in)
    thr*_ref: (1, W*P)        folded LIF threshold: tau*v_th - bn_shift
    out_ref:  (B, H, W*P)     output slab
    """
    x = x_ref[...]                                     # (B, H, WC)
    BH = B * H

    def shifted_stack(a, wc):
        # (B, H, wc) -> (B*H, 3*wc): rows h-1 | h | h+1 stacked along K,
        # with a zero row at each image border (1-px zero padding in H).
        # All writes are full-lane (wc is a multiple of 128).
        zrow = jnp.zeros((B, 1, wc), jnp.float32)
        up = jnp.concatenate([zrow, a[:, :H - 1, :]], axis=1)    # row h-1
        down = jnp.concatenate([a[:, 1:, :], zrow], axis=1)      # row h+1
        return jnp.concatenate([up, a, down], axis=-1).reshape(BH, 3 * wc)

    # ---- conv1 + BN1 + LIF1: one (B*H, 3*WC) x (3*WC, WP) MXU matmul ----
    lhs1 = shifted_stack(x, WC)
    y1 = jnp.dot(lhs1, wb1_ref[...], preferred_element_type=jnp.float32)
    # spike = heaviside(y/tau - v_th) with BN shift folded into the threshold
    spk1 = (y1 >= thr1_ref[...]).astype(jnp.float32)   # (BH, WP) in {0,1}

    # ---- conv2 + BN2 + LIF2 on the spike map (same banded trick) ----
    # TODO(synk): spk1 is exactly {0,1}; a bf16 conv2 LHS would be exact and
    # faster on v6e/v7x, but the MXU is nowhere near the bottleneck here.
    lhs2 = shifted_stack(spk1.reshape(B, H, WP), WP)
    y2 = jnp.dot(lhs2, wb2_ref[...], preferred_element_type=jnp.float32)
    spk2 = (y2 >= thr2_ref[...]).astype(jnp.float32)   # (BH, WP)

    # ---- residual connection, directly in the lane-dense layout ----
    # TODO(synk): stride>1 / downsample path not implemented (this instance
    # uses stride=1, downsample=None, so identity == x and Cin == P).
    identity = x.reshape(BH, WC)                       # WC == WP here
    if connect_f == 'ADD':
        res = spk2 + identity
    elif connect_f == 'AND':
        res = spk2 * identity
    elif connect_f == 'IAND':
        res = identity * (1.0 - spk2)
    else:
        raise NotImplementedError(connect_f)
    out_ref[...] = res.reshape(B, H, WP)               # unmasked 512-lane store


def _images_per_step(n):
    """Largest divisor of n that is <= 8 and keeps the grid length >= 2
    (so the 'parallel' axis can feed both v7x TensorCores)."""
    best = 1
    for b in range(1, n + 1):
        if n % b == 0 and b <= 8 and (n // b >= 2 or n == 1):
            best = b
    return best


def basic_block_forward_nhwc(x_nhwc, params, connect_f='ADD'):
    """x_nhwc: (N, H, W, Cin) float32. Returns (N, H, W, P) float32."""
    wb1, wb2, thr1, thr2 = params
    N, H, W, Cin = x_nhwc.shape
    WP = thr1.shape[-1]
    P = WP // W
    if Cin != P:
        raise NotImplementedError(
            "identity residual requires inplanes == planes "
            "(stride=1, downsample=None)")
    WC = W * Cin
    B = _images_per_step(N)

    # Last-dim merge/split reshapes are free (no HBM data movement).
    x_slab = x_nhwc.reshape(N, H, WC)

    kernel = functools.partial(basic_block_kernel, B=B, H=H, WC=WC, WP=WP,
                               connect_f=connect_f)
    out = pl.pallas_call(
        kernel,
        out_shape=jax.ShapeDtypeStruct((N, H, WP), jnp.float32),
        grid_spec=pltpu.PrefetchScalarGridSpec(
            num_scalar_prefetch=0,
            grid=(N // B,),
            in_specs=[
                pl.BlockSpec((B, H, WC), lambda n: (n, 0, 0)),
                # weights / thresholds: constant index maps -> DMA'd once.
                pl.BlockSpec((3 * WC, WP), lambda n: (0, 0)),
                pl.BlockSpec((3 * WP, WP), lambda n: (0, 0)),
                pl.BlockSpec((1, WP), lambda n: (0, 0)),
                pl.BlockSpec((1, WP), lambda n: (0, 0)),
            ],
            out_specs=pl.BlockSpec((B, H, WP), lambda n: (n, 0, 0)),
        ),
        compiler_params=pltpu.CompilerParams(
            dimension_semantics=("parallel",),
            vmem_limit_bytes=32 * 1024 * 1024),
    )(x_slab, wb1, wb2, thr1, thr2)

    return out.reshape(N, H, W, P)


def basic_block_forward(x_nchw, params, connect_f='ADD'):
    """NCHW adapter matching the PyTorch module interface.

    In a real NHWC pipeline these transposes would be dropped and
    basic_block_forward_nhwc used directly.
    """
    x_nhwc = jnp.transpose(x_nchw, (0, 2, 3, 1))
    out = basic_block_forward_nhwc(x_nhwc, params, connect_f)
    return jnp.transpose(out, (0, 3, 1, 2))


# ---------------- parameter construction (deterministic, synthetic) ----------
def _banded_conv_weight(w_oihw, scale, W):
    """OIHW conv3x3 weight (+ per-output-channel BN scale) -> banded
    (3*W*C, W*P) matrix so that the dy-row-shifted, K-stacked input
    (B*H, 3*W*C) @ banded == conv3x3(pad=1, stride=1) output in the merged
    (B*H, W*P) layout. Row index = dy*W*C + w_in*C + c, col = w_out*P + p."""
    w = np.asarray(w_oihw, np.float32)                    # (P, C, 3, 3)
    s = np.asarray(scale, np.float32)                     # (P,)
    P, C, _, _ = w.shape
    w_hwio = np.transpose(w, (2, 3, 1, 0)) * s[None, None, None, :]  # (3,3,C,P)
    banded = np.zeros((3, W, C, W, P), np.float32)
    for dy in range(3):
        for dx in range(3):
            for wo in range(W):
                wi = wo + dx - 1
                if 0 <= wi < W:
                    banded[dy, wi, :, wo, :] = w_hwio[dy, dx]
    return jnp.asarray(banded.reshape(3 * W * C, W * P))


def make_params(key, inplanes, planes, W):
    ks = jax.random.split(key, 10)
    w1_oihw = 0.2 * jax.random.normal(ks[0], (planes, inplanes, 3, 3), jnp.float32)
    w2_oihw = 0.2 * jax.random.normal(ks[1], (planes, planes, 3, 3), jnp.float32)

    def bn_params(kg, kb, km, kv, c):
        gamma = 1.0 + 0.1 * jax.random.normal(kg, (c,), jnp.float32)
        beta = 0.1 * jax.random.normal(kb, (c,), jnp.float32)
        rmean = 0.1 * jax.random.normal(km, (c,), jnp.float32)
        rvar = jax.random.uniform(kv, (c,), jnp.float32, 0.5, 1.5)
        return gamma, beta, rmean, rvar

    bn1 = bn_params(ks[2], ks[3], ks[4], ks[5], planes)
    bn2 = bn_params(ks[6], ks[7], ks[8], ks[9], planes)

    def fold(gamma, beta, mean, var):
        scale = gamma / jnp.sqrt(var + BN_EPS)
        shift = beta - mean * scale
        return scale, shift

    s1, b1 = fold(*bn1)
    s2, b2 = fold(*bn2)
    # BN scale folded into weights; BN shift + 1/tau folded into the LIF
    # threshold: spike = (conv_scaled >= tau*v_th - shift). Thresholds are
    # tiled to the lane-dense (1, W*P) layout (column index = w*P + p).
    wb1 = _banded_conv_weight(w1_oihw, s1, W)
    wb2 = _banded_conv_weight(w2_oihw, s2, W)
    thr1 = jnp.tile(TAU * V_TH - b1, W).reshape(1, W * planes)
    thr2 = jnp.tile(TAU * V_TH - b2, W).reshape(1, W * planes)

    kernel_params = (wb1, wb2, thr1, thr2)
    torch_style = (w1_oihw, bn1, w2_oihw, bn2)
    return kernel_params, torch_style


# ---------------- pure-JAX reference (mirrors the PyTorch forward) -----------
def reference(x_nchw, w1_oihw, bn1, w2_oihw, bn2, connect_f='ADD'):
    def conv(x, w):
        return jax.lax.conv_general_dilated(
            x, w, window_strides=(1, 1), padding=((1, 1), (1, 1)),
            dimension_numbers=('NCHW', 'OIHW', 'NCHW'),
            precision=jax.lax.Precision.HIGHEST)

    def bn(x, gamma, beta, mean, var):
        g = gamma[None, :, None, None]
        b = beta[None, :, None, None]
        m = mean[None, :, None, None]
        v = var[None, :, None, None]
        return (x - m) / jnp.sqrt(v + BN_EPS) * g + b

    def lif(x):
        return ((x / TAU) >= V_TH).astype(jnp.float32)

    out = lif(bn(conv(x_nchw, w1_oihw), *bn1))
    out = lif(bn(conv(out, w2_oihw), *bn2))
    if connect_f == 'ADD':
        return out + x_nchw
    elif connect_f == 'AND':
        return out * x_nchw
    elif connect_f == 'IAND':
        return x_nchw * (1.0 - out)
    raise NotImplementedError(connect_f)


if __name__ == "__main__":
    N, C, H, W = 4, 32, 16, 16          # inplanes = planes = 32, stride = 1
    key = jax.random.PRNGKey(0)
    kx, kp = jax.random.split(key)
    x = jax.random.normal(kx, (N, C, H, W), jnp.float32)

    kernel_params, torch_params = make_params(kp, C, C, W)

    out = basic_block_forward(x, kernel_params, connect_f='ADD')
    out = jax.block_until_ready(out)

    ref = reference(x, *torch_params, connect_f='ADD')
    assert out.shape == ref.shape, (out.shape, ref.shape)
    assert jnp.allclose(out, ref, atol=1e-4, rtol=1e-4), float(
        jnp.max(jnp.abs(out - ref)))

    print("KERNEL_OK")
</pallas_src>

<mosaic_0001>
module attributes {stable_mosaic.version = 11 : i64} {
  func.func @basic_block_kernel(%arg0: i32, %arg1: memref<2x16x512xf32, #tpu.memory_space<vmem>>, %arg2: memref<1536x512xf32, #tpu.memory_space<vmem>>, %arg3: memref<1536x512xf32, #tpu.memory_space<vmem>>, %arg4: memref<1x512xf32, #tpu.memory_space<vmem>>, %arg5: memref<1x512xf32, #tpu.memory_space<vmem>>, %arg6: memref<2x16x512xf32, #tpu.memory_space<vmem>>) attributes {dimension_semantics = [#tpu.dimension_semantics<parallel>], iteration_bounds = array<i64: 2>, scalar_prefetch = 0 : i64, scratch_operands = 0 : i64, tpu.core_type = #tpu.core_type<tc>, window_params = [{transform_indices = @transform_0, window_bounds = array<i64: 2, 16, 512>}, {pipeline_mode = #tpu.pipeline_mode<synchronous>, transform_indices = @transform_1, window_bounds = array<i64: 1536, 512>}, {pipeline_mode = #tpu.pipeline_mode<synchronous>, transform_indices = @transform_2, window_bounds = array<i64: 1536, 512>}, {pipeline_mode = #tpu.pipeline_mode<synchronous>, transform_indices = @transform_3, window_bounds = array<i64: 1, 512>}, {pipeline_mode = #tpu.pipeline_mode<synchronous>, transform_indices = @transform_4, window_bounds = array<i64: 1, 512>}, {transform_indices = @transform_5, window_bounds = array<i64: 2, 16, 512>}]} {
    %c0 = arith.constant 0 : index
    %c0_0 = arith.constant 0 : index
    %c0_1 = arith.constant 0 : index
    %0 = vector.load %arg1[%c0, %c0_0, %c0_1] : memref<2x16x512xf32, #tpu.memory_space<vmem>>, vector<2x16x512xf32>
    %cst = arith.constant 0.000000e+00 : f32
    %1 = vector.broadcast %cst : f32 to vector<2x1x512xf32>
    %2 = vector.extract_strided_slice %0 {offsets = [0, 0, 0], sizes = [2, 15, 512], strides = [1, 1, 1]} : vector<2x16x512xf32> to vector<2x15x512xf32>
    %3 = tpu.concatenate %1, %2 in 1 : vector<2x1x512xf32>, vector<2x15x512xf32> -> vector<2x16x512xf32>
    %4 = vector.extract_strided_slice %0 {offsets = [0, 1, 0], sizes = [2, 15, 512], strides = [1, 1, 1]} : vector<2x16x512xf32> to vector<2x15x512xf32>
    %5 = tpu.concatenate %4, %1 in 1 : vector<2x15x512xf32>, vector<2x1x512xf32> -> vector<2x16x512xf32>
    %6 = tpu.concatenate %3, %0, %5 in 2 : vector<2x16x512xf32>, vector<2x16x512xf32>, vector<2x16x512xf32> -> vector<2x16x1536xf32>
    %7 = vector.shape_cast %6 : vector<2x16x1536xf32> to vector<32x1536xf32>
    %c0_2 = arith.constant 0 : index
    %c0_3 = arith.constant 0 : index
    %8 = vector.load %arg2[%c0_2, %c0_3] : memref<1536x512xf32, #tpu.memory_space<vmem>>, vector<1536x512xf32>
    %cst_4 = arith.constant dense<0.000000e+00> : vector<32x512xf32>
    %9 = tpu.matmul %7, %8, %cst_4 {dimension_numbers = #tpu.dot_dimension_numbers<[1], [0], [0], [1], [0, 0, 1, 1], [], []>} : vector<32x1536xf32>, vector<1536x512xf32>, vector<32x512xf32> -> vector<32x512xf32>
    %c0_5 = arith.constant 0 : index
    %c0_6 = arith.constant 0 : index
    %10 = vector.load %arg4[%c0_5, %c0_6] : memref<1x512xf32, #tpu.memory_space<vmem>>, vector<1x512xf32>
    %11 = vector.broadcast %10 : vector<1x512xf32> to vector<32x512xf32>
    %12 = arith.cmpf oge, %9, %11 : vector<32x512xf32>
    %13 = arith.extui %12 : vector<32x512xi1> to vector<32x512xi32>
    %14 = arith.sitofp %13 : vector<32x512xi32> to vector<32x512xf32>
    %15 = vector.shape_cast %14 : vector<32x512xf32> to vector<2x16x512xf32>
    %cst_7 = arith.constant 0.000000e+00 : f32
    %16 = vector.broadcast %cst_7 : f32 to vector<2x1x512xf32>
    %17 = vector.extract_strided_slice %15 {offsets = [0, 0, 0], sizes = [2, 15, 512], strides = [1, 1, 1]} : vector<2x16x512xf32> to vector<2x15x512xf32>
    %18 = tpu.concatenate %16, %17 in 1 : vector<2x1x512xf32>, vector<2x15x512xf32> -> vector<2x16x512xf32>
    %19 = vector.extract_strided_slice %15 {offsets = [0, 1, 0], sizes = [2, 15, 512], strides = [1, 1, 1]} : vector<2x16x512xf32> to vector<2x15x512xf32>
    %20 = tpu.concatenate %19, %16 in 1 : vector<2x15x512xf32>, vector<2x1x512xf32> -> vector<2x16x512xf32>
    %21 = tpu.concatenate %18, %15, %20 in 2 : vector<2x16x512xf32>, vector<2x16x512xf32>, vector<2x16x512xf32> -> vector<2x16x1536xf32>
    %22 = vector.shape_cast %21 : vector<2x16x1536xf32> to vector<32x1536xf32>
    %c0_8 = arith.constant 0 : index
    %c0_9 = arith.constant 0 : index
    %23 = vector.load %arg3[%c0_8, %c0_9] : memref<1536x512xf32, #tpu.memory_space<vmem>>, vector<1536x512xf32>
    %cst_10 = arith.constant dense<0.000000e+00> : vector<32x512xf32>
    %24 = tpu.matmul %22, %23, %cst_10 {dimension_numbers = #tpu.dot_dimension_numbers<[1], [0], [0], [1], [0, 0, 1, 1], [], []>} : vector<32x1536xf32>, vector<1536x512xf32>, vector<32x512xf32> -> vector<32x512xf32>
    %c0_11 = arith.constant 0 : index
    %c0_12 = arith.constant 0 : index
    %25 = vector.load %arg5[%c0_11, %c0_12] : memref<1x512xf32, #tpu.memory_space<vmem>>, vector<1x512xf32>
    %26 = vector.broadcast %25 : vector<1x512xf32> to vector<32x512xf32>
    %27 = arith.cmpf oge, %24, %26 : vector<32x512xf32>
    %28 = arith.extui %27 : vector<32x512xi1> to vector<32x512xi32>
    %29 = arith.sitofp %28 : vector<32x512xi32> to vector<32x512xf32>
    %30 = vector.shape_cast %0 : vector<2x16x512xf32> to vector<32x512xf32>
    %31 = arith.addf %29, %30 : vector<32x512xf32>
    %32 = vector.shape_cast %31 : vector<32x512xf32> to vector<2x16x512xf32>
    %c0_13 = arith.constant 0 : index
    %c0_14 = arith.constant 0 : index
    %c0_15 = arith.constant 0 : index
    %33 = vector.load %arg6[%c0_13, %c0_14, %c0_15] : memref<2x16x512xf32, #tpu.memory_space<vmem>>, vector<2x16x512xf32>
    tpu.vector_store %arg6[%c0_13, %c0_14, %c0_15], %32 {strides = array<i32>} : memref<2x16x512xf32, #tpu.memory_space<vmem>>, vector<2x16x512xf32>,
    return
  }
  func.func @transform_0(%arg0: i32) -> (i32, i32, i32) {
    %c0_i32 = arith.constant 0 : i32
    %c0_i32_0 = arith.constant 0 : i32
    %c0_i32_1 = arith.constant 0 : i32
    return %arg0, %c0_i32, %c0_i32_0 : i32, i32, i32
  }
  func.func @transform_1(%arg0: i32) -> (i32, i32) {
    %c0_i32 = arith.constant 0 : i32
    %c0_i32_0 = arith.constant 0 : i32
    %c0_i32_1 = arith.constant 0 : i32
    return %c0_i32, %c0_i32_0 : i32, i32
  }
  func.func @transform_2(%arg0: i32) -> (i32, i32) {
    %c0_i32 = arith.constant 0 : i32
    %c0_i32_0 = arith.constant 0 : i32
    %c0_i32_1 = arith.constant 0 : i32
    return %c0_i32, %c0_i32_0 : i32, i32
  }
  func.func @transform_3(%arg0: i32) -> (i32, i32) {
    %c0_i32 = arith.constant 0 : i32
    %c0_i32_0 = arith.constant 0 : i32
    %c0_i32_1 = arith.constant 0 : i32
    return %c0_i32, %c0_i32_0 : i32, i32
  }
  func.func @transform_4(%arg0: i32) -> (i32, i32) {
    %c0_i32 = arith.constant 0 : i32
    %c0_i32_0 = arith.constant 0 : i32
    %c0_i32_1 = arith.constant 0 : i32
    return %c0_i32, %c0_i32_0 : i32, i32
  }
  func.func @transform_5(%arg0: i32) -> (i32, i32, i32) {
    %c0_i32 = arith.constant 0 : i32
    %c0_i32_0 = arith.constant 0 : i32
    %c0_i32_1 = arith.constant 0 : i32
    return %arg0, %c0_i32, %c0_i32_0 : i32, i32, i32
  }
}

</mosaic_0001>

<bundles_post_ra>
// kernel: tpu_custom_call.1
= control target key start
LH: loop header
LB: loop body
LE: loop exit
PB: predicated region body
PF: predicated region fallthrough
CT: control target
= control target key end

     0   :  { %10 = vsyncpa [#allocation3], 0  ;;  %s7956_s0 = inlined_call_operand.hbm [shape: f32[4,16,512], index: 0, kind: input, shape index: {}]   ;;  %s7957_s1 = inlined_call_operand.hbm [shape: f32[1536,512], index: 1, kind: input, shape index: {}]   ;;  %s7958_s2 = inlined_call_operand.hbm [shape: f32[1536,512], index: 2, kind: input, shape index: {}]   ;;  %s7959_s3 = inlined_call_operand.hbm [shape: f32[1,512], index: 3, kind: input, shape index: {}]   ;;  %s7960_s4 = inlined_call_operand.hbm [shape: f32[1,512], index: 4, kind: input, shape index: {}]   ;;  %s7961_s5 = inlined_call_operand.hbm [shape: f32[4,16,512], index: 5, kind: output, shape index: {}]  }
   0x1   :  { %12 = vsyncpa [#allocation3 + $0x1], 0 }
   0x2   :  { %13 = vsyncpa [#allocation6], 0 }
   0x3   :  { %14 = vsyncpa [#allocation9], 0 }
   0x4   :  { %15 = vsyncpa [#allocation4], 0 }
   0x5   :  { %17 = vsyncpa [#allocation4 + $0x1], 0  ;;  %s6788_s18 = smov 0   ;;  %s6790_s19 = smov 0  }
   0x6   :  { %s6792_s20 = smov 0   ;;  %s6794_s21 = smov 0  }
   0x7 LB: > { %s6809_s22 = sadd.s32 4294967295, %s6744_s21   ;;  %s4512_s23 = sadd.s32 4294967294, %s6744_s21   ;;  %s6744_s21 = sphi %s6794_s21, %s8036_s21   ;;  %s6740_s20 = sphi %s6792_s20, %s8035_s20   ;;  %s6736_s19 = sphi %s6790_s19, %s8034_s19   ;;  %s6732_s18 = sphi %s6788_s18, %s8033_s18  }
   0x8   : > { %p43_p0 = scmp.ne.s32.totalorder %s6736_s19, %s6732_s18  ;;  %p7962_p1 = scmp.eq.s32.totalorder %s6809_s22, 0 }
   0x9   : > { %p157_p3 = scmp.eq.s32.totalorder %s4512_s23, 1  ;;  %p4513_p5 = scmp.ge.s32.totalorder %s6744_s21, 1 }
   0xa   : > { %p6818_p4 = por %p7962_p1, %p43_p0  ;;  %p164_p7 = scmp.lt.s32.totalorder %s6744_s21, 3 }
   0xb   : > { %p6823_p6 = por %p157_p3, %p43_p0  ;;  %s6746_s27 = smov [#allocation5]  }
   0xc   : > { %s7987_s24 = scalar_select %p6818_p4, 1, 0 }
   0xd   : > { %s7988_s25 = scalar_select %p6823_p6, 1, 0 }
   0xe   : > { %p6828_p8 = pnand %p4513_p5, %p164_p7  ;;  %s176_s28 = sshll.u32 %s6746_s27, 4  ;;  %s6832_s28 = int_to_ptr.vmem [resolvable:$true] %s176_s28 }
   0xf   : > { %s6747_s30 = smov [#allocation8]   ;;  %s6748_s7 = smov [#allocation7]  }
  0x10   : > { %s7989_s26 = scalar_select %p6828_p8, 1, 0 }
  0x11   : > { %p6416_p9 = pneg %p6828_p8  ;;  %s203_s6 = sshll.u32 %s6747_s30, 4  ;;  %s6843_s6 = int_to_ptr.vmem [resolvable:$true] %s203_s6 }
  0x12   : > { %s6845_s8 = sshll.u32 %s6748_s7, 4  ;;  %s6528_s11 = scalar_lea.hbm %s7957_s1, 98304  ;;  %s190_s8 = int_to_ptr.vmem [resolvable:$true] %s6845_s8 }
  0x13   : > { %p6839_p11 = pnand %p6416_p9, %p7962_p1  ;;  %p6529_p12 = scmp.ne.s32.totalorder %s7957_s1, %s6528_s11 }
  0x14   : > { %p6535_p5 = scmp.lt.u32.totalorder %s6528_s11, %s7957_s1 }
  0x15   : > { %p6855_p13 = pneg %p6839_p11 }
  0x17   : > { %p6531_p0 = pnand %p6855_p13, %p6529_p12 }
  0x19   : > { %p6532_p3 = pneg %p6531_p0 }
  0x1b   : > { %p6537_p7 = pnand %p6535_p5, %p6532_p3 }
  0x1d   : > { %6540 = shalt.err (!%p6537_p7)
}
  0x1e   : > { %s6541_s17 = scalar_lea.vmem %s6832_s28, 98304  ;;  %p6549_p2 = scmp.lt.s32.totalorder %s6832_s28, %s6832_s28 }
  0x1f   : > { %p6542_p9 = scmp.ne.s32.totalorder %s6832_s28, %s6541_s17  ;;  %p6550_p6 = scmp.lt.s32.totalorder %s6541_s17, %s6541_s17 }
  0x21   : > { %p6544_p10 = pnand %p6542_p9, %p6855_p13  ;;  %p6551_p12 = por %p6550_p6, %p6549_p2 }
  0x23   : > { %p6545_p1 = pneg %p6544_p10 }
  0x25   : > { %p6552_p0 = pnand %p6551_p12, %p6545_p1 }
  0x27   : > { %6555 = shalt.err (!%p6552_p0)
}
  0x28   : > { %s6749_s23 = smov 512   ;;  %s6750_s27 = smov 32  }
  0x29   : > { %6419 = dma.hbm_to_vmem [thread:$0]  (!%p6839_p11), %s7957_s1, 98304, %s6832_s28, [#allocation6], %s6749_s23, %s6749_s23, %s6750_s27  }
  0x2a   : > { %s6556_s11 = scalar_lea.hbm %s7959_s3, 64 }
  0x2b   : > { %p6557_p1 = scmp.ne.s32.totalorder %s7959_s3, %s6556_s11  ;;  %p6563_p10 = scmp.lt.u32.totalorder %s6556_s11, %s7959_s3 }
  0x2d   : > { %p6559_p2 = pnand %p6557_p1, %p6855_p13 }
  0x2f   : > { %p6560_p6 = pneg %p6559_p2 }
  0x31   : > { %p6565_p3 = pnand %p6563_p10, %p6560_p6 }
  0x33   : > { %6568 = shalt.err (!%p6565_p3)
}
  0x34   : > { %s6569_s28 = scalar_lea.vmem %s6843_s6, 64  ;;  %p6577_p12 = scmp.lt.s32.totalorder %s6843_s6, %s6843_s6 }
  0x35   : > { %p6570_p5 = scmp.ne.s32.totalorder %s6843_s6, %s6569_s28  ;;  %p6578_p0 = scmp.lt.s32.totalorder %s6569_s28, %s6569_s28 }
  0x37   : > { %p6572_p7 = pnand %p6570_p5, %p6855_p13  ;;  %p6579_p1 = por %p6578_p0, %p6577_p12 }
  0x39   : > { %p6573_p9 = pneg %p6572_p7 }
  0x3b   : > { %p6580_p2 = pnand %p6579_p1, %p6573_p9 }
  0x3d   : > { %6583 = shalt.err (!%p6580_p2)
}
  0x3e   : > { %6425 = dma.hbm_to_vmem [thread:$0]  (!%p6839_p11), %s7959_s3, 64, %s6843_s6, [#allocation9]  }
  0x3f   : > { %s6584_s10 = scalar_lea.hbm %s7958_s2, 98304 }
  0x40   : > { %p6585_p6 = scmp.ne.s32.totalorder %s7958_s2, %s6584_s10  ;;  %p6591_p5 = scmp.lt.u32.totalorder %s6584_s10, %s7958_s2 }
  0x42   : > { %p6587_p10 = pnand %p6585_p6, %p6855_p13 }
  0x44   : > { %p6588_p3 = pneg %p6587_p10 }
  0x46   : > { %p6593_p7 = pnand %p6591_p5, %p6588_p3 }
  0x48   : > { %6596 = shalt.err (!%p6593_p7)
}
  0x49   : > { %s6597_s16 = scalar_lea.vmem %s190_s8, 98304  ;;  %p6605_p1 = scmp.lt.s32.totalorder %s190_s8, %s190_s8 }
  0x4a   : > { %p6598_p9 = scmp.ne.s32.totalorder %s190_s8, %s6597_s16  ;;  %p6606_p2 = scmp.lt.s32.totalorder %s6597_s16, %s6597_s16 }
  0x4c   : > { %p6600_p12 = pnand %p6598_p9, %p6855_p13  ;;  %p6607_p4 = por %p6606_p2, %p6605_p1 }
  0x4e   : > { %p6601_p0 = pneg %p6600_p12 }
  0x50   : > { %p6608_p8 = pnand %p6607_p4, %p6601_p0 }
  0x52   : > { %6611 = shalt.err (!%p6608_p8)
}
  0x53   : > { %6422 = dma.hbm_to_vmem [thread:$0]  (!%p6839_p11), %s7958_s2, 98304, %s190_s8, [#allocation6], %s6749_s23, %s6749_s23, %s6750_s27  }
  0x54   : > { %s6751_s17 = smov [#allocation10]   ;;  %s6612_s10 = scalar_lea.hbm %s7960_s4, 64 }
  0x55   : > { %s214_s30 = sshll.u32 %s6751_s17, 4  ;;  %p6613_p4 = scmp.ne.s32.totalorder %s7960_s4, %s6612_s10  ;;  %s215_s30 = int_to_ptr.vmem [resolvable:$true] %s214_s30 }
  0x56   : > { %p6619_p10 = scmp.lt.u32.totalorder %s6612_s10, %s7960_s4 }
  0x57   : > { %p6615_p8 = pnand %p6613_p4, %p6855_p13 }
  0x59   : > { %p6616_p6 = pneg %p6615_p8 }
  0x5b   : > { %p6621_p3 = pnand %p6619_p10, %p6616_p6 }
  0x5d   : > { %6624 = shalt.err (!%p6621_p3)
}
  0x5e   : > { %s6625_s8 = scalar_lea.vmem %s215_s30, 64  ;;  %p6633_p12 = scmp.lt.s32.totalorder %s215_s30, %s215_s30 }
  0x5f   : > { %p6626_p5 = scmp.ne.s32.totalorder %s215_s30, %s6625_s8  ;;  %p6634_p0 = scmp.lt.s32.totalorder %s6625_s8, %s6625_s8 }
  0x61   : > { %p6628_p7 = pnand %p6626_p5, %p6855_p13  ;;  %p6635_p1 = por %p6634_p0, %p6633_p12 }
  0x63   : > { %p6629_p9 = pneg %p6628_p7 }
  0x65   : > { %p6636_p2 = pnand %p6635_p1, %p6629_p9 }
  0x67   : > { %6639 = shalt.err (!%p6636_p2)
}
  0x68   : > { %6428 = dma.hbm_to_vmem [thread:$0]  (!%p6839_p11), %s7960_s4, 64, %s215_s30, [#allocation9]  }
  0x69   : > { %s6943_s14 = sadd.s32 1, %s6744_s21   ;;  %s30_s28 = sadd.s32 1, %s6740_s20 }
  0x6a   : > { %s27_s29 = ssub.s32 %s6744_s21, %s6943_s14  ;;  %p37_p13 = scmp.ne.s32.totalorder %s6740_s20, %s6736_s19 }
  0x6b   : > { %p28_p4 = scmp.eq.s32.totalorder %s27_s29, 0  ;;  %p38_p8 = scmp.eq.s32.totalorder %s6744_s21, 0 }
  0x6c   : > { %p7992_p6 = scmp.eq.s32.totalorder %s6809_s22, 1  ;;  %p6441_p3 = scmp.lt.s32.totalorder %s6744_s21, 2 }
  0x6d   : > { %s6959_s7 = scalar_select %p28_p4, %s6740_s20, %s30_s28  }
  0x6e   : > { %p6953_p10 = por %p7992_p6, %p37_p13  ;;  %p39_p5 = por %p38_p8, %p37_p13 }
  0x6f   : > { %s225_s9 = sand.u32 1, %s6740_s20   ;;  %s4697_s30 = sshll.u32 %s6744_s21, 11 }
  0x70   : > { %s4519_s10 = sshll.u32 %s225_s9, 7  ;;  %s6966_s13 = scalar_lea.hbm %s7956_s0, %s4697_s30 }
  0x71   : > { %s229_s15 = scalar_lea.vmem [#allocation2], %s4519_s10  ;;  %p6970_p11 = pnand %p6441_p3, %p39_p5 }
  0x72   : > { %s237_s8 = sshll.u32 %s229_s15, 4  ;;  %s6974_s6 = scalar_lea.sflag [#allocation3], %s225_s9  ;;  %s6968_s8 = int_to_ptr.vmem [resolvable:$true] %s237_s8 }
  0x73   : > { %s6640_s28 = scalar_lea.hbm %s6966_s13, 2048  ;;  %p6642_p9 = pneg %p6970_p11 }
  0x74   : > { %p6641_p7 = scmp.ne.s32.totalorder %s6966_s13, %s6640_s28  ;;  %s6645_s30 = scalar_lea.hbm %s7956_s0, 4096 }
  0x75   : > { %p6646_p1 = scmp.lt.u32.totalorder %s6966_s13, %s7956_s0  ;;  %p6647_p2 = scmp.lt.u32.totalorder %s6645_s30, %s6640_s28 }
  0x76   : > { %p6643_p12 = pnand %p6642_p9, %p6641_p7  ;;  %p6649_p4 = scmp.lt.u32.totalorder %s6640_s28, %s6966_s13 }
  0x77   : > { %p6648_p13 = por %p6647_p2, %p6646_p1 }
  0x78   : > { %p6644_p0 = pneg %p6643_p12 }
  0x79   : > { %p6650_p8 = por %p6649_p4, %p6648_p13 }
  0x7b   : > { %p6651_p6 = pnand %p6650_p8, %p6644_p0 }
  0x7d   : > { %6654 = shalt.err (!%p6651_p6)
}
  0x7e   : > { %s6655_s9 = scalar_lea.vmem %s6968_s8, 2048  ;;  %s6752_s15 = smov [#allocation2]  }
  0x7f   : > { %p6656_p3 = scmp.ne.s32.totalorder %s6968_s8, %s6655_s9  ;;  %s6660_s29 = sshll.u32 %s6752_s15, 4  ;;  %s6661_s29 = int_to_ptr.vmem [resolvable:$false] %s6660_s29 }
  0x80   : > { %s6662_s10 = scalar_lea.vmem %s6661_s29, 4096  ;;  %p6663_p12 = scmp.lt.s32.totalorder %s6968_s8, %s6661_s29 }
  0x81   : > { %p6658_p5 = pnand %p6656_p3, %p6642_p9  ;;  %p6664_p1 = scmp.lt.s32.totalorder %s6662_s10, %s6655_s9 }
  0x83   : > { %p6659_p7 = pneg %p6658_p5  ;;  %p6665_p2 = por %p6664_p1, %p6663_p12 }
  0x85   : > { %p6666_p13 = pnand %p6665_p2, %p6659_p7 }
  0x87   : > { %6669 = shalt.err (!%p6666_p13)
}
  0x88   : > { %6432 = dma.hbm_to_vmem [thread:$0]  (!%p6970_p11), %s6966_s13, 2048, %s6968_s8, %s6974_s6, %s6749_s23, %s6749_s23, %s6750_s27  }
  0x89   : > { %p7995_p9 = scmp.ne.s32.totalorder %s7989_s26, 0 }
  0x8b   : > { %249 = sbr.rel (%p7995_p9) target bundleno = 1329 (0x531), region = 40 }
  0x92   : > { %s7008_s28 = sand.u32 1, %s6736_s19   ;;  %p7996_p0 = scmp.ne.s32.totalorder %s7987_s24, 0 }
  0x93   : > { %s4524_s30 = sshll.u32 %s7008_s28, 7  ;;  %s252_s11 = scalar_lea.sflag [#allocation3], %s7008_s28 }
  0x94   : > { %s7014_s16 = scalar_lea.vmem [#allocation2], %s4524_s30 }
  0x95   : > { %6715 = dma.done.wait (%p7996_p0), %s252_s11, 2048  }
  0x96   : > { %6717 = vsyncadd (%p7996_p0), %s252_s11, 4294965248  ;;  %p7997_p11 = scmp.eq.s32.totalorder %s6809_s22, 0 }
  0x98   : > { %6719 = dma.done.wait (%p7997_p11), [#allocation6], 196608   ;;  %p7998_p4 = pmov %p7997_p11 }
  0x9a   : > { %6721 = vsyncadd (%p7998_p4), [#allocation6], 4294770688  ;;  %p7999_p8 = pmov %p7998_p4 }
  0x9b   : > { %p8000_p6 = pmov %p7998_p4 }
  0x9c   : > { %6723 = dma.done.wait (%p7999_p8), [#allocation9], 128  }
  0x9d   : > { %6725 = vsyncadd (%p8000_p6), [#allocation9], 4294967168  ;;  %v431_v0 = vld [vmem:[#allocation5 + $0x8] sm:$0xff]  ;;  %v433_v2 = vld [vmem:[#allocation5 + $0x18] sm:$0xff]  ;;  %vm332_vm0 = vcmask 1040384   ;;  %vm381_vm2 = vcmask 1046528  }
  0x9e   : > { %v435_v1 = vld [vmem:[#allocation5 + $0x28] sm:$0xff]  ;;  %v437_v4 = vld [vmem:[#allocation5 + $0x38] sm:$0xff]  ;;  %v430_v5 = vld [vmem:[#allocation5] sm:$0xff]  ;;  %s7848_s24 = scalar_lea.vmem [#allocation11], %s4524_s30  ;;  %s4699_s26 = sshll.u32 %s6809_s22, 11 }
  0x9f   : > { %v4700_v3 = vpack.c.bf16 %v435_v1, %v431_v0  ;;  %v434_v6 = vld [vmem:[#allocation5 + $0x20] sm:$0xff]  ;;  %v5084_v7 = vpack.c.bf16 %v437_v4, %v433_v2  ;;  %v432_v9 = vld [vmem:[#allocation5 + $0x10] sm:$0xff]  ;;  %v439_v11 = vld [vmem:[#allocation5 + $0x48] sm:$0xff]  ;;  %s4401_s23 = sshll.u32 %s7848_s24, 4  ;;  %s7906_s13 = scalar_lea.hbm %s7961_s5, %s4699_s26  ;;  %s7908_s23 = int_to_ptr.vmem [resolvable:$true] %s4401_s23 }
  0xa0   : > { %v4702_v8 = vpack.c.bf16 %v434_v6, %v430_v5  ;;  %v436_v10 = vld [vmem:[#allocation5 + $0x30] sm:$0xff]  ;;  %v443_v13 = vld [vmem:[#allocation5 + $0x68] sm:$0xff]  ;;  %v441_v14 = vld [vmem:[#allocation5 + $0x58] sm:$0xff]  ;;  %s4387_s8 = scalar_lea.sflag [#allocation4], %s7008_s28  ;;  %s6670_s6 = scalar_lea.vmem %s7908_s23, 2048 }
  0xa1   : > { %4701 = vmatprep.subr.bf16.mxu0 %v4700_v3  ;;  %v5086_v12 = vpack.c.bf16 %v436_v10, %v432_v9  ;;  %v445_v15 = vld [vmem:[#allocation5 + $0x78] sm:$0xff]  ;;  %5085 = vmatprep.subr.bf16.mxu1 %v5084_v7  ;;  %v4704_v16 = vpack.c.bf16 %v443_v13, %v439_v11  ;;  %v438_v18 = vld [vmem:[#allocation5 + $0x40] sm:$0xff]  ;;  %v440_v20 = vld [vmem:[#allocation5 + $0x50] sm:$0xff]  ;;  %p6671_p3 = scmp.ne.s32.totalorder %s7908_s23, %s6670_s6  ;;  %s6755_s12 = smov [#allocation11]  }
  0xa2   : > { %4703 = vmatpush1.bf16.msra.mxu0 %v4702_v8  ;;  %v5088_v17 = vpack.c.bf16 %v445_v15, %v441_v14  ;;  %v442_v19 = vld [vmem:[#allocation5 + $0x60] sm:$0xff]  ;;  %v444_v22 = vld [vmem:[#allocation5 + $0x70] sm:$0xff]  ;;  %v447_v23 = vld [vmem:[#allocation5 + $0x88] sm:$0xff]  ;;  %s6674_s9 = sshll.u32 %s6755_s12, 4  ;;  %s6675_s9 = int_to_ptr.vmem [resolvable:$false] %s6674_s9 }
  0xa3   : > { %5087 = vmatpush1.bf16.msra.mxu1 %v5086_v12  ;;  %v4706_v21 = vpack.c.bf16 %v442_v19, %v438_v18  ;;  %v451_v24 = vld [vmem:[#allocation5 + $0xa8] sm:$0xff]  ;;  %4705 = vmatprep.subr.bf16.mxu0 %v4704_v16  ;;  %v5090_v25 = vpack.c.bf16 %v444_v22, %v440_v20  ;;  %v449_v27 = vld [vmem:[#allocation5 + $0x98] sm:$0xff]  ;;  %v446_v29 = vld [vmem:[#allocation5 + $0x80] sm:$0xff]  ;;  %p6672_p5 = pnand %p6671_p3, %p6953_p10  ;;  %s6676_s15 = scalar_lea.vmem %s6675_s9, 4096 }
  0xa4   : > { %5089 = vmatprep.subr.bf16.mxu1 %v5088_v17  ;;  %v4708_v26 = vpack.c.bf16 %v451_v24, %v447_v23  ;;  %v453_v28 = vld [vmem:[#allocation5 + $0xb8] sm:$0xff]  ;;  %v450_v31 = vld [vmem:[#allocation5 + $0xa0] sm:$0xff]  ;;  %v448_v32 = vld [vmem:[#allocation5 + $0x90] sm:$0xff]  ;;  %p6677_p12 = scmp.lt.s32.totalorder %s7908_s23, %s6675_s9  ;;  %p6678_p1 = scmp.lt.s32.totalorder %s6676_s15, %s6670_s6 }
  0xa5   : > { %v5092_v30 = vpack.c.bf16 %v453_v28, %v449_v27  ;;  %v452_v33 = vld [vmem:[#allocation5 + $0xb0] sm:$0xff]  ;;  %v4710_v34 = vpack.c.bf16 %v450_v31, %v446_v29  ;;  %v455_v35 = vld [vmem:[#allocation5 + $0xc8] sm:$0xff]  ;;  %v457_v37 = vld [vmem:[#allocation5 + $0xd8] sm:$0xff]  ;;  %p6673_p7 = pneg %p6672_p5 }
  0xa6   : > { %4707 = vmatpush1.bf16.msra.mxu0 %v4706_v21  ;;  %v459_v36 = vld [vmem:[#allocation5 + $0xe8] sm:$0xff]  ;;  %v5094_v38 = vpack.c.bf16 %v452_v33, %v448_v32  ;;  %v461_v40 = vld [vmem:[#allocation5 + $0xf8] sm:$0xff]  ;;  %v454_v41 = vld [vmem:[#allocation5 + $0xc0] sm:$0xff]  ;;  %p6679_p2 = por %p6678_p1, %p6677_p12 }
  0xa7   : > { %5091 = vmatpush1.bf16.msra.mxu1 %v5090_v25  ;;  %4709 = vmatprep.subr.bf16.mxu0 %v4708_v26  ;;  %v4712_v39 = vpack.c.bf16 %v459_v36, %v455_v35  ;;  %v458_v42 = vld [vmem:[#allocation5 + $0xe0] sm:$0xff]  ;;  %v5096_v43 = vpack.c.bf16 %v461_v40, %v457_v37  ;;  %v456_v44 = vld [vmem:[#allocation5 + $0xd0] sm:$0xff]  ;;  %v463_v46 = vld [vmem:[#allocation5 + $0x108] sm:$0xff] }
  0xa8   : > { %5093 = vmatprep.subr.bf16.mxu1 %v5092_v30  ;;  %v460_v45 = vld [vmem:[#allocation5 + $0xf0] sm:$0xff]  ;;  %v467_v47 = vld [vmem:[#allocation5 + $0x128] sm:$0xff]  ;;  %v465_v48 = vld [vmem:[#allocation5 + $0x118] sm:$0xff]  ;;  %v4714_v50 = vpack.c.bf16 %v458_v42, %v454_v41  ;;  %p6680_p13 = pnand %p6679_p2, %p6673_p7 }
  0xa9   : > { %v469_v49 = vld [vmem:[#allocation5 + $0x138] sm:$0xff]  ;;  %v5098_v51 = vpack.c.bf16 %v460_v45, %v456_v44  ;;  %v4716_v52 = vpack.c.bf16 %v467_v47, %v463_v46  ;;  %v462_v53 = vld [vmem:[#allocation5 + $0x100] sm:$0xff]  ;;  %v464_v55 = vld [vmem:[#allocation5 + $0x110] sm:$0xff] }
  0xaa   : > { %4711 = vmatpush1.bf16.msra.mxu0 %v4710_v34  ;;  %v466_v54 = vld [vmem:[#allocation5 + $0x120] sm:$0xff]  ;;  %v5100_v56 = vpack.c.bf16 %v469_v49, %v465_v48  ;;  %v468_v57 = vld [vmem:[#allocation5 + $0x130] sm:$0xff]  ;;  %v471_v58 = vld [vmem:[#allocation5 + $0x148] sm:$0xff] }
  0xab   : > { %5095 = vmatpush1.bf16.msra.mxu1 %v5094_v38  ;;  %4713 = vmatprep.subr.bf16.mxu0 %v4712_v39  ;;  %v475_v59 = vld [vmem:[#allocation5 + $0x168] sm:$0xff]  ;;  %v473_v60 = vld [vmem:[#allocation5 + $0x158] sm:$0xff]  ;;  %v4718_v62 = vpack.c.bf16 %v466_v54, %v462_v53  ;;  %v5102_v63 = vpack.c.bf16 %v468_v57, %v464_v55  ;;  %v470_v1 = vld [vmem:[#allocation5 + $0x140] sm:$0xff] }
  0xac   : > { %5097 = vmatprep.subr.bf16.mxu1 %v5096_v43  ;;  %v477_v61 = vld [vmem:[#allocation5 + $0x178] sm:$0xff]  ;;  %v4720_v0 = vpack.c.bf16 %v475_v59, %v471_v58  ;;  %v474_v2 = vld [vmem:[#allocation5 + $0x160] sm:$0xff]  ;;  %v472_v3 = vld [vmem:[#allocation5 + $0x150] sm:$0xff] }
  0xad   : > { %v5104_v4 = vpack.c.bf16 %v477_v61, %v473_v60  ;;  %v476_v5 = vld [vmem:[#allocation5 + $0x170] sm:$0xff]  ;;  %v479_v6 = vld [vmem:[#allocation5 + $0x188] sm:$0xff]  ;;  %v481_v8 = vld [vmem:[#allocation5 + $0x198] sm:$0xff]  ;;  %v4722_v10 = vpack.c.bf16 %v474_v2, %v470_v1 }
  0xae   : > { %4715 = vmatpush1.bf16.msra.mxu0 %v4714_v50  ;;  %v483_v7 = vld [vmem:[#allocation5 + $0x1a8] sm:$0xff]  ;;  %v485_v9 = vld [vmem:[#allocation5 + $0x1b8] sm:$0xff]  ;;  %v5106_v11 = vpack.c.bf16 %v476_v5, %v472_v3  ;;  %v478_v13 = vld [vmem:[#allocation5 + $0x180] sm:$0xff] }
  0xaf   : > { %5099 = vmatpush1.bf16.msra.mxu1 %v5098_v51  ;;  %4717 = vmatprep.subr.bf16.mxu0 %v4716_v52  ;;  %v4724_v12 = vpack.c.bf16 %v483_v7, %v479_v6  ;;  %v482_v14 = vld [vmem:[#allocation5 + $0x1a0] sm:$0xff]  ;;  %v480_v15 = vld [vmem:[#allocation5 + $0x190] sm:$0xff]  ;;  %v5108_v16 = vpack.c.bf16 %v485_v9, %v481_v8  ;;  %v487_v18 = vld [vmem:[#allocation5 + $0x1c8] sm:$0xff] }
  0xb0   : > { %5101 = vmatprep.subr.bf16.mxu1 %v5100_v56  ;;  %v484_v17 = vld [vmem:[#allocation5 + $0x1b0] sm:$0xff]  ;;  %v491_v19 = vld [vmem:[#allocation5 + $0x1e8] sm:$0xff]  ;;  %v489_v20 = vld [vmem:[#allocation5 + $0x1d8] sm:$0xff]  ;;  %v4726_v22 = vpack.c.bf16 %v482_v14, %v478_v13 }
  0xb1   : > { %v493_v21 = vld [vmem:[#allocation5 + $0x1f8] sm:$0xff]  ;;  %v5110_v23 = vpack.c.bf16 %v484_v17, %v480_v15  ;;  %v4728_v24 = vpack.c.bf16 %v491_v19, %v487_v18  ;;  %v486_v25 = vld [vmem:[#allocation5 + $0x1c0] sm:$0xff]  ;;  %v488_v27 = vld [vmem:[#allocation5 + $0x1d0] sm:$0xff] }
  0xb2   : > { %4719 = vmatpush1.bf16.msra.mxu0 %v4718_v62  ;;  %v490_v26 = vld [vmem:[#allocation5 + $0x1e0] sm:$0xff]  ;;  %v5112_v28 = vpack.c.bf16 %v493_v21, %v489_v20  ;;  %v492_v29 = vld [vmem:[#allocation5 + $0x1f0] sm:$0xff]  ;;  %v495_v30 = vld [vmem:[#allocation5 + $0x208] sm:$0xff] }
  0xb3   : > { %5103 = vmatpush1.bf16.msra.mxu1 %v5102_v63  ;;  %4721 = vmatprep.subr.bf16.mxu0 %v4720_v0  ;;  %v499_v31 = vld [vmem:[#allocation5 + $0x228] sm:$0xff]  ;;  %v497_v32 = vld [vmem:[#allocation5 + $0x218] sm:$0xff]  ;;  %v4730_v34 = vpack.c.bf16 %v490_v26, %v486_v25  ;;  %v5114_v35 = vpack.c.bf16 %v492_v29, %v488_v27  ;;  %v494_v37 = vld [vmem:[#allocation5 + $0x200] sm:$0xff] }
  0xb4   : > { %5105 = vmatprep.subr.bf16.mxu1 %v5104_v4  ;;  %v501_v33 = vld [vmem:[#allocation5 + $0x238] sm:$0xff]  ;;  %v4732_v36 = vpack.c.bf16 %v499_v31, %v495_v30  ;;  %v498_v38 = vld [vmem:[#allocation5 + $0x220] sm:$0xff]  ;;  %v496_v39 = vld [vmem:[#allocation5 + $0x210] sm:$0xff] }
  0xb5   : > { %v5116_v40 = vpack.c.bf16 %v501_v33, %v497_v32  ;;  %v500_v41 = vld [vmem:[#allocation5 + $0x230] sm:$0xff]  ;;  %v503_v42 = vld [vmem:[#allocation5 + $0x248] sm:$0xff]  ;;  %v505_v44 = vld [vmem:[#allocation5 + $0x258] sm:$0xff]  ;;  %v4734_v46 = vpack.c.bf16 %v498_v38, %v494_v37 }
  0xb6   : > { %4723 = vmatpush1.bf16.msra.mxu0 %v4722_v10  ;;  %v507_v43 = vld [vmem:[#allocation5 + $0x268] sm:$0xff]  ;;  %v509_v45 = vld [vmem:[#allocation5 + $0x278] sm:$0xff]  ;;  %v5118_v47 = vpack.c.bf16 %v500_v41, %v496_v39  ;;  %v502_v49 = vld [vmem:[#allocation5 + $0x240] sm:$0xff] }
  0xb7   : > { %5107 = vmatpush1.bf16.msra.mxu1 %v5106_v11  ;;  %4725 = vmatprep.subr.bf16.mxu0 %v4724_v12  ;;  %v4736_v48 = vpack.c.bf16 %v507_v43, %v503_v42  ;;  %v506_v50 = vld [vmem:[#allocation5 + $0x260] sm:$0xff]  ;;  %v504_v51 = vld [vmem:[#allocation5 + $0x250] sm:$0xff]  ;;  %v5120_v52 = vpack.c.bf16 %v509_v45, %v505_v44  ;;  %v511_v54 = vld [vmem:[#allocation5 + $0x288] sm:$0xff] }
  0xb8   : > { %5109 = vmatprep.subr.bf16.mxu1 %v5108_v16  ;;  %v508_v53 = vld [vmem:[#allocation5 + $0x270] sm:$0xff]  ;;  %v515_v55 = vld [vmem:[#allocation5 + $0x2a8] sm:$0xff]  ;;  %v513_v56 = vld [vmem:[#allocation5 + $0x298] sm:$0xff]  ;;  %v4738_v58 = vpack.c.bf16 %v506_v50, %v502_v49 }
  0xb9   : > { %v517_v57 = vld [vmem:[#allocation5 + $0x2b8] sm:$0xff]  ;;  %v5122_v59 = vpack.c.bf16 %v508_v53, %v504_v51  ;;  %v4740_v60 = vpack.c.bf16 %v515_v55, %v511_v54  ;;  %v510_v61 = vld [vmem:[#allocation5 + $0x280] sm:$0xff]  ;;  %v512_v63 = vld [vmem:[#allocation5 + $0x290] sm:$0xff] }
  0xba   : > { %4727 = vmatpush1.bf16.msra.mxu0 %v4726_v22  ;;  %v514_v62 = vld [vmem:[#allocation5 + $0x2a0] sm:$0xff]  ;;  %v5124_v0 = vpack.c.bf16 %v517_v57, %v513_v56  ;;  %v516_v1 = vld [vmem:[#allocation5 + $0x2b0] sm:$0xff]  ;;  %v519_v2 = vld [vmem:[#allocation5 + $0x2c8] sm:$0xff] }
  0xbb   : > { %5111 = vmatpush1.bf16.msra.mxu1 %v5110_v23  ;;  %4729 = vmatprep.subr.bf16.mxu0 %v4728_v24  ;;  %v523_v3 = vld [vmem:[#allocation5 + $0x2e8] sm:$0xff]  ;;  %v521_v4 = vld [vmem:[#allocation5 + $0x2d8] sm:$0xff]  ;;  %v4742_v6 = vpack.c.bf16 %v514_v62, %v510_v61  ;;  %v518_v7 = vld [vmem:[#allocation5 + $0x2c0] sm:$0xff]  ;;  %v5126_v8 = vpack.c.bf16 %v516_v1, %v512_v63 }
  0xbc   : > { %5113 = vmatprep.subr.bf16.mxu1 %v5112_v28  ;;  %v525_v5 = vld [vmem:[#allocation5 + $0x2f8] sm:$0xff]  ;;  %v4744_v9 = vpack.c.bf16 %v523_v3, %v519_v2  ;;  %v522_v10 = vld [vmem:[#allocation5 + $0x2e0] sm:$0xff]  ;;  %v520_v11 = vld [vmem:[#allocation5 + $0x2d0] sm:$0xff] }
  0xbd   : > { %v524_v12 = vld [vmem:[#allocation5 + $0x2f0] sm:$0xff]  ;;  %v5128_v13 = vpack.c.bf16 %v525_v5, %v521_v4  ;;  %v527_v14 = vld [vmem:[#allocation5 + $0x308] sm:$0xff]  ;;  %v529_v17 = vld [vmem:[#allocation5 + $0x318] sm:$0xff]  ;;  %v4746_v21 = vpack.c.bf16 %v522_v10, %v518_v7 }
  0xbe   : > { %4731 = vmatpush1.bf16.msra.mxu0 %v4730_v34  ;;  %v531_v15 = vld [vmem:[#allocation5 + $0x328] sm:$0xff]  ;;  %v533_v18 = vld [vmem:[#allocation5 + $0x338] sm:$0xff]  ;;  %vm7035_vm1 = vmneg %vm332_vm0  ;;  %v5130_v22 = vpack.c.bf16 %v524_v12, %v520_v11 }
  0xbf   : > { %5115 = vmatpush1.bf16.msra.mxu1 %v5114_v35  ;;  %4733 = vmatprep.subr.bf16.mxu0 %v4732_v36  ;;  %v7029_v16 = vld [vmem:[%s7014_s16 + $0x8] sm:$0xff]  ;;  %v4748_v23 = vpack.c.bf16 %v531_v15, %v527_v14  ;;  %v526_v24 = vld [vmem:[#allocation5 + $0x300] sm:$0xff]  ;;  %v528_v26 = vld [vmem:[#allocation5 + $0x310] sm:$0xff]  ;;  %v5132_v27 = vpack.c.bf16 %v533_v18, %v529_v17 }
  0xc0   : > { %5117 = vmatprep.subr.bf16.mxu1 %v5116_v40  ;;  %v7032_v19 = vrot.slane %v7029_v16, 7  ;;  %v530_v25 = vld [vmem:[#allocation5 + $0x320] sm:$0xff]  ;;  %v532_v28 = vld [vmem:[#allocation5 + $0x330] sm:$0xff]  ;;  %v535_v29 = vld [vmem:[#allocation5 + $0x348] sm:$0xff] }
  0xc1   : > { %v539_v30 = vld [vmem:[#allocation5 + $0x368] sm:$0xff]  ;;  %v537_v31 = vld [vmem:[#allocation5 + $0x358] sm:$0xff]  ;;  %v4750_v33 = vpack.c.bf16 %v530_v25, %v526_v24  ;;  %v5134_v34 = vpack.c.bf16 %v532_v28, %v528_v26  ;;  %v534_v36 = vld [vmem:[#allocation5 + $0x340] sm:$0xff] }
  0xc2   : > { %4735 = vmatpush1.bf16.msra.mxu0 %v4734_v46  ;;  %4531 = vmatprep.mubr.msk.f32.mxu0 %vm7035_vm1, %v7032_v19  ;;  %v541_v32 = vld [vmem:[#allocation5 + $0x378] sm:$0xff]  ;;  %v4752_v35 = vpack.c.bf16 %v539_v30, %v535_v29  ;;  %v538_v37 = vld [vmem:[#allocation5 + $0x360] sm:$0xff]  ;;  %v536_v38 = vld [vmem:[#allocation5 + $0x350] sm:$0xff] }
  0xc3   : > { %5119 = vmatpush1.bf16.msra.mxu1 %v5118_v47  ;;  %4737 = vmatprep.subr.bf16.mxu0 %v4736_v48  ;;  %v5136_v39 = vpack.c.bf16 %v541_v32, %v537_v31  ;;  %v540_v40 = vld [vmem:[#allocation5 + $0x370] sm:$0xff]  ;;  %v543_v41 = vld [vmem:[#allocation5 + $0x388] sm:$0xff]  ;;  %v545_v43 = vld [vmem:[#allocation5 + $0x398] sm:$0xff]  ;;  %v4754_v45 = vpack.c.bf16 %v538_v37, %v534_v36 }
  0xc4   : > { %5121 = vmatprep.subr.bf16.mxu1 %v5120_v52  ;;  %4555 = vmatprep.mubr.msk.f32.mxu1 %vm7035_vm1, %v7032_v19  ;;  %v547_v42 = vld [vmem:[#allocation5 + $0x3a8] sm:$0xff]  ;;  %v549_v44 = vld [vmem:[#allocation5 + $0x3b8] sm:$0xff]  ;;  %v5138_v46 = vpack.c.bf16 %v540_v40, %v536_v38  ;;  %v542_v48 = vld [vmem:[#allocation5 + $0x380] sm:$0xff] }
  0xc5   : > { %v4756_v47 = vpack.c.bf16 %v547_v42, %v543_v41  ;;  %v546_v49 = vld [vmem:[#allocation5 + $0x3a0] sm:$0xff]  ;;  %v544_v50 = vld [vmem:[#allocation5 + $0x390] sm:$0xff]  ;;  %v5140_v51 = vpack.c.bf16 %v549_v44, %v545_v43  ;;  %v551_v53 = vld [vmem:[#allocation5 + $0x3c8] sm:$0xff] }
  0xc6   : > { %4739 = vmatpush1.bf16.msra.mxu0 %v4738_v58  ;;  %v548_v52 = vld [vmem:[#allocation5 + $0x3b0] sm:$0xff]  ;;  %v555_v54 = vld [vmem:[#allocation5 + $0x3e8] sm:$0xff]  ;;  %v553_v55 = vld [vmem:[#allocation5 + $0x3d8] sm:$0xff]  ;;  %v4758_v57 = vpack.c.bf16 %v546_v49, %v542_v48 }
  0xc7   : > { %5123 = vmatpush1.bf16.msra.mxu1 %v5122_v59  ;;  %4741 = vmatprep.subr.bf16.mxu0 %v4740_v60  ;;  %v557_v56 = vld [vmem:[#allocation5 + $0x3f8] sm:$0xff]  ;;  %v5142_v58 = vpack.c.bf16 %v548_v52, %v544_v50  ;;  %v4760_v59 = vpack.c.bf16 %v555_v54, %v551_v53  ;;  %v550_v60 = vld [vmem:[#allocation5 + $0x3c0] sm:$0xff]  ;;  %v552_v62 = vld [vmem:[#allocation5 + $0x3d0] sm:$0xff] }
  0xc8   : > { %5125 = vmatprep.subr.bf16.mxu1 %v5124_v0  ;;  %v554_v61 = vld [vmem:[#allocation5 + $0x3e0] sm:$0xff]  ;;  %v5144_v63 = vpack.c.bf16 %v557_v56, %v553_v55  ;;  %v556_v0 = vld [vmem:[#allocation5 + $0x3f0] sm:$0xff]  ;;  %v559_v1 = vld [vmem:[#allocation5 + $0x408] sm:$0xff] }
  0xc9   : > { %v563_v2 = vld [vmem:[#allocation5 + $0x428] sm:$0xff]  ;;  %v561_v3 = vld [vmem:[#allocation5 + $0x418] sm:$0xff]  ;;  %v4762_v5 = vpack.c.bf16 %v554_v61, %v550_v60  ;;  %v5146_v7 = vpack.c.bf16 %v556_v0, %v552_v62  ;;  %v562_v10 = vld [vmem:[#allocation5 + $0x420] sm:$0xff] }
  0xca   : > { %4743 = vmatpush1.bf16.msra.mxu0 %v4742_v6  ;;  %v565_v4 = vld [vmem:[#allocation5 + $0x438] sm:$0xff]  ;;  %v300_v6 = vld [vmem:[%s7014_s16] sm:$0xff]  ;;  %v560_v11 = vld [vmem:[#allocation5 + $0x410] sm:$0xff] }
  0xcb   : > { %5127 = vmatpush1.bf16.msra.mxu1 %v5126_v8  ;;  %4745 = vmatprep.subr.bf16.mxu0 %v4744_v9  ;;  %v4764_v8 = vpack.c.bf16 %v563_v2, %v559_v1  ;;  %v558_v9 = vld [vmem:[#allocation5 + $0x400] sm:$0xff]  ;;  %v5148_v12 = vpack.c.bf16 %v565_v4, %v561_v3  ;;  %v567_v14 = vld [vmem:[#allocation5 + $0x448] sm:$0xff]  ;;  %v7046_v17 = vrot.slane %v300_v6, 7  ;;  %v569_v18 = vld [vmem:[#allocation5 + $0x458] sm:$0xff] }
  0xcc   : > { %5129 = vmatprep.subr.bf16.mxu1 %v5128_v13  ;;  %v564_v13 = vld [vmem:[#allocation5 + $0x430] sm:$0xff]  ;;  %v571_v15 = vld [vmem:[#allocation5 + $0x468] sm:$0xff]  ;;  %v566_v25 = vld [vmem:[#allocation5 + $0x440] sm:$0xff] }
  0xcd   : > { %v4768_v24 = vpack.c.bf16 %v571_v15, %v567_v14  ;;  %v570_v26 = vld [vmem:[#allocation5 + $0x460] sm:$0xff]  ;;  %v572_v29 = vld [vmem:[#allocation5 + $0x470] sm:$0xff]  ;;  %v575_v30 = vld [vmem:[#allocation5 + $0x488] sm:$0xff] }
  0xce   : > { %4747 = vmatpush1.bf16.msra.mxu0 %v4746_v21  ;;  %v573_v21 = vld [vmem:[#allocation5 + $0x478] sm:$0xff]  ;;  %v579_v31 = vld [vmem:[#allocation5 + $0x4a8] sm:$0xff]  ;;  %v574_v37 = vld [vmem:[#allocation5 + $0x480] sm:$0xff] }
  0xcf   : > { %5131 = vmatpush1.bf16.msra.mxu1 %v5130_v22  ;;  %4749 = vmatprep.subr.bf16.mxu0 %v4748_v23  ;;  %v4766_v22 = vpack.c.bf16 %v562_v10, %v558_v9  ;;  %v5150_v23 = vpack.c.bf16 %v564_v13, %v560_v11  ;;  %v5152_v28 = vpack.c.bf16 %v573_v21, %v569_v18  ;;  %v577_v32 = vld [vmem:[#allocation5 + $0x498] sm:$0xff]  ;;  %v578_v38 = vld [vmem:[#allocation5 + $0x4a0] sm:$0xff]  ;;  %v580_v41 = vld [vmem:[#allocation5 + $0x4b0] sm:$0xff] }
  0xd0   : > { %5133 = vmatprep.subr.bf16.mxu1 %v5132_v27  ;;  %v568_v27 = vld [vmem:[#allocation5 + $0x450] sm:$0xff]  ;;  %v4772_v36 = vpack.c.bf16 %v579_v31, %v575_v30  ;;  %v583_v42 = vld [vmem:[#allocation5 + $0x4c8] sm:$0xff]  ;;  %v585_v44 = vld [vmem:[#allocation5 + $0x4d8] sm:$0xff] }
  0xd1   : > { %v587_v43 = vld [vmem:[#allocation5 + $0x4e8] sm:$0xff]  ;;  %v582_v49 = vld [vmem:[#allocation5 + $0x4c0] sm:$0xff]  ;;  %v588_v53 = vld [vmem:[#allocation5 + $0x4f0] sm:$0xff] }
  0xd2   : > { %4751 = vmatpush1.bf16.msra.mxu0 %v4750_v33  ;;  %v581_v33 = vld [vmem:[#allocation5 + $0x4b8] sm:$0xff]  ;;  %v4776_v48 = vpack.c.bf16 %v587_v43, %v583_v42  ;;  %v586_v50 = vld [vmem:[#allocation5 + $0x4e0] sm:$0xff]  ;;  %v591_v54 = vld [vmem:[#allocation5 + $0x508] sm:$0xff] }
  0xd3   : > { %5135 = vmatpush1.bf16.msra.mxu1 %v5134_v34  ;;  %4753 = vmatprep.subr.bf16.mxu0 %v4752_v35  ;;  %v4770_v34 = vpack.c.bf16 %v570_v26, %v566_v25  ;;  %v5154_v35 = vpack.c.bf16 %v572_v29, %v568_v27  ;;  %v5156_v40 = vpack.c.bf16 %v581_v33, %v577_v32  ;;  %v595_v55 = vld [vmem:[#allocation5 + $0x528] sm:$0xff]  ;;  %v593_v56 = vld [vmem:[#allocation5 + $0x518] sm:$0xff]  ;;  %v594_v62 = vld [vmem:[#allocation5 + $0x520] sm:$0xff] }
  0xd4   : > { %5137 = vmatprep.subr.bf16.mxu1 %v5136_v39  ;;  %v576_v39 = vld [vmem:[#allocation5 + $0x490] sm:$0xff]  ;;  %v4780_v61 = vpack.c.bf16 %v595_v55, %v591_v54  ;;  %v599_v2 = vld [vmem:[#allocation5 + $0x548] sm:$0xff]  ;;  %v605_v6 = vld [vmem:[#allocation5 + $0x578] sm:$0xff] }
  0xd5   : > { %v596_v0 = vld [vmem:[#allocation5 + $0x530] sm:$0xff]  ;;  %v603_v3 = vld [vmem:[#allocation5 + $0x568] sm:$0xff]  ;;  %v598_v10 = vld [vmem:[#allocation5 + $0x540] sm:$0xff] }
  0xd6   : > { %4755 = vmatpush1.bf16.msra.mxu0 %v4754_v45  ;;  %v589_v45 = vld [vmem:[#allocation5 + $0x4f8] sm:$0xff]  ;;  %v305_v4 = vld [vmem:[%s7014_s16 + $0x28] sm:$0xff]  ;;  %v4784_v13 = vpack.c.bf16 %v603_v3, %v599_v2  ;;  %v602_v14 = vld [vmem:[#allocation5 + $0x560] sm:$0xff] }
  0xd7   : > { %5139 = vmatpush1.bf16.msra.mxu1 %v5138_v46  ;;  %4757 = vmatprep.subr.bf16.mxu0 %v4756_v47  ;;  %v4774_v46 = vpack.c.bf16 %v578_v38, %v574_v37  ;;  %v5158_v47 = vpack.c.bf16 %v580_v41, %v576_v39  ;;  %v5160_v52 = vpack.c.bf16 %v589_v45, %v585_v44  ;;  %v600_v15 = vld [vmem:[#allocation5 + $0x550] sm:$0xff]  ;;  %v309_v21 = vld [vmem:[%s7014_s16 + $0x48] sm:$0xff]  ;;  %v613_v29 = vld [vmem:[#allocation5 + $0x5b8] sm:$0xff] }
  0xd8   : > { %5141 = vmatprep.subr.bf16.mxu1 %v5140_v51  ;;  %v584_v51 = vld [vmem:[#allocation5 + $0x4d0] sm:$0xff]  ;;  %v611_v25 = vld [vmem:[#allocation5 + $0x5a8] sm:$0xff]  ;;  %v346_v27 = vrot.slane %v309_v21, 7  ;;  %v308_v30 = vld [vmem:[%s7014_s16 + $0x40] sm:$0xff]  ;;  %v4786_v31 = vpack.c.bf16 %v602_v14, %v598_v10 }
  0xd9   : > { %v5162_v60 = vpack.c.bf16 %v588_v53, %v584_v51  ;;  %v345_v32 = vrot.slane %v308_v30, 7  ;;  %v313_v33 = vld [vmem:[%s7014_s16 + $0x68] sm:$0xff]  ;;  %v608_v37 = vld [vmem:[#allocation5 + $0x590] sm:$0xff]  ;;  %v312_v42 = vld [vmem:[%s7014_s16 + $0x60] sm:$0xff] }
  0xda   : > { %4759 = vmatpush1.bf16.msra.mxu0 %v4758_v57  ;;  %v597_v57 = vld [vmem:[#allocation5 + $0x538] sm:$0xff]  ;;  %v351_v38 = vrot.slane %v313_v33, 7  ;;  %v619_v41 = vld [vmem:[#allocation5 + $0x5e8] sm:$0xff]  ;;  %v614_v51 = vld [vmem:[#allocation5 + $0x5c0] sm:$0xff] }
  0xdb   : > { %5143 = vmatpush1.bf16.msra.mxu1 %v5142_v58  ;;  %4761 = vmatprep.subr.bf16.mxu0 %v4760_v59  ;;  %v4778_v58 = vpack.c.bf16 %v586_v50, %v582_v49  ;;  %v590_v59 = vld [vmem:[#allocation5 + $0x500] sm:$0xff]  ;;  %v5164_v1 = vpack.c.bf16 %v597_v57, %v593_v56  ;;  %v617_v43 = vld [vmem:[#allocation5 + $0x5d8] sm:$0xff]  ;;  %v616_v53 = vld [vmem:[#allocation5 + $0x5d0] sm:$0xff] }
  0xdc   : > { %5145 = vmatprep.subr.bf16.mxu1 %v5144_v63  ;;  %v592_v63 = vld [vmem:[#allocation5 + $0x510] sm:$0xff]  ;;  %v4782_v9 = vpack.c.bf16 %v594_v62, %v590_v59  ;;  %v621_v44 = vld [vmem:[#allocation5 + $0x5f8] sm:$0xff]  ;;  %v352_v45 = vsel %vm332_vm0, %v346_v27, %v351_v38  ;;  %v623_v57 = vld [vmem:[#allocation5 + $0x608] sm:$0xff] }
  0xdd   : > { %v5176_v55 = vpack.c.bf16 %v621_v44, %v617_v43  ;;  %v620_v56 = vld [vmem:[#allocation5 + $0x5f0] sm:$0xff]  ;;  %v626_v2 = vld [vmem:[#allocation5 + $0x620] sm:$0xff]  ;;  %v647_v33 = vld [vmem:[#allocation5 + $0x6c8] sm:$0xff] }
  0xde   : > { %4763 = vmatpush1.bf16.msra.mxu0 %v4762_v5  ;;  %v601_v5 = vld [vmem:[#allocation5 + $0x558] sm:$0xff]  ;;  %v624_v3 = vld [vmem:[#allocation5 + $0x610] sm:$0xff]  ;;  %v634_v14 = vld [vmem:[#allocation5 + $0x660] sm:$0xff] }
  0xdf   : > { %5147 = vmatpush1.bf16.msra.mxu1 %v5146_v7  ;;  %4765 = vmatprep.subr.bf16.mxu0 %v4764_v8  ;;  %v339_v7 = vrot.slane %v305_v4, 7  ;;  %v304_v8 = vld [vmem:[%s7014_s16 + $0x20] sm:$0xff]  ;;  %v636_v21 = vld [vmem:[#allocation5 + $0x670] sm:$0xff]  ;;  %v655_v44 = vld [vmem:[#allocation5 + $0x708] sm:$0xff] }
  0xe0   : > { %5149 = vmatprep.subr.bf16.mxu1 %v5148_v12  ;;  %v337_v11 = vrot.slane %v304_v8, 7  ;;  %v5166_v12 = vpack.c.bf16 %v596_v0, %v592_v63  ;;  %v5178_v63 = vpack.c.bf16 %v620_v56, %v616_v53  ;;  %v633_v8 = vld [vmem:[#allocation5 + $0x658] sm:$0xff]  ;;  %v642_v30 = vld [vmem:[#allocation5 + $0x6a0] sm:$0xff]  ;;  %v652_v43 = vld [vmem:[#allocation5 + $0x6f0] sm:$0xff] }
  0xe1   : > { %4533 = vmatmul.mubr.msk.f32.vlgmr.msra.gmra.mrb[0].mxu0 %vm7035_vm1, %v7046_v17  ;;  %v340_v18 = vsel %vm332_vm0, %v7032_v19, %v339_v7  ;;  %v606_v19 = vld [vmem:[#allocation5 + $0x580] sm:$0xff]  ;;  %v635_v7 = vld [vmem:[#allocation5 + $0x668] sm:$0xff]  ;;  %v656_v53 = vld [vmem:[#allocation5 + $0x710] sm:$0xff] }
  0xe2   : > { %4767 = vmatpush1.bf16.msra.mxu0 %v4766_v22  ;;  %4557 = vmatmul.mubr.msk.f32.vlgmr.msra.gmra.mrb[0].mxu1 %vm7035_vm1, %v7046_v17  ;;  %v5168_v22 = vpack.c.bf16 %v605_v6, %v601_v5  ;;  %v338_v26 = vsel %vm332_vm0, %v7046_v17, %v337_v11  ;;  %v612_v17 = vld [vmem:[#allocation5 + $0x5b0] sm:$0xff]  ;;  %v631_v6 = vld [vmem:[#allocation5 + $0x648] sm:$0xff] }
  0xe3   : > { %5151 = vmatpush1.bf16.msra.mxu1 %v5150_v23  ;;  %4769 = vmatprep.subr.bf16.mxu0 %v4768_v24  ;;  %v604_v23 = vld [vmem:[#allocation5 + $0x570] sm:$0xff]  ;;  %v607_v24 = vld [vmem:[#allocation5 + $0x588] sm:$0xff]  ;;  %v5174_v49 = vpack.c.bf16 %v612_v17, %v608_v37 }
  0xe4   : > { %5153 = vmatprep.subr.bf16.mxu1 %v5152_v28  ;;  %1268 = vmatprep.mubr.f32.mxu0 %v340_v18  ;;  %v609_v28 = vld [vmem:[#allocation5 + $0x598] sm:$0xff]  ;;  %v628_v5 = vld [vmem:[#allocation5 + $0x630] sm:$0xff]  ;;  %v663_v56 = vld [vmem:[#allocation5 + $0x748] sm:$0xff] }
  0xe5   : > { %1802 = vmatprep.mubr.f32.mxu1 %v340_v18  ;;  %1269 = vmatmul.mubr.f32.gmra.mrb[2].mxu0 %v338_v26  ;;  %v5172_v39 = vpack.c.bf16 %v613_v29, %v609_v28  ;;  %v5182_v11 = vpack.c.bf16 %v628_v5, %v624_v3  ;;  %v638_v29 = vld [vmem:[#allocation5 + $0x680] sm:$0xff]  ;;  %v671_v5 = vld [vmem:[#allocation5 + $0x788] sm:$0xff] }
  0xe6   : > { %4771 = vmatpush1.bf16.msra.mxu0 %v4770_v34  ;;  %1803 = vmatmul.mubr.f32.gmra.mrb[2].mxu1 %v338_v26  ;;  %v5170_v34 = vpack.c.bf16 %v604_v23, %v600_v15  ;;  %v632_v15 = vld [vmem:[#allocation5 + $0x650] sm:$0xff]  ;;  %v643_v23 = vld [vmem:[#allocation5 + $0x6a8] sm:$0xff]  ;;  %v4806_v37 = vpack.c.bf16 %v642_v30, %v638_v29  ;;  %v682_v29 = vld [vmem:[#allocation5 + $0x7e0] sm:$0xff] }
  0xe7   : > { %5155 = vmatpush1.bf16.msra.mxu1 %v5154_v35  ;;  %4773 = vmatprep.subr.bf16.mxu0 %v4772_v36  ;;  %v4788_v35 = vpack.c.bf16 %v611_v25, %v607_v24  ;;  %v610_v36 = vld [vmem:[#allocation5 + $0x5a0] sm:$0xff]  ;;  %v641_v24 = vld [vmem:[#allocation5 + $0x698] sm:$0xff]  ;;  %v680_v30 = vld [vmem:[#allocation5 + $0x7d0] sm:$0xff] }
  0xe8   : > { %5157 = vmatprep.subr.bf16.mxu1 %v5156_v40  ;;  %v615_v40 = vld [vmem:[#allocation5 + $0x5c8] sm:$0xff]  ;;  %4535 = vmatprep.mubr.msk.f32.mxu0 %vm7035_vm1, %v346_v27  ;;  %v645_v25 = vld [vmem:[#allocation5 + $0x6b8] sm:$0xff] }
  0xe9   : > { %4559 = vmatprep.mubr.msk.f32.mxu1 %vm7035_vm1, %v346_v27  ;;  %4537 = vmatmul.mubr.msk.f32.gmra.mrb[4].mxu0 %vm7035_vm1, %v345_v32  ;;  %v4792_v50 = vpack.c.bf16 %v619_v41, %v615_v40  ;;  %v5186_v27 = vpack.c.bf16 %v636_v21, %v632_v15  ;;  %v650_v40 = vld [vmem:[#allocation5 + $0x6e0] sm:$0xff]  ;;  %v648_v41 = vld [vmem:[#allocation5 + $0x6d0] sm:$0xff]  ;;  %v679_v21 = vld [vmem:[#allocation5 + $0x7c8] sm:$0xff] }
  0xea   : > { %4775 = vmatpush1.bf16.msra.mxu0 %v4774_v46  ;;  %v349_v46 = vrot.slane %v312_v42, 7  ;;  %4561 = vmatmul.mubr.msk.f32.gmra.mrb[4].mxu1 %vm7035_vm1, %v345_v32 }
  0xeb   : > { %5159 = vmatpush1.bf16.msra.mxu1 %v5158_v47  ;;  %4777 = vmatprep.subr.bf16.mxu0 %v4776_v48  ;;  %v4790_v47 = vpack.c.bf16 %v610_v36, %v606_v19  ;;  %v303_v48 = vld [vmem:[%s7014_s16 + $0x18] sm:$0xff]  ;;  %v5188_v19 = vpack.c.bf16 %v645_v25, %v641_v24 }
  0xec   : > { %5161 = vmatprep.subr.bf16.mxu1 %v5160_v52  ;;  %v618_v52 = vld [vmem:[#allocation5 + $0x5e0] sm:$0xff]  ;;  %v350_v54 = vsel %vm332_vm0, %v345_v32, %v349_v46  ;;  %1280 = vmatprep.mubr.f32.mxu0 %v352_v45  ;;  %v7075_v59 = vrot.slane %v303_v48, 7  ;;  %v644_v32 = vld [vmem:[#allocation5 + $0x6b0] sm:$0xff]  ;;  %v653_v36 = vld [vmem:[#allocation5 + $0x6f8] sm:$0xff] }
  0xed   : > { %1814 = vmatprep.mubr.f32.mxu1 %v352_v45  ;;  %1281 = vmatmul.mubr.f32.gmra.mrb[6].mxu0 %v350_v54  ;;  %v4794_v62 = vpack.c.bf16 %v618_v52, %v614_v51  ;;  %v659_v45 = vld [vmem:[#allocation5 + $0x728] sm:$0xff]  ;;  %v657_v46 = vld [vmem:[#allocation5 + $0x718] sm:$0xff]  ;;  %v654_v51 = vld [vmem:[#allocation5 + $0x700] sm:$0xff] }
  0xee   : > { %4779 = vmatpush1.bf16.msra.mxu0 %v4778_v58  ;;  %v627_v58 = vld [vmem:[#allocation5 + $0x628] sm:$0xff]  ;;  %1815 = vmatmul.mubr.f32.gmra.mrb[6].mxu1 %v350_v54  ;;  %v658_v52 = vld [vmem:[#allocation5 + $0x720] sm:$0xff]  ;;  %v685_v24 = vld [vmem:[#allocation5 + $0x7f8] sm:$0xff] }
  0xef   : > { %5163 = vmatpush1.bf16.msra.mxu1 %v5162_v60  ;;  %4781 = vmatprep.subr.bf16.mxu0 %v4780_v61  ;;  %v625_v60 = vld [vmem:[#allocation5 + $0x618] sm:$0xff]  ;;  %v4796_v0 = vpack.c.bf16 %v627_v58, %v623_v57  ;;  %v667_v57 = vld [vmem:[#allocation5 + $0x768] sm:$0xff] }
  0xf0   : > { %5165 = vmatprep.subr.bf16.mxu1 %v5164_v1  ;;  %v629_v61 = vld [vmem:[#allocation5 + $0x638] sm:$0xff]  ;;  %v622_v1 = vld [vmem:[#allocation5 + $0x600] sm:$0xff]  ;;  %4539 = vmatprep.mubr.msk.f32.mxu0 %vm7035_vm1, %v7075_v59 }
  0xf1   : > { %v5180_v4 = vpack.c.bf16 %v629_v61, %v625_v60  ;;  %4563 = vmatprep.mubr.msk.f32.mxu1 %vm7035_vm1, %v7075_v59  ;;  %v4798_v10 = vpack.c.bf16 %v626_v2, %v622_v1  ;;  %v665_v58 = vld [vmem:[#allocation5 + $0x758] sm:$0xff]  ;;  %v4814_v61 = vpack.c.bf16 %v658_v52, %v654_v51  ;;  %v666_v1 = vld [vmem:[#allocation5 + $0x760] sm:$0xff]  ;;  %v664_v2 = vld [vmem:[#allocation5 + $0x750] sm:$0xff] }
  0xf2   : > { %4783 = vmatpush1.bf16.msra.mxu0 %v4782_v9  ;;  %v637_v9 = vld [vmem:[#allocation5 + $0x678] sm:$0xff] }
  0xf3   : > { %5167 = vmatpush1.bf16.msra.mxu1 %v5166_v12  ;;  %4785 = vmatprep.subr.bf16.mxu0 %v4784_v13  ;;  %v4800_v12 = vpack.c.bf16 %v635_v7, %v631_v6  ;;  %v630_v13 = vld [vmem:[#allocation5 + $0x640] sm:$0xff]  ;;  %v5184_v18 = vpack.c.bf16 %v637_v9, %v633_v8  ;;  %v669_v60 = vld [vmem:[#allocation5 + $0x778] sm:$0xff]  ;;  %v675_v6 = vld [vmem:[#allocation5 + $0x7a8] sm:$0xff] }
  0xf4   : > { %5169 = vmatprep.subr.bf16.mxu1 %v5168_v22  ;;  %v639_v22 = vld [vmem:[#allocation5 + $0x688] sm:$0xff]  ;;  %v4802_v26 = vpack.c.bf16 %v634_v14, %v630_v13  ;;  %v5200_v3 = vpack.c.bf16 %v669_v60, %v665_v58  ;;  %v673_v7 = vld [vmem:[#allocation5 + $0x798] sm:$0xff]  ;;  %v674_v13 = vld [vmem:[#allocation5 + $0x7a0] sm:$0xff] }
  0xf5   : > { %v4804_v28 = vpack.c.bf16 %v643_v23, %v639_v22  ;;  %v677_v8 = vld [vmem:[#allocation5 + $0x7b8] sm:$0xff]  ;;  %v672_v14 = vld [vmem:[#allocation5 + $0x790] sm:$0xff]  ;;  %v683_v22 = vld [vmem:[#allocation5 + $0x7e8] sm:$0xff] }
  0xf6   : > { %4787 = vmatpush1.bf16.msra.mxu0 %v4786_v31  ;;  %v640_v31 = vld [vmem:[#allocation5 + $0x690] sm:$0xff]  ;;  %v5204_v15 = vpack.c.bf16 %v677_v8, %v673_v7  ;;  %v681_v23 = vld [vmem:[#allocation5 + $0x7d8] sm:$0xff] }
  0xf7   : > { %5171 = vmatpush1.bf16.msra.mxu1 %v5170_v34  ;;  %4789 = vmatprep.subr.bf16.mxu0 %v4788_v35  ;;  %v651_v34 = vld [vmem:[#allocation5 + $0x6e8] sm:$0xff]  ;;  %v649_v35 = vld [vmem:[#allocation5 + $0x6d8] sm:$0xff]  ;;  %v5190_v17 = vpack.c.bf16 %v644_v32, %v640_v31  ;;  %v5208_v31 = vpack.c.bf16 %v685_v24, %v681_v23  ;;  %v696_v58 = vld [vmem:[#allocation5 + $0x850] sm:$0xff] }
  0xf8   : > { %5173 = vmatprep.subr.bf16.mxu1 %v5172_v39  ;;  %v4808_v38 = vpack.c.bf16 %v651_v34, %v647_v33  ;;  %v646_v39 = vld [vmem:[#allocation5 + $0x6c0] sm:$0xff]  ;;  %v5192_v42 = vpack.c.bf16 %v653_v36, %v649_v35  ;;  %v687_v32 = vld [vmem:[#allocation5 + $0x808] sm:$0xff]  ;;  %v689_v34 = vld [vmem:[#allocation5 + $0x818] sm:$0xff] }
  0xf9   : > { %v4810_v48 = vpack.c.bf16 %v650_v40, %v646_v39  ;;  %v691_v33 = vld [vmem:[#allocation5 + $0x828] sm:$0xff]  ;;  %v693_v35 = vld [vmem:[#allocation5 + $0x838] sm:$0xff]  ;;  %v310_v7 = vld [vmem:[%s7014_s16 + $0x50] sm:$0xff] }
  0xfa   : > { %4791 = vmatpush1.bf16.msra.mxu0 %v4790_v47  ;;  %v661_v47 = vld [vmem:[#allocation5 + $0x738] sm:$0xff]  ;;  %v4828_v40 = vpack.c.bf16 %v691_v33, %v687_v32  ;;  %v347_v24 = vrot.slane %v310_v7, 7  ;;  %v716_v33 = vld [vmem:[#allocation5 + $0x8f0] sm:$0xff] }
  0xfb   : > { %5175 = vmatpush1.bf16.msra.mxu1 %v5174_v49  ;;  %4793 = vmatprep.subr.bf16.mxu0 %v4792_v50  ;;  %v5194_v49 = vpack.c.bf16 %v652_v43, %v648_v41  ;;  %v4812_v50 = vpack.c.bf16 %v659_v45, %v655_v44  ;;  %v5196_v54 = vpack.c.bf16 %v661_v47, %v657_v46  ;;  %v690_v41 = vld [vmem:[#allocation5 + $0x820] sm:$0xff]  ;;  %v306_v43 = vld [vmem:[%s7014_s16 + $0x30] sm:$0xff]  ;;  %v695_v46 = vld [vmem:[#allocation5 + $0x848] sm:$0xff] }
  0xfc   : > { %5177 = vmatprep.subr.bf16.mxu1 %v5176_v55  ;;  %v660_v55 = vld [vmem:[#allocation5 + $0x730] sm:$0xff]  ;;  %v5212_v44 = vpack.c.bf16 %v693_v35, %v689_v34  ;;  %v699_v47 = vld [vmem:[#allocation5 + $0x868] sm:$0xff]  ;;  %v315_v8 = vld [vmem:[%s7014_s16 + $0x78] sm:$0xff] }
  0xfd   : > { %v692_v45 = vld [vmem:[#allocation5 + $0x830] sm:$0xff]  ;;  %v717_v23 = vld [vmem:[#allocation5 + $0x8f8] sm:$0xff]  ;;  %v719_v34 = vld [vmem:[#allocation5 + $0x908] sm:$0xff] }
  0xfe   : > { %4795 = vmatpush1.bf16.msra.mxu0 %v4794_v62  ;;  %v5198_v62 = vpack.c.bf16 %v660_v55, %v656_v53  ;;  %v341_v53 = vrot.slane %v306_v43, 7  ;;  %v4832_v55 = vpack.c.bf16 %v699_v47, %v695_v46  ;;  %v723_v35 = vld [vmem:[#allocation5 + $0x928] sm:$0xff]  ;;  %v722_v43 = vld [vmem:[#allocation5 + $0x920] sm:$0xff]  ;;  %v724_v46 = vld [vmem:[#allocation5 + $0x930] sm:$0xff] }
  0xff   : > { %5179 = vmatpush1.bf16.msra.mxu1 %v5178_v63  ;;  %4797 = vmatprep.subr.bf16.mxu0 %v4796_v0  ;;  %v4816_v63 = vpack.c.bf16 %v667_v57, %v663_v56  ;;  %v662_v0 = vld [vmem:[#allocation5 + $0x740] sm:$0xff]  ;;  %v727_v47 = vld [vmem:[#allocation5 + $0x948] sm:$0xff]  ;;  %v740_v7 = vld [vmem:[#allocation5 + $0x9b0] sm:$0xff] }
 0x100   : > { %5181 = vmatprep.subr.bf16.mxu1 %v5180_v4  ;;  %v668_v4 = vld [vmem:[#allocation5 + $0x770] sm:$0xff]  ;;  %v4818_v9 = vpack.c.bf16 %v666_v1, %v662_v0  ;;  %v694_v56 = vld [vmem:[#allocation5 + $0x840] sm:$0xff]  ;;  %v705_v0 = vld [vmem:[#allocation5 + $0x898] sm:$0xff] }
 0x101   : > { %v698_v57 = vld [vmem:[#allocation5 + $0x860] sm:$0xff]  ;;  %v709_v1 = vld [vmem:[#allocation5 + $0x8b8] sm:$0xff] }
 0x102   : > { %4799 = vmatpush1.bf16.msra.mxu0 %v4798_v10  ;;  %v5202_v10 = vpack.c.bf16 %v668_v4, %v664_v2  ;;  %v4834_v4 = vpack.c.bf16 %v698_v57, %v694_v56  ;;  %v728_v56 = vld [vmem:[#allocation5 + $0x950] sm:$0xff] }
 0x103   : > { %5183 = vmatpush1.bf16.msra.mxu1 %v5182_v11  ;;  %4801 = vmatprep.subr.bf16.mxu0 %v4800_v12  ;;  %v4820_v11 = vpack.c.bf16 %v675_v6, %v671_v5  ;;  %v670_v12 = vld [vmem:[#allocation5 + $0x780] sm:$0xff] }
 0x104   : > { %5185 = vmatprep.subr.bf16.mxu1 %v5184_v18  ;;  %v676_v18 = vld [vmem:[#allocation5 + $0x7b0] sm:$0xff]  ;;  %v4822_v25 = vpack.c.bf16 %v674_v13, %v670_v12  ;;  %v702_v5 = vld [vmem:[#allocation5 + $0x880] sm:$0xff] }
 0x105   : > { %v704_v12 = vld [vmem:[#allocation5 + $0x890] sm:$0xff] }
 0x106   : > { %4803 = vmatpush1.bf16.msra.mxu0 %v4802_v26  ;;  %v5206_v26 = vpack.c.bf16 %v676_v18, %v672_v14  ;;  %v314_v13 = vld [vmem:[%s7014_s16 + $0x70] sm:$0xff]  ;;  %v715_v18 = vld [vmem:[#allocation5 + $0x8e8] sm:$0xff] }
 0x107   : > { %5187 = vmatpush1.bf16.msra.mxu1 %v5186_v27  ;;  %4805 = vmatprep.subr.bf16.mxu0 %v4804_v28  ;;  %v4824_v27 = vpack.c.bf16 %v683_v22, %v679_v21  ;;  %v678_v28 = vld [vmem:[#allocation5 + $0x7c0] sm:$0xff]  ;;  %v708_v14 = vld [vmem:[#allocation5 + $0x8b0] sm:$0xff]  ;;  %v713_v22 = vld [vmem:[#allocation5 + $0x8d8] sm:$0xff] }
 0x108   : > { %5189 = vmatprep.subr.bf16.mxu1 %v5188_v19  ;;  %v684_v19 = vld [vmem:[#allocation5 + $0x7f0] sm:$0xff]  ;;  %v4826_v36 = vpack.c.bf16 %v682_v29, %v678_v28  ;;  %v5222_v28 = vpack.c.bf16 %v708_v14, %v704_v12  ;;  %v5224_v32 = vpack.c.bf16 %v717_v23, %v713_v22  ;;  %v746_v14 = vld [vmem:[#allocation5 + $0x9e0] sm:$0xff]  ;;  %v751_v22 = vld [vmem:[#allocation5 + $0xa08] sm:$0xff] }
 0x109   : > { %v5210_v39 = vpack.c.bf16 %v684_v19, %v680_v30  ;;  %v710_v30 = vld [vmem:[#allocation5 + $0x8c0] sm:$0xff]  ;;  %v712_v19 = vld [vmem:[#allocation5 + $0x8d0] sm:$0xff]  ;;  %v755_v23 = vld [vmem:[#allocation5 + $0xa28] sm:$0xff] }
 0x10a   : > { %4807 = vmatpush1.bf16.msra.mxu0 %v4806_v37  ;;  %v302_v37 = vld [vmem:[%s7014_s16 + $0x10] sm:$0xff] }
 0x10b   : > { %5191 = vmatpush1.bf16.msra.mxu1 %v5190_v17  ;;  %4809 = vmatprep.subr.bf16.mxu0 %v4808_v38  ;;  %v686_v17 = vld [vmem:[#allocation5 + $0x800] sm:$0xff]  ;;  %v307_v38 = vld [vmem:[%s7014_s16 + $0x38] sm:$0xff] }
 0x10c   : > { %5193 = vmatprep.subr.bf16.mxu1 %v5192_v42  ;;  %v688_v42 = vld [vmem:[#allocation5 + $0x810] sm:$0xff]  ;;  %v343_v51 = vrot.slane %v307_v38, 7  ;;  %v4830_v52 = vpack.c.bf16 %v690_v41, %v686_v17  ;;  %v4844_v41 = vpack.c.bf16 %v723_v35, %v719_v34  ;;  %v763_v34 = vld [vmem:[#allocation5 + $0xa68] sm:$0xff]  ;;  %v761_v35 = vld [vmem:[#allocation5 + $0xa58] sm:$0xff] }
 0x10e   : > { %4811 = vmatpush1.bf16.msra.mxu0 %v4810_v48  ;;  %v335_v48 = vrot.slane %v302_v37, 7  ;;  %v344_v2 = vsel %vm332_vm0, %v7075_v59, %v343_v51  ;;  %v5220_v59 = vpack.c.bf16 %v709_v1, %v705_v0  ;;  %v725_v37 = vld [vmem:[#allocation5 + $0x938] sm:$0xff] }
 0x10f   : > { %5195 = vmatpush1.bf16.msra.mxu1 %v5194_v49  ;;  %4813 = vmatprep.subr.bf16.mxu0 %v4812_v50  ;;  %v697_v49 = vld [vmem:[#allocation5 + $0x858] sm:$0xff] }
 0x110   : > { %5197 = vmatprep.subr.bf16.mxu1 %v5196_v54  ;;  %v701_v50 = vld [vmem:[#allocation5 + $0x878] sm:$0xff]  ;;  %v5214_v54 = vpack.c.bf16 %v692_v45, %v688_v42  ;;  %v342_v6 = vsel %vm332_vm0, %v335_v48, %v341_v53  ;;  %v718_v42 = vld [vmem:[#allocation5 + $0x900] sm:$0xff] }
 0x111   : > { %v5216_v60 = vpack.c.bf16 %v701_v50, %v697_v49  ;;  %v729_v49 = vld [vmem:[#allocation5 + $0x958] sm:$0xff]  ;;  %v4846_v51 = vpack.c.bf16 %v722_v43, %v718_v42  ;;  %v764_v43 = vld [vmem:[#allocation5 + $0xa70] sm:$0xff] }
 0x112   : > { %4815 = vmatpush1.bf16.msra.mxu0 %v4814_v61  ;;  %v700_v61 = vld [vmem:[#allocation5 + $0x870] sm:$0xff]  ;;  %v733_v50 = vld [vmem:[#allocation5 + $0x978] sm:$0xff] }
 0x113   : > { %5199 = vmatpush1.bf16.msra.mxu1 %v5198_v62  ;;  %4817 = vmatprep.subr.bf16.mxu0 %v4816_v63  ;;  %v703_v62 = vld [vmem:[#allocation5 + $0x888] sm:$0xff]  ;;  %v5232_v57 = vpack.c.bf16 %v733_v50, %v729_v49 }
 0x114   : > { %5201 = vmatprep.subr.bf16.mxu1 %v5200_v3  ;;  %v707_v63 = vld [vmem:[#allocation5 + $0x8a8] sm:$0xff]  ;;  %v311_v3 = vld [vmem:[%s7014_s16 + $0x58] sm:$0xff] }
 0x115   : > { %v348_v21 = vrot.slane %v311_v3, 7  ;;  %v734_v3 = vld [vmem:[#allocation5 + $0x980] sm:$0xff] }
 0x116   : > { %4819 = vmatpush1.bf16.msra.mxu0 %v4818_v9  ;;  %v5218_v9 = vpack.c.bf16 %v700_v61, %v696_v58  ;;  %v732_v58 = vld [vmem:[#allocation5 + $0x970] sm:$0xff]  ;;  %v739_v61 = vld [vmem:[#allocation5 + $0x9a8] sm:$0xff] }
 0x117   : > { %5203 = vmatpush1.bf16.msra.mxu1 %v5202_v10  ;;  %4821 = vmatprep.subr.bf16.mxu0 %v4820_v11  ;;  %v4836_v10 = vpack.c.bf16 %v707_v63, %v703_v62  ;;  %v706_v11 = vld [vmem:[#allocation5 + $0x8a0] sm:$0xff]  ;;  %v737_v62 = vld [vmem:[#allocation5 + $0x998] sm:$0xff]  ;;  %v5234_v1 = vpack.c.bf16 %v732_v58, %v728_v56  ;;  %v775_v56 = vld [vmem:[#allocation5 + $0xac8] sm:$0xff] }
 0x118   : > { %5205 = vmatprep.subr.bf16.mxu1 %v5204_v15  ;;  %v711_v15 = vld [vmem:[#allocation5 + $0x8c8] sm:$0xff]  ;;  %v741_v63 = vld [vmem:[#allocation5 + $0x9b8] sm:$0xff] }
 0x119   : > { %v4840_v29 = vpack.c.bf16 %v715_v18, %v711_v15  ;;  %v744_v15 = vld [vmem:[#allocation5 + $0x9d0] sm:$0xff]  ;;  %v777_v58 = vld [vmem:[#allocation5 + $0xad8] sm:$0xff] }
 0x11a   : > { %4823 = vmatpush1.bf16.msra.mxu0 %v4822_v25  ;;  %v355_v25 = vrot.slane %v315_v8, 7  ;;  %v743_v8 = vld [vmem:[#allocation5 + $0x9c8] sm:$0xff] }
 0x11b   : > { %5207 = vmatpush1.bf16.msra.mxu1 %v5206_v26  ;;  %4825 = vmatprep.subr.bf16.mxu0 %v4824_v27  ;;  %v4838_v26 = vpack.c.bf16 %v706_v11, %v702_v5  ;;  %v353_v27 = vrot.slane %v314_v13, 7  ;;  %v736_v5 = vld [vmem:[#allocation5 + $0x990] sm:$0xff]  ;;  %v749_v11 = vld [vmem:[#allocation5 + $0x9f8] sm:$0xff] }
 0x11c   : > { %5209 = vmatprep.subr.bf16.mxu1 %v5208_v31  ;;  %v714_v31 = vld [vmem:[#allocation5 + $0x8e0] sm:$0xff]  ;;  %v356_v17 = vsel %vm332_vm0, %v348_v21, %v355_v25  ;;  %v757_v25 = vld [vmem:[#allocation5 + $0xa38] sm:$0xff] }
 0x11d   : > { %v4842_v38 = vpack.c.bf16 %v714_v31, %v710_v30  ;;  %v754_v30 = vld [vmem:[#allocation5 + $0xa20] sm:$0xff]  ;;  %v752_v31 = vld [vmem:[#allocation5 + $0xa10] sm:$0xff] }
 0x11e   : > { %4827 = vmatpush1.bf16.msra.mxu0 %v4826_v36  ;;  %v721_v36 = vld [vmem:[#allocation5 + $0x918] sm:$0xff] }
 0x11f   : > { %5211 = vmatpush1.bf16.msra.mxu1 %v5210_v39  ;;  %4829 = vmatprep.subr.bf16.mxu0 %v4828_v40  ;;  %v354_v39 = vsel %vm332_vm0, %v347_v24, %v353_v27  ;;  %v5226_v40 = vpack.c.bf16 %v716_v33, %v712_v19  ;;  %v5228_v45 = vpack.c.bf16 %v725_v37, %v721_v36  ;;  %v759_v33 = vld [vmem:[#allocation5 + $0xa48] sm:$0xff]  ;;  %v765_v36 = vld [vmem:[#allocation5 + $0xa78] sm:$0xff] }
 0x120   : > { %5213 = vmatprep.subr.bf16.mxu1 %v5212_v44  ;;  %v720_v44 = vld [vmem:[#allocation5 + $0x910] sm:$0xff]  ;;  %v5248_v42 = vpack.c.bf16 %v765_v36, %v761_v35 }
 0x121   : > { %4541 = vmatmul.mubr.msk.f32.vlgmr.msra.gmra.mrb[0].mxu0 %vm7035_vm1, %v335_v48 }
 0x122   : > { %4831 = vmatpush1.bf16.msra.mxu0 %v4830_v52  ;;  %4565 = vmatmul.mubr.msk.f32.vlgmr.msra.gmra.mrb[0].mxu1 %vm7035_vm1, %v335_v48  ;;  %v731_v48 = vld [vmem:[#allocation5 + $0x968] sm:$0xff]  ;;  %v5230_v52 = vpack.c.bf16 %v724_v46, %v720_v44  ;;  %v769_v46 = vld [vmem:[#allocation5 + $0xa98] sm:$0xff] }
 0x123   : > { %5215 = vmatpush1.bf16.msra.mxu1 %v5214_v54  ;;  %4833 = vmatprep.subr.bf16.mxu0 %v4832_v55  ;;  %v4848_v53 = vpack.c.bf16 %v731_v48, %v727_v47  ;;  %v726_v54 = vld [vmem:[#allocation5 + $0x940] sm:$0xff]  ;;  %v767_v44 = vld [vmem:[#allocation5 + $0xa88] sm:$0xff]  ;;  %v773_v47 = vld [vmem:[#allocation5 + $0xab8] sm:$0xff] }
 0x124   : > { %5217 = vmatprep.subr.bf16.mxu1 %v5216_v60  ;;  %1357 = vmatprep.mubr.f32.mxu0 %v344_v2  ;;  %v730_v55 = vld [vmem:[#allocation5 + $0x960] sm:$0xff]  ;;  %v735_v60 = vld [vmem:[#allocation5 + $0x988] sm:$0xff] }
 0x125   : > { %1891 = vmatprep.mubr.f32.mxu1 %v344_v2  ;;  %1358 = vmatmul.mubr.f32.gmra.mrb[2].mxu0 %v342_v6  ;;  %v4850_v0 = vpack.c.bf16 %v730_v55, %v726_v54  ;;  %v4852_v2 = vpack.c.bf16 %v739_v61, %v735_v60  ;;  %v5252_v54 = vpack.c.bf16 %v773_v47, %v769_v46  ;;  %v772_v55 = vld [vmem:[#allocation5 + $0xab0] sm:$0xff]  ;;  %v781_v60 = vld [vmem:[#allocation5 + $0xaf8] sm:$0xff] }
 0x126   : > { %4835 = vmatpush1.bf16.msra.mxu0 %v4834_v4  ;;  %1892 = vmatmul.mubr.f32.gmra.mrb[2].mxu1 %v342_v6  ;;  %v738_v4 = vld [vmem:[#allocation5 + $0x9a0] sm:$0xff]  ;;  %v5236_v6 = vpack.c.bf16 %v741_v63, %v737_v62 }
 0x127   : > { %5219 = vmatpush1.bf16.msra.mxu1 %v5218_v9  ;;  %4837 = vmatprep.subr.bf16.mxu0 %v4836_v10  ;;  %v747_v9 = vld [vmem:[#allocation5 + $0x9e8] sm:$0xff]  ;;  %v745_v10 = vld [vmem:[#allocation5 + $0x9d8] sm:$0xff]  ;;  %v4854_v12 = vpack.c.bf16 %v738_v4, %v734_v3  ;;  %v5256_v3 = vpack.c.bf16 %v781_v60, %v777_v58  ;;  %v780_v4 = vld [vmem:[#allocation5 + $0xaf0] sm:$0xff] }
 0x128   : > { %5221 = vmatprep.subr.bf16.mxu1 %v5220_v59  ;;  %4543 = vmatprep.mubr.msk.f32.mxu0 %vm7035_vm1, %v348_v21  ;;  %v4856_v13 = vpack.c.bf16 %v747_v9, %v743_v8  ;;  %v742_v59 = vld [vmem:[#allocation5 + $0x9c0] sm:$0xff]  ;;  %v5240_v18 = vpack.c.bf16 %v749_v11, %v745_v10  ;;  %v789_v8 = vld [vmem:[#allocation5 + $0xb38] sm:$0xff] }
 0x129   : > { %4567 = vmatprep.mubr.msk.f32.mxu1 %vm7035_vm1, %v348_v21  ;;  %4545 = vmatmul.mubr.msk.f32.gmra.mrb[4].mxu0 %vm7035_vm1, %v347_v24  ;;  %v748_v21 = vld [vmem:[#allocation5 + $0x9f0] sm:$0xff] }
 0x12a   : > { %4839 = vmatpush1.bf16.msra.mxu0 %v4838_v26  ;;  %4569 = vmatmul.mubr.msk.f32.gmra.mrb[4].mxu1 %vm7035_vm1, %v347_v24  ;;  %v753_v24 = vld [vmem:[#allocation5 + $0xa18] sm:$0xff]  ;;  %v4858_v26 = vpack.c.bf16 %v746_v14, %v742_v59  ;;  %v5242_v27 = vpack.c.bf16 %v748_v21, %v744_v15  ;;  %v788_v14 = vld [vmem:[#allocation5 + $0xb30] sm:$0xff]  ;;  %v791_v15 = vld [vmem:[#allocation5 + $0xb48] sm:$0xff] }
 0x12b   : > { %5223 = vmatpush1.bf16.msra.mxu1 %v5222_v28  ;;  %4841 = vmatprep.subr.bf16.mxu0 %v4840_v29  ;;  %v4860_v28 = vpack.c.bf16 %v755_v23, %v751_v22  ;;  %v750_v29 = vld [vmem:[#allocation5 + $0xa00] sm:$0xff]  ;;  %v5244_v19 = vpack.c.bf16 %v757_v25, %v753_v24  ;;  %v793_v21 = vld [vmem:[#allocation5 + $0xb58] sm:$0xff] }
 0x12c   : > { %5225 = vmatprep.subr.bf16.mxu1 %v5224_v32  ;;  %1369 = vmatprep.mubr.f32.mxu0 %v356_v17  ;;  %v756_v32 = vld [vmem:[#allocation5 + $0xa30] sm:$0xff]  ;;  %v4862_v37 = vpack.c.bf16 %v754_v30, %v750_v29  ;;  %v797_v22 = vld [vmem:[#allocation5 + $0xb78] sm:$0xff] }
 0x12d   : > { %1903 = vmatprep.mubr.f32.mxu1 %v356_v17  ;;  %1370 = vmatmul.mubr.f32.gmra.mrb[6].mxu0 %v354_v39  ;;  %v5246_v17 = vpack.c.bf16 %v756_v32, %v752_v31  ;;  %v5264_v29 = vpack.c.bf16 %v797_v22, %v793_v21  ;;  %v796_v30 = vld [vmem:[#allocation5 + $0xb70] sm:$0xff]  ;;  %v799_v31 = vld [vmem:[#allocation5 + $0xb88] sm:$0xff]  ;;  %v801_v32 = vld [vmem:[#allocation5 + $0xb98] sm:$0xff] }
 0x12e   : > { %4843 = vmatpush1.bf16.msra.mxu0 %v4842_v38  ;;  %1904 = vmatmul.mubr.f32.gmra.mrb[6].mxu1 %v354_v39  ;;  %v4864_v38 = vpack.c.bf16 %v763_v34, %v759_v33  ;;  %v758_v39 = vld [vmem:[#allocation5 + $0xa40] sm:$0xff]  ;;  %v805_v33 = vld [vmem:[#allocation5 + $0xbb8] sm:$0xff] }
 0x12f   : > { %5227 = vmatpush1.bf16.msra.mxu1 %v5226_v40  ;;  %4845 = vmatprep.subr.bf16.mxu0 %v4844_v41  ;;  %v762_v40 = vld [vmem:[#allocation5 + $0xa60] sm:$0xff]  ;;  %v760_v41 = vld [vmem:[#allocation5 + $0xa50] sm:$0xff] }
 0x130   : > { %5229 = vmatprep.subr.bf16.mxu1 %v5228_v45  ;;  %1440 = vmatprep.mubr.f32.mxu0 %v7029_v16  ;;  %v771_v45 = vld [vmem:[#allocation5 + $0xaa8] sm:$0xff]  ;;  %v4866_v48 = vpack.c.bf16 %v762_v40, %v758_v39  ;;  %v5250_v49 = vpack.c.bf16 %v764_v43, %v760_v41  ;;  %v5268_v39 = vpack.c.bf16 %v805_v33, %v801_v32  ;;  %v804_v40 = vld [vmem:[#allocation5 + $0xbb0] sm:$0xff]  ;;  %v809_v43 = vld [vmem:[#allocation5 + $0xbd8] sm:$0xff] }
 0x131   : > { %1974 = vmatprep.mubr.f32.mxu1 %v7029_v16  ;;  %v5238_v16 = vpack.c.bf16 %v740_v7, %v736_v5  ;;  %v4868_v50 = vpack.c.bf16 %v771_v45, %v767_v44  ;;  %v783_v5 = vld [vmem:[#allocation5 + $0xb08] sm:$0xff]  ;;  %v785_v7 = vld [vmem:[#allocation5 + $0xb18] sm:$0xff]  ;;  %v7116_v33 = vld [vmem:[%s7014_s16 + $0x20] sm:$0xff] }
 0x132   : > { %4847 = vmatpush1.bf16.msra.mxu0 %v4846_v51  ;;  %v766_v51 = vld [vmem:[#allocation5 + $0xa80] sm:$0xff]  ;;  %v5260_v59 = vpack.c.bf16 %v789_v8, %v785_v7  ;;  %v807_v41 = vld [vmem:[#allocation5 + $0xbc8] sm:$0xff]  ;;  %v813_v44 = vld [vmem:[#allocation5 + $0xbf8] sm:$0xff] }
 0x133   : > { %5231 = vmatpush1.bf16.msra.mxu1 %v5230_v52  ;;  %4849 = vmatprep.subr.bf16.mxu0 %v4848_v53  ;;  %v770_v52 = vld [vmem:[#allocation5 + $0xaa0] sm:$0xff]  ;;  %v768_v53 = vld [vmem:[#allocation5 + $0xa90] sm:$0xff]  ;;  %v845_v32 = vld [vmem:[#allocation5 + $0xcf8] sm:$0xff] }
 0x134   : > { %5233 = vmatprep.subr.bf16.mxu1 %v5232_v57  ;;  %v779_v57 = vld [vmem:[#allocation5 + $0xae8] sm:$0xff]  ;;  %v4870_v61 = vpack.c.bf16 %v770_v52, %v766_v51  ;;  %v5254_v62 = vpack.c.bf16 %v772_v55, %v768_v53  ;;  %v5272_v51 = vpack.c.bf16 %v813_v44, %v809_v43  ;;  %v812_v52 = vld [vmem:[#allocation5 + $0xbf0] sm:$0xff]  ;;  %v817_v55 = vld [vmem:[#allocation5 + $0xc18] sm:$0xff] }
 0x135   : > { %v4872_v63 = vpack.c.bf16 %v779_v57, %v775_v56  ;;  %v815_v53 = vld [vmem:[#allocation5 + $0xc08] sm:$0xff]  ;;  %v821_v56 = vld [vmem:[#allocation5 + $0xc38] sm:$0xff] }
 0x136   : > { %4851 = vmatpush1.bf16.msra.mxu0 %v4850_v0  ;;  %v774_v0 = vld [vmem:[#allocation5 + $0xac0] sm:$0xff]  ;;  %v6492_v43 = vld [vmem:[%s7014_s16 + $0x48] sm:$0xff]  ;;  %v849_v44 = vld [vmem:[#allocation5 + $0xd18] sm:$0xff] }
 0x137   : > { %5235 = vmatpush1.bf16.msra.mxu1 %v5234_v1  ;;  %4853 = vmatprep.subr.bf16.mxu0 %v4852_v2  ;;  %v778_v1 = vld [vmem:[#allocation5 + $0xae0] sm:$0xff]  ;;  %v776_v2 = vld [vmem:[#allocation5 + $0xad0] sm:$0xff] }
 0x138   : > { %5237 = vmatprep.subr.bf16.mxu1 %v5236_v6  ;;  %v787_v6 = vld [vmem:[#allocation5 + $0xb28] sm:$0xff]  ;;  %v4874_v9 = vpack.c.bf16 %v778_v1, %v774_v0  ;;  %v5258_v10 = vpack.c.bf16 %v780_v4, %v776_v2  ;;  %v5276_v0 = vpack.c.bf16 %v821_v56, %v817_v55  ;;  %v820_v1 = vld [vmem:[#allocation5 + $0xc30] sm:$0xff]  ;;  %v825_v4 = vld [vmem:[#allocation5 + $0xc58] sm:$0xff] }
 0x139   : > { %v4876_v11 = vpack.c.bf16 %v787_v6, %v783_v5  ;;  %v823_v2 = vld [vmem:[#allocation5 + $0xc48] sm:$0xff]  ;;  %v829_v5 = vld [vmem:[#allocation5 + $0xc78] sm:$0xff] }
 0x13a   : > { %4855 = vmatpush1.bf16.msra.mxu0 %v4854_v12  ;;  %v782_v12 = vld [vmem:[#allocation5 + $0xb00] sm:$0xff]  ;;  %v855_v55 = vld [vmem:[#allocation5 + $0xd48] sm:$0xff] }
 0x13b   : > { %5239 = vmatpush1.bf16.msra.mxu1 %v5238_v16  ;;  %4857 = vmatprep.subr.bf16.mxu0 %v4856_v13  ;;  %v786_v16 = vld [vmem:[#allocation5 + $0xb20] sm:$0xff]  ;;  %v784_v13 = vld [vmem:[#allocation5 + $0xb10] sm:$0xff]  ;;  %v859_v56 = vld [vmem:[#allocation5 + $0xd68] sm:$0xff] }
 0x13c   : > { %5241 = vmatprep.subr.bf16.mxu1 %v5240_v18  ;;  %v795_v18 = vld [vmem:[#allocation5 + $0xb68] sm:$0xff]  ;;  %v4878_v23 = vpack.c.bf16 %v786_v16, %v782_v12  ;;  %v5262_v24 = vpack.c.bf16 %v788_v14, %v784_v13  ;;  %v5280_v12 = vpack.c.bf16 %v829_v5, %v825_v4  ;;  %v828_v16 = vld [vmem:[#allocation5 + $0xc70] sm:$0xff]  ;;  %v6489_v14 = vld [vmem:[%s7014_s16] sm:$0xff] }
 0x13d   : > { %v4880_v25 = vpack.c.bf16 %v795_v18, %v791_v15  ;;  %v831_v13 = vld [vmem:[#allocation5 + $0xc88] sm:$0xff]  ;;  %v833_v15 = vld [vmem:[#allocation5 + $0xc98] sm:$0xff]  ;;  %v860_v5 = vld [vmem:[#allocation5 + $0xd70] sm:$0xff] }
 0x13e   : > { %4859 = vmatpush1.bf16.msra.mxu0 %v4858_v26  ;;  %v790_v26 = vld [vmem:[#allocation5 + $0xb40] sm:$0xff]  ;;  %v837_v18 = vld [vmem:[#allocation5 + $0xcb8] sm:$0xff] }
 0x13f   : > { %5243 = vmatpush1.bf16.msra.mxu1 %v5242_v27  ;;  %4861 = vmatprep.subr.bf16.mxu0 %v4860_v28  ;;  %v794_v27 = vld [vmem:[#allocation5 + $0xb60] sm:$0xff]  ;;  %v792_v28 = vld [vmem:[#allocation5 + $0xb50] sm:$0xff] }
 0x140   : > { %5245 = vmatprep.subr.bf16.mxu1 %v5244_v19  ;;  %v803_v19 = vld [vmem:[#allocation5 + $0xba8] sm:$0xff]  ;;  %v4882_v34 = vpack.c.bf16 %v794_v27, %v790_v26  ;;  %v5266_v35 = vpack.c.bf16 %v796_v30, %v792_v28  ;;  %v832_v26 = vld [vmem:[#allocation5 + $0xc90] sm:$0xff]  ;;  %v5284_v27 = vpack.c.bf16 %v837_v18, %v833_v15 }
 0x141   : > { %v4884_v36 = vpack.c.bf16 %v803_v19, %v799_v31  ;;  %v836_v28 = vld [vmem:[#allocation5 + $0xcb0] sm:$0xff]  ;;  %v843_v30 = vld [vmem:[#allocation5 + $0xce8] sm:$0xff]  ;;  %v841_v19 = vld [vmem:[#allocation5 + $0xcd8] sm:$0xff] }
 0x142   : > { %4863 = vmatpush1.bf16.msra.mxu0 %v4862_v37  ;;  %v798_v37 = vld [vmem:[#allocation5 + $0xb80] sm:$0xff]  ;;  %v7111_v31 = vld [vmem:[%s7014_s16 + $0x28] sm:$0xff]  ;;  %v868_v18 = vld [vmem:[#allocation5 + $0xdb0] sm:$0xff] }
 0x143   : > { %5247 = vmatpush1.bf16.msra.mxu1 %v5246_v17  ;;  %4865 = vmatprep.subr.bf16.mxu0 %v4864_v38  ;;  %v802_v17 = vld [vmem:[#allocation5 + $0xba0] sm:$0xff]  ;;  %v800_v38 = vld [vmem:[#allocation5 + $0xb90] sm:$0xff] }
 0x144   : > { %5249 = vmatprep.subr.bf16.mxu1 %v5248_v42  ;;  %v811_v42 = vld [vmem:[#allocation5 + $0xbe8] sm:$0xff]  ;;  %v4886_v45 = vpack.c.bf16 %v802_v17, %v798_v37  ;;  %v5270_v46 = vpack.c.bf16 %v804_v40, %v800_v38  ;;  %v838_v37 = vld [vmem:[#allocation5 + $0xcc0] sm:$0xff]  ;;  %v840_v38 = vld [vmem:[#allocation5 + $0xcd0] sm:$0xff] }
 0x145   : > { %v4888_v47 = vpack.c.bf16 %v811_v42, %v807_v41  ;;  %v842_v17 = vld [vmem:[#allocation5 + $0xce0] sm:$0xff]  ;;  %v844_v40 = vld [vmem:[#allocation5 + $0xcf0] sm:$0xff]  ;;  %v847_v41 = vld [vmem:[#allocation5 + $0xd08] sm:$0xff] }
 0x146   : > { %4867 = vmatpush1.bf16.msra.mxu0 %v4866_v48  ;;  %v806_v48 = vld [vmem:[#allocation5 + $0xbc0] sm:$0xff]  ;;  %v851_v42 = vld [vmem:[#allocation5 + $0xd28] sm:$0xff] }
 0x147   : > { %5251 = vmatpush1.bf16.msra.mxu1 %v5250_v49  ;;  %4869 = vmatprep.subr.bf16.mxu0 %v4868_v50  ;;  %v810_v49 = vld [vmem:[#allocation5 + $0xbe0] sm:$0xff]  ;;  %v808_v50 = vld [vmem:[#allocation5 + $0xbd0] sm:$0xff] }
 0x148   : > { %5253 = vmatprep.subr.bf16.mxu1 %v5252_v54  ;;  %v819_v54 = vld [vmem:[#allocation5 + $0xc28] sm:$0xff]  ;;  %v4890_v57 = vpack.c.bf16 %v810_v49, %v806_v48  ;;  %v5274_v58 = vpack.c.bf16 %v812_v52, %v808_v50  ;;  %v5290_v48 = vpack.c.bf16 %v844_v40, %v840_v38  ;;  %v4908_v49 = vpack.c.bf16 %v851_v42, %v847_v41  ;;  %v846_v50 = vld [vmem:[#allocation5 + $0xd00] sm:$0xff]  ;;  %v848_v52 = vld [vmem:[#allocation5 + $0xd10] sm:$0xff] }
 0x149   : > { %v4892_v60 = vpack.c.bf16 %v819_v54, %v815_v53  ;;  %v852_v54 = vld [vmem:[#allocation5 + $0xd30] sm:$0xff]  ;;  %v878_v40 = vld [vmem:[#allocation5 + $0xe00] sm:$0xff] }
 0x14a   : > { %4871 = vmatpush1.bf16.msra.mxu0 %v4870_v61  ;;  %v814_v61 = vld [vmem:[#allocation5 + $0xc00] sm:$0xff]  ;;  %v880_v42 = vld [vmem:[#allocation5 + $0xe10] sm:$0xff] }
 0x14b   : > { %5255 = vmatpush1.bf16.msra.mxu1 %v5254_v62  ;;  %4873 = vmatprep.subr.bf16.mxu0 %v4872_v63  ;;  %v818_v62 = vld [vmem:[#allocation5 + $0xc20] sm:$0xff]  ;;  %v816_v63 = vld [vmem:[#allocation5 + $0xc10] sm:$0xff] }
 0x14c   : > { %5257 = vmatprep.subr.bf16.mxu1 %v5256_v3  ;;  %v827_v3 = vld [vmem:[#allocation5 + $0xc68] sm:$0xff]  ;;  %v4894_v6 = vpack.c.bf16 %v818_v62, %v814_v61  ;;  %v5278_v7 = vpack.c.bf16 %v820_v1, %v816_v63  ;;  %v7128_v61 = vld [vmem:[%s7014_s16 + $0x60] sm:$0xff]  ;;  %v5294_v63 = vpack.c.bf16 %v852_v54, %v848_v52  ;;  %v888_v54 = vld [vmem:[#allocation5 + $0xe50] sm:$0xff] }
 0x14d   : > { %v4896_v8 = vpack.c.bf16 %v827_v3, %v823_v2  ;;  %v854_v1 = vld [vmem:[#allocation5 + $0xd40] sm:$0xff]  ;;  %v856_v3 = vld [vmem:[#allocation5 + $0xd50] sm:$0xff] }
 0x14e   : > { %4875 = vmatpush1.bf16.msra.mxu0 %v4874_v9  ;;  %v822_v9 = vld [vmem:[#allocation5 + $0xc40] sm:$0xff] }
 0x14f   : > { %5259 = vmatpush1.bf16.msra.mxu1 %v5258_v10  ;;  %4877 = vmatprep.subr.bf16.mxu0 %v4876_v11  ;;  %v826_v10 = vld [vmem:[#allocation5 + $0xc60] sm:$0xff]  ;;  %v824_v11 = vld [vmem:[#allocation5 + $0xc50] sm:$0xff] }
 0x150   : > { %5261 = vmatprep.subr.bf16.mxu1 %v5260_v59  ;;  %v835_v59 = vld [vmem:[#allocation5 + $0xca8] sm:$0xff]  ;;  %v4898_v21 = vpack.c.bf16 %v826_v10, %v822_v9  ;;  %v5282_v22 = vpack.c.bf16 %v828_v16, %v824_v11  ;;  %v858_v2 = vld [vmem:[#allocation5 + $0xd60] sm:$0xff]  ;;  %v865_v9 = vld [vmem:[#allocation5 + $0xd98] sm:$0xff] }
 0x151   : > { %v869_v10 = vld [vmem:[#allocation5 + $0xdb8] sm:$0xff]  ;;  %v4914_v11 = vpack.c.bf16 %v858_v2, %v854_v1  ;;  %v882_v41 = vld [vmem:[#allocation5 + $0xe20] sm:$0xff] }
 0x152   : > { %4879 = vmatpush1.bf16.msra.mxu0 %v4878_v23  ;;  %v4900_v23 = vpack.c.bf16 %v835_v59, %v831_v13  ;;  %v862_v13 = vld [vmem:[#allocation5 + $0xd80] sm:$0xff]  ;;  %v5300_v15 = vpack.c.bf16 %v869_v10, %v865_v9  ;;  %v907_v9 = vld [vmem:[#allocation5 + $0xee8] sm:$0xff]  ;;  %v905_v10 = vld [vmem:[#allocation5 + $0xed8] sm:$0xff] }
 0x153   : > { %5263 = vmatpush1.bf16.msra.mxu1 %v5262_v24  ;;  %4881 = vmatprep.subr.bf16.mxu0 %v4880_v25  ;;  %v830_v24 = vld [vmem:[#allocation5 + $0xc80] sm:$0xff] }
 0x154   : > { %5265 = vmatprep.subr.bf16.mxu1 %v5264_v29  ;;  %v834_v25 = vld [vmem:[#allocation5 + $0xca0] sm:$0xff]  ;;  %v839_v29 = vld [vmem:[#allocation5 + $0xcc8] sm:$0xff] }
 0x155   : > { %v866_v59 = vld [vmem:[#allocation5 + $0xda0] sm:$0xff] }
 0x156   : > { %4883 = vmatpush1.bf16.msra.mxu0 %v4882_v34  ;;  %v4902_v34 = vpack.c.bf16 %v834_v25, %v830_v24  ;;  %v877_v24 = vld [vmem:[#allocation5 + $0xdf8] sm:$0xff]  ;;  %v4918_v25 = vpack.c.bf16 %v866_v59, %v862_v13  ;;  %v886_v52 = vld [vmem:[#allocation5 + $0xe40] sm:$0xff] }
 0x157   : > { %5267 = vmatpush1.bf16.msra.mxu1 %v5266_v35  ;;  %4885 = vmatprep.subr.bf16.mxu0 %v4884_v36  ;;  %v5286_v35 = vpack.c.bf16 %v836_v28, %v832_v26  ;;  %v4904_v36 = vpack.c.bf16 %v843_v30, %v839_v29  ;;  %v870_v28 = vld [vmem:[#allocation5 + $0xdc0] sm:$0xff]  ;;  %v872_v30 = vld [vmem:[#allocation5 + $0xdd0] sm:$0xff] }
 0x158   : > { %5269 = vmatprep.subr.bf16.mxu1 %v5268_v39  ;;  %v5288_v39 = vpack.c.bf16 %v845_v32, %v841_v19  ;;  %v874_v29 = vld [vmem:[#allocation5 + $0xde0] sm:$0xff]  ;;  %v876_v32 = vld [vmem:[#allocation5 + $0xdf0] sm:$0xff] }
 0x159   : > { %v5306_v38 = vpack.c.bf16 %v876_v32, %v872_v30  ;;  %v902_v59 = vld [vmem:[#allocation5 + $0xec0] sm:$0xff] }
 0x15a   : > { %4887 = vmatpush1.bf16.msra.mxu0 %v4886_v45  ;;  %v853_v45 = vld [vmem:[#allocation5 + $0xd38] sm:$0xff]  ;;  %v914_v30 = vld [vmem:[#allocation5 + $0xf20] sm:$0xff] }
 0x15b   : > { %5271 = vmatpush1.bf16.msra.mxu1 %v5270_v46  ;;  %4889 = vmatprep.subr.bf16.mxu0 %v4888_v47  ;;  %v6493_v46 = vld [vmem:[%s7014_s16 + $0x40] sm:$0xff]  ;;  %v4906_v47 = vpack.c.bf16 %v842_v17, %v838_v37  ;;  %v5292_v53 = vpack.c.bf16 %v853_v45, %v849_v44  ;;  %v885_v37 = vld [vmem:[#allocation5 + $0xe38] sm:$0xff]  ;;  %v4922_v17 = vpack.c.bf16 %v874_v29, %v870_v28  ;;  %v884_v44 = vld [vmem:[#allocation5 + $0xe30] sm:$0xff] }
 0x15c   : > { %5273 = vmatprep.subr.bf16.mxu1 %v5272_v51  ;;  %v850_v51 = vld [vmem:[#allocation5 + $0xd20] sm:$0xff]  ;;  %v887_v45 = vld [vmem:[#allocation5 + $0xe48] sm:$0xff] }
 0x15d   : > { %v4910_v62 = vpack.c.bf16 %v850_v51, %v846_v50  ;;  %v5310_v50 = vpack.c.bf16 %v884_v44, %v880_v42  ;;  %v910_v29 = vld [vmem:[#allocation5 + $0xf00] sm:$0xff] }
 0x15e   : > { %4891 = vmatpush1.bf16.msra.mxu0 %v4890_v57  ;;  %v7123_v57 = vld [vmem:[%s7014_s16 + $0x68] sm:$0xff]  ;;  %v922_v42 = vld [vmem:[#allocation5 + $0xf60] sm:$0xff] }
 0x15f   : > { %5275 = vmatpush1.bf16.msra.mxu1 %v5274_v58  ;;  %4893 = vmatprep.subr.bf16.mxu0 %v4892_v60  ;;  %v857_v58 = vld [vmem:[#allocation5 + $0xd58] sm:$0xff] }
 0x160   : > { %5277 = vmatprep.subr.bf16.mxu1 %v5276_v0  ;;  %v861_v60 = vld [vmem:[#allocation5 + $0xd78] sm:$0xff]  ;;  %v4912_v0 = vpack.c.bf16 %v859_v56, %v855_v55  ;;  %v892_v56 = vld [vmem:[#allocation5 + $0xe70] sm:$0xff] }
 0x161   : > { %1441 = vmatmul.mubr.f32.vlgmr.msra.gmra.mrb[0].mxu0 %v6489_v14  ;;  %v5296_v4 = vpack.c.bf16 %v861_v60, %v857_v58  ;;  %v895_v58 = vld [vmem:[#allocation5 + $0xe88] sm:$0xff]  ;;  %v5314_v1 = vpack.c.bf16 %v892_v56, %v888_v54  ;;  %v930_v54 = vld [vmem:[#allocation5 + $0xfa0] sm:$0xff] }
 0x162   : > { %4895 = vmatpush1.bf16.msra.mxu0 %v4894_v6  ;;  %1975 = vmatmul.mubr.f32.vlgmr.msra.gmra.mrb[0].mxu1 %v6489_v14  ;;  %v863_v6 = vld [vmem:[#allocation5 + $0xd88] sm:$0xff]  ;;  %v864_v14 = vld [vmem:[#allocation5 + $0xd90] sm:$0xff] }
 0x163   : > { %5279 = vmatpush1.bf16.msra.mxu1 %v5278_v7  ;;  %4897 = vmatprep.subr.bf16.mxu0 %v4896_v8  ;;  %v867_v7 = vld [vmem:[#allocation5 + $0xda8] sm:$0xff]  ;;  %v6496_v8 = vld [vmem:[%s7014_s16 + $0x18] sm:$0xff]  ;;  %v5302_v26 = vpack.c.bf16 %v868_v18, %v864_v14  ;;  %v906_v14 = vld [vmem:[#allocation5 + $0xee0] sm:$0xff] }
 0x164   : > { %5281 = vmatprep.subr.bf16.mxu1 %v5280_v12  ;;  %1446 = vmatprep.mubr.f32.mxu0 %v7111_v31  ;;  %v5298_v12 = vpack.c.bf16 %v860_v5, %v856_v3  ;;  %v4916_v16 = vpack.c.bf16 %v867_v7, %v863_v6  ;;  %v899_v60 = vld [vmem:[#allocation5 + $0xea8] sm:$0xff]  ;;  %v894_v3 = vld [vmem:[#allocation5 + $0xe80] sm:$0xff]  ;;  %v896_v5 = vld [vmem:[#allocation5 + $0xe90] sm:$0xff] }
 0x165   : > { %1980 = vmatprep.mubr.f32.mxu1 %v7111_v31  ;;  %1447 = vmatmul.mubr.f32.gmra.mrb[2].mxu0 %v7116_v33  ;;  %v4932_v2 = vpack.c.bf16 %v899_v60, %v895_v58  ;;  %v900_v7 = vld [vmem:[#allocation5 + $0xeb0] sm:$0xff]  ;;  %v935_v60 = vld [vmem:[#allocation5 + $0xfc8] sm:$0xff] }
 0x166   : > { %4899 = vmatpush1.bf16.msra.mxu0 %v4898_v21  ;;  %1981 = vmatmul.mubr.f32.gmra.mrb[2].mxu1 %v7116_v33  ;;  %v871_v21 = vld [vmem:[#allocation5 + $0xdc8] sm:$0xff]  ;;  %v932_v58 = vld [vmem:[#allocation5 + $0xfb0] sm:$0xff] }
 0x167   : > { %5283 = vmatpush1.bf16.msra.mxu1 %v5282_v22  ;;  %4901 = vmatprep.subr.bf16.mxu0 %v4900_v23  ;;  %v875_v22 = vld [vmem:[#allocation5 + $0xde8] sm:$0xff]  ;;  %v873_v23 = vld [vmem:[#allocation5 + $0xdd8] sm:$0xff] }
 0x168   : > { %5285 = vmatprep.subr.bf16.mxu1 %v5284_v27  ;;  %1452 = vmatprep.mubr.f32.mxu0 %v6492_v43  ;;  %v4920_v27 = vpack.c.bf16 %v875_v22, %v871_v21  ;;  %v5304_v19 = vpack.c.bf16 %v877_v24, %v873_v23  ;;  %v908_v21 = vld [vmem:[#allocation5 + $0xef0] sm:$0xff]  ;;  %v911_v22 = vld [vmem:[#allocation5 + $0xf08] sm:$0xff]  ;;  %v913_v24 = vld [vmem:[#allocation5 + $0xf18] sm:$0xff] }
 0x169   : > { %1986 = vmatprep.mubr.f32.mxu1 %v6492_v43  ;;  %1453 = vmatmul.mubr.f32.gmra.mrb[4].mxu0 %v6493_v46  ;;  %v915_v23 = vld [vmem:[#allocation5 + $0xf28] sm:$0xff] }
 0x16a   : > { %4903 = vmatpush1.bf16.msra.mxu0 %v4902_v34  ;;  %1987 = vmatmul.mubr.f32.gmra.mrb[4].mxu1 %v6493_v46  ;;  %v879_v34 = vld [vmem:[#allocation5 + $0xe08] sm:$0xff]  ;;  %v4940_v28 = vpack.c.bf16 %v915_v23, %v911_v22  ;;  %v948_v22 = vld [vmem:[#allocation5 + $0x1030] sm:$0xff] }
 0x16b   : > { %5287 = vmatpush1.bf16.msra.mxu1 %v5286_v35  ;;  %4905 = vmatprep.subr.bf16.mxu0 %v4904_v36  ;;  %v883_v35 = vld [vmem:[#allocation5 + $0xe28] sm:$0xff]  ;;  %v881_v36 = vld [vmem:[#allocation5 + $0xe18] sm:$0xff] }
 0x16c   : > { %5289 = vmatprep.subr.bf16.mxu1 %v5288_v39  ;;  %1458 = vmatprep.mubr.f32.mxu0 %v7123_v57  ;;  %v4924_v39 = vpack.c.bf16 %v883_v35, %v879_v34  ;;  %v5308_v43 = vpack.c.bf16 %v885_v37, %v881_v36  ;;  %v891_v46 = vld [vmem:[#allocation5 + $0xe68] sm:$0xff]  ;;  %v916_v34 = vld [vmem:[#allocation5 + $0xf30] sm:$0xff]  ;;  %v921_v37 = vld [vmem:[#allocation5 + $0xf58] sm:$0xff] }
 0x16d   : > { %1992 = vmatprep.mubr.f32.mxu1 %v7123_v57  ;;  %1459 = vmatmul.mubr.f32.gmra.mrb[6].mxu0 %v7128_v61  ;;  %v4928_v51 = vpack.c.bf16 %v891_v46, %v887_v45  ;;  %v919_v35 = vld [vmem:[#allocation5 + $0xf48] sm:$0xff]  ;;  %v924_v45 = vld [vmem:[#allocation5 + $0xf70] sm:$0xff] }
 0x16e   : > { %4907 = vmatpush1.bf16.msra.mxu0 %v4906_v47  ;;  %1993 = vmatmul.mubr.f32.gmra.mrb[6].mxu1 %v7128_v61  ;;  %v889_v47 = vld [vmem:[#allocation5 + $0xe58] sm:$0xff]  ;;  %v923_v36 = vld [vmem:[#allocation5 + $0xf68] sm:$0xff] }
 0x16f   : > { %5291 = vmatpush1.bf16.msra.mxu1 %v5290_v48  ;;  %4909 = vmatprep.subr.bf16.mxu0 %v4908_v49  ;;  %v893_v48 = vld [vmem:[#allocation5 + $0xe78] sm:$0xff]  ;;  %v4926_v49 = vpack.c.bf16 %v882_v41, %v878_v40  ;;  %v4944_v40 = vpack.c.bf16 %v923_v36, %v919_v35  ;;  %v918_v41 = vld [vmem:[#allocation5 + $0xf40] sm:$0xff]  ;;  %v927_v46 = vld [vmem:[#allocation5 + $0xf88] sm:$0xff] }
 0x170   : > { %5293 = vmatprep.subr.bf16.mxu1 %v5292_v53  ;;  %1529 = vmatprep.mubr.f32.mxu0 %v6496_v8  ;;  %v890_v53 = vld [vmem:[#allocation5 + $0xe60] sm:$0xff]  ;;  %v5312_v55 = vpack.c.bf16 %v893_v48, %v889_v47  ;;  %v931_v47 = vld [vmem:[#allocation5 + $0xfa8] sm:$0xff]  ;;  %v929_v48 = vld [vmem:[#allocation5 + $0xf98] sm:$0xff] }
 0x171   : > { %2063 = vmatprep.mubr.f32.mxu1 %v6496_v8  ;;  %v903_v8 = vld [vmem:[#allocation5 + $0xec8] sm:$0xff]  ;;  %v956_v35 = vld [vmem:[#allocation5 + $0x1070] sm:$0xff] }
 0x172   : > { %4911 = vmatpush1.bf16.msra.mxu0 %v4910_v62  ;;  %v897_v62 = vld [vmem:[#allocation5 + $0xe98] sm:$0xff]  ;;  %v4936_v13 = vpack.c.bf16 %v907_v9, %v903_v8  ;;  %v940_v8 = vld [vmem:[#allocation5 + $0xff0] sm:$0xff]  ;;  %v943_v9 = vld [vmem:[#allocation5 + $0x1008] sm:$0xff] }
 0x173   : > { %5295 = vmatpush1.bf16.msra.mxu1 %v5294_v63  ;;  %4913 = vmatprep.subr.bf16.mxu0 %v4912_v0  ;;  %v901_v63 = vld [vmem:[#allocation5 + $0xeb8] sm:$0xff]  ;;  %v4930_v0 = vpack.c.bf16 %v890_v53, %v886_v52  ;;  %v4948_v52 = vpack.c.bf16 %v931_v47, %v927_v46  ;;  %v926_v53 = vld [vmem:[#allocation5 + $0xf80] sm:$0xff]  ;;  %v951_v23 = vld [vmem:[#allocation5 + $0x1048] sm:$0xff] }
 0x174   : > { %5297 = vmatprep.subr.bf16.mxu1 %v5296_v4  ;;  %v898_v4 = vld [vmem:[#allocation5 + $0xea0] sm:$0xff]  ;;  %v5316_v6 = vpack.c.bf16 %v901_v63, %v897_v62  ;;  %v939_v62 = vld [vmem:[#allocation5 + $0xfe8] sm:$0xff]  ;;  %v937_v63 = vld [vmem:[#allocation5 + $0xfd8] sm:$0xff] }
 0x175   : > { %v959_v36 = vld [vmem:[#allocation5 + $0x1088] sm:$0xff]  ;;  %v964_v47 = vld [vmem:[#allocation5 + $0x10b0] sm:$0xff] }
 0x176   : > { %4915 = vmatpush1.bf16.msra.mxu0 %v4914_v11  ;;  %v909_v11 = vld [vmem:[#allocation5 + $0xef8] sm:$0xff] }
 0x177   : > { %5299 = vmatpush1.bf16.msra.mxu1 %v5298_v12  ;;  %4917 = vmatprep.subr.bf16.mxu0 %v4916_v16  ;;  %v4934_v12 = vpack.c.bf16 %v898_v4, %v894_v3  ;;  %v5318_v16 = vpack.c.bf16 %v900_v7, %v896_v5  ;;  %v5320_v18 = vpack.c.bf16 %v909_v11, %v905_v10  ;;  %v934_v4 = vld [vmem:[#allocation5 + $0xfc0] sm:$0xff]  ;;  %v947_v10 = vld [vmem:[#allocation5 + $0x1028] sm:$0xff]  ;;  %v945_v11 = vld [vmem:[#allocation5 + $0x1018] sm:$0xff] }
 0x178   : > { %5301 = vmatprep.subr.bf16.mxu1 %v5300_v15  ;;  %v904_v15 = vld [vmem:[#allocation5 + $0xed0] sm:$0xff]  ;;  %v4952_v3 = vpack.c.bf16 %v939_v62, %v935_v60  ;;  %v938_v5 = vld [vmem:[#allocation5 + $0xfe0] sm:$0xff] }
 0x179   : > { %v970_v60 = vld [vmem:[#allocation5 + $0x10e0] sm:$0xff]  ;;  %v968_v62 = vld [vmem:[#allocation5 + $0x10d0] sm:$0xff] }
 0x17a   : > { %4919 = vmatpush1.bf16.msra.mxu0 %v4918_v25  ;;  %v917_v25 = vld [vmem:[#allocation5 + $0xf38] sm:$0xff] }
 0x17b   : > { %5303 = vmatpush1.bf16.msra.mxu1 %v5302_v26  ;;  %4921 = vmatprep.subr.bf16.mxu0 %v4920_v27  ;;  %v4938_v26 = vpack.c.bf16 %v906_v14, %v902_v59  ;;  %v5322_v27 = vpack.c.bf16 %v908_v21, %v904_v15  ;;  %v5324_v32 = vpack.c.bf16 %v917_v25, %v913_v24  ;;  %v942_v14 = vld [vmem:[#allocation5 + $0x1000] sm:$0xff]  ;;  %v955_v24 = vld [vmem:[#allocation5 + $0x1068] sm:$0xff]  ;;  %v953_v25 = vld [vmem:[#allocation5 + $0x1058] sm:$0xff] }
 0x17c   : > { %5305 = vmatprep.subr.bf16.mxu1 %v5304_v19  ;;  %v912_v19 = vld [vmem:[#allocation5 + $0xf10] sm:$0xff]  ;;  %v4956_v59 = vpack.c.bf16 %v947_v10, %v943_v9  ;;  %v946_v15 = vld [vmem:[#allocation5 + $0x1020] sm:$0xff]  ;;  %v7148_v9 = vrot.slane %v7111_v31, 1  ;;  %v7151_v31 = vld [vmem:[%s7014_s16 + $0x78] sm:$0xff] }
 0x17e   : > { %4923 = vmatpush1.bf16.msra.mxu0 %v4922_v17  ;;  %v925_v17 = vld [vmem:[#allocation5 + $0xf78] sm:$0xff] }
 0x17f   : > { %5307 = vmatpush1.bf16.msra.mxu1 %v5306_v38  ;;  %4925 = vmatprep.subr.bf16.mxu0 %v4924_v39  ;;  %v4942_v38 = vpack.c.bf16 %v914_v30, %v910_v29  ;;  %v5326_v39 = vpack.c.bf16 %v916_v34, %v912_v19  ;;  %v5328_v44 = vpack.c.bf16 %v925_v17, %v921_v37  ;;  %v950_v30 = vld [vmem:[#allocation5 + $0x1040] sm:$0xff]  ;;  %v963_v37 = vld [vmem:[#allocation5 + $0x10a8] sm:$0xff]  ;;  %v6497_v17 = vld [vmem:[%s7014_s16 + $0x10] sm:$0xff] }
 0x180   : > { %5309 = vmatprep.subr.bf16.mxu1 %v5308_v43  ;;  %v920_v43 = vld [vmem:[#allocation5 + $0xf50] sm:$0xff]  ;;  %v4960_v29 = vpack.c.bf16 %v955_v24, %v951_v23  ;;  %v954_v19 = vld [vmem:[#allocation5 + $0x1060] sm:$0xff]  ;;  %v989_v23 = vld [vmem:[#allocation5 + $0x1178] sm:$0xff] }
 0x181   : > { %v7156_v24 = vld [vmem:[%s7014_s16 + $0x70] sm:$0xff] }
 0x182   : > { %4927 = vmatpush1.bf16.msra.mxu0 %v4926_v49  ;;  %v933_v49 = vld [vmem:[#allocation5 + $0xfb8] sm:$0xff] }
 0x183   : > { %5311 = vmatpush1.bf16.msra.mxu1 %v5310_v50  ;;  %4929 = vmatprep.subr.bf16.mxu0 %v4928_v51  ;;  %v4946_v50 = vpack.c.bf16 %v922_v42, %v918_v41  ;;  %v5330_v51 = vpack.c.bf16 %v924_v45, %v920_v43  ;;  %v5332_v56 = vpack.c.bf16 %v933_v49, %v929_v48  ;;  %v958_v43 = vld [vmem:[#allocation5 + $0x1080] sm:$0xff]  ;;  %v960_v45 = vld [vmem:[#allocation5 + $0x1090] sm:$0xff]  ;;  %v967_v48 = vld [vmem:[#allocation5 + $0x10c8] sm:$0xff] }
 0x184   : > { %5313 = vmatprep.subr.bf16.mxu1 %v5312_v55  ;;  %v928_v55 = vld [vmem:[#allocation5 + $0xf90] sm:$0xff]  ;;  %v4964_v42 = vpack.c.bf16 %v963_v37, %v959_v36  ;;  %v971_v49 = vld [vmem:[#allocation5 + $0x10e8] sm:$0xff]  ;;  %v993_v37 = vld [vmem:[#allocation5 + $0x1198] sm:$0xff] }
 0x185   : > { %v995_v36 = vld [vmem:[#allocation5 + $0x11a8] sm:$0xff] }
 0x186   : > { %4931 = vmatpush1.bf16.msra.mxu0 %v4930_v0  ;;  %v941_v0 = vld [vmem:[#allocation5 + $0xff8] sm:$0xff] }
 0x187   : > { %5315 = vmatpush1.bf16.msra.mxu1 %v5314_v1  ;;  %4933 = vmatprep.subr.bf16.mxu0 %v4932_v2  ;;  %v4950_v1 = vpack.c.bf16 %v930_v54, %v926_v53  ;;  %v5334_v2 = vpack.c.bf16 %v932_v58, %v928_v55  ;;  %v5336_v7 = vpack.c.bf16 %v941_v0, %v937_v63  ;;  %v7140_v53 = vld [vmem:[%s7014_s16 + $0x30] sm:$0xff]  ;;  %v966_v58 = vld [vmem:[#allocation5 + $0x10c0] sm:$0xff] }
 0x188   : > { %5317 = vmatprep.subr.bf16.mxu1 %v5316_v6  ;;  %v936_v6 = vld [vmem:[#allocation5 + $0xfd0] sm:$0xff]  ;;  %v5350_v55 = vpack.c.bf16 %v964_v47, %v960_v45  ;;  %v4970_v10 = vpack.c.bf16 %v970_v60, %v966_v58  ;;  %v1003_v47 = vld [vmem:[#allocation5 + $0x11e8] sm:$0xff] }
 0x189   : > { %v972_v0 = vld [vmem:[#allocation5 + $0x10f0] sm:$0xff] }
 0x18a   : > { %4935 = vmatpush1.bf16.msra.mxu0 %v4934_v12  ;;  %v949_v12 = vld [vmem:[#allocation5 + $0x1038] sm:$0xff]  ;;  %v996_v45 = vld [vmem:[#allocation5 + $0x11b0] sm:$0xff] }
 0x18b   : > { %5319 = vmatpush1.bf16.msra.mxu1 %v5318_v16  ;;  %4937 = vmatprep.subr.bf16.mxu0 %v4936_v13  ;;  %v4954_v16 = vpack.c.bf16 %v938_v5, %v934_v4  ;;  %v5338_v13 = vpack.c.bf16 %v940_v8, %v936_v6  ;;  %v5340_v21 = vpack.c.bf16 %v949_v12, %v945_v11  ;;  %v977_v4 = vld [vmem:[#allocation5 + $0x1118] sm:$0xff]  ;;  %v6501_v6 = vld [vmem:[%s7014_s16 + $0x50] sm:$0xff] }
 0x18c   : > { %5321 = vmatprep.subr.bf16.mxu1 %v5320_v18  ;;  %v944_v18 = vld [vmem:[#allocation5 + $0x1010] sm:$0xff]  ;;  %v981_v5 = vld [vmem:[#allocation5 + $0x1138] sm:$0xff]  ;;  %v5354_v11 = vpack.c.bf16 %v972_v0, %v968_v62  ;;  %v1011_v0 = vld [vmem:[#allocation5 + $0x1228] sm:$0xff] }
 0x18d   : > { %v1000_v58 = vld [vmem:[#allocation5 + $0x11d0] sm:$0xff] }
 0x18e   : > { %4939 = vmatpush1.bf16.msra.mxu0 %v4938_v26  ;;  %v957_v26 = vld [vmem:[#allocation5 + $0x1078] sm:$0xff]  ;;  %v1004_v62 = vld [vmem:[#allocation5 + $0x11f0] sm:$0xff] }
 0x18f   : > { %5323 = vmatpush1.bf16.msra.mxu1 %v5322_v27  ;;  %4941 = vmatprep.subr.bf16.mxu0 %v4940_v28  ;;  %v4958_v27 = vpack.c.bf16 %v946_v15, %v942_v14  ;;  %v5342_v28 = vpack.c.bf16 %v948_v22, %v944_v18  ;;  %v5344_v34 = vpack.c.bf16 %v957_v26, %v953_v25  ;;  %v980_v15 = vld [vmem:[#allocation5 + $0x1130] sm:$0xff]  ;;  %v983_v18 = vld [vmem:[#allocation5 + $0x1148] sm:$0xff]  ;;  %v985_v22 = vld [vmem:[#allocation5 + $0x1158] sm:$0xff] }
 0x190   : > { %5325 = vmatprep.subr.bf16.mxu1 %v5324_v32  ;;  %v952_v32 = vld [vmem:[#allocation5 + $0x1050] sm:$0xff]  ;;  %v5356_v14 = vpack.c.bf16 %v981_v5, %v977_v4  ;;  %v5370_v4 = vpack.c.bf16 %v1004_v62, %v1000_v58 }
 0x191   : > { %v5346_v41 = vpack.c.bf16 %v956_v35, %v952_v32  ;;  %v5360_v32 = vpack.c.bf16 %v989_v23, %v985_v22  ;;  %v991_v35 = vld [vmem:[#allocation5 + $0x1188] sm:$0xff]  ;;  %v1018_v22 = vld [vmem:[#allocation5 + $0x1260] sm:$0xff]  ;;  %v1016_v23 = vld [vmem:[#allocation5 + $0x1250] sm:$0xff] }
 0x192   : > { %4943 = vmatpush1.bf16.msra.mxu0 %v4942_v38  ;;  %v961_v38 = vld [vmem:[#allocation5 + $0x1098] sm:$0xff] }
 0x193   : > { %5327 = vmatpush1.bf16.msra.mxu1 %v5326_v39  ;;  %4945 = vmatprep.subr.bf16.mxu0 %v4944_v40  ;;  %v965_v39 = vld [vmem:[#allocation5 + $0x10b8] sm:$0xff]  ;;  %v4962_v40 = vpack.c.bf16 %v954_v19, %v950_v30  ;;  %v986_v30 = vld [vmem:[#allocation5 + $0x1160] sm:$0xff]  ;;  %v984_v19 = vld [vmem:[#allocation5 + $0x1150] sm:$0xff] }
 0x194   : > { %5329 = vmatprep.subr.bf16.mxu1 %v5328_v44  ;;  %v962_v44 = vld [vmem:[#allocation5 + $0x10a0] sm:$0xff]  ;;  %v5348_v46 = vpack.c.bf16 %v965_v39, %v961_v38 }
 0x195   : > { %v4966_v54 = vpack.c.bf16 %v962_v44, %v958_v43  ;;  %v992_v43 = vld [vmem:[#allocation5 + $0x1190] sm:$0xff] }
 0x196   : > { %4947 = vmatpush1.bf16.msra.mxu0 %v4946_v50  ;;  %v7135_v50 = vld [vmem:[%s7014_s16 + $0x38] sm:$0xff] }
 0x197   : > { %5331 = vmatpush1.bf16.msra.mxu1 %v5330_v51  ;;  %4949 = vmatprep.subr.bf16.mxu0 %v4948_v52  ;;  %v969_v51 = vld [vmem:[#allocation5 + $0x10d8] sm:$0xff] }
 0x198   : > { %5333 = vmatprep.subr.bf16.mxu1 %v5332_v56  ;;  %v973_v52 = vld [vmem:[#allocation5 + $0x10f8] sm:$0xff]  ;;  %v4968_v56 = vpack.c.bf16 %v971_v49, %v967_v48 }
 0x199   : > { %v5352_v63 = vpack.c.bf16 %v973_v52, %v969_v51  ;;  %v1001_v48 = vld [vmem:[#allocation5 + $0x11d8] sm:$0xff]  ;;  %v5366_v52 = vpack.c.bf16 %v996_v45, %v992_v43 }
 0x19a   : > { %4951 = vmatpush1.bf16.msra.mxu0 %v4950_v1  ;;  %v975_v1 = vld [vmem:[#allocation5 + $0x1108] sm:$0xff]  ;;  %v1005_v49 = vld [vmem:[#allocation5 + $0x11f8] sm:$0xff] }
 0x19b   : > { %5335 = vmatpush1.bf16.msra.mxu1 %v5334_v2  ;;  %4953 = vmatprep.subr.bf16.mxu0 %v4952_v3  ;;  %v979_v2 = vld [vmem:[#allocation5 + $0x1128] sm:$0xff]  ;;  %v6500_v3 = vld [vmem:[%s7014_s16 + $0x58] sm:$0xff]  ;;  %v5368_v60 = vpack.c.bf16 %v1005_v49, %v1001_v48  ;;  %v1032_v48 = vld [vmem:[#allocation5 + $0x12d0] sm:$0xff] }
 0x19c   : > { %5337 = vmatprep.subr.bf16.mxu1 %v5336_v7  ;;  %v6502_v7 = vld [vmem:[%s7014_s16 + $0x8] sm:$0xff]  ;;  %v4972_v12 = vpack.c.bf16 %v979_v2, %v975_v1  ;;  %v1009_v1 = vld [vmem:[#allocation5 + $0x1218] sm:$0xff] }
 0x19d   : > { %v385_v8 = vrot.slane %v6502_v7, 1  ;;  %v1013_v2 = vld [vmem:[#allocation5 + $0x1238] sm:$0xff]  ;;  %v1010_v7 = vld [vmem:[#allocation5 + $0x1220] sm:$0xff] }
 0x19e   : > { %4955 = vmatpush1.bf16.msra.mxu0 %v4954_v16  ;;  %v974_v16 = vld [vmem:[#allocation5 + $0x1100] sm:$0xff] }
 0x19f   : > { %5339 = vmatpush1.bf16.msra.mxu1 %v5338_v13  ;;  %4957 = vmatprep.subr.bf16.mxu0 %v4956_v59  ;;  %v978_v13 = vld [vmem:[#allocation5 + $0x1120] sm:$0xff]  ;;  %v976_v59 = vld [vmem:[#allocation5 + $0x1110] sm:$0xff]  ;;  %v387_v25 = vsel %vm381_vm2, %v385_v8, %v7148_v9 }
 0x1a0   : > { %5341 = vmatprep.subr.bf16.mxu1 %v5340_v21  ;;  %v987_v21 = vld [vmem:[#allocation5 + $0x1168] sm:$0xff]  ;;  %v4974_v26 = vpack.c.bf16 %v978_v13, %v974_v16  ;;  %v1008_v8 = vld [vmem:[#allocation5 + $0x1210] sm:$0xff]  ;;  %v1017_v13 = vld [vmem:[#allocation5 + $0x1258] sm:$0xff] }
 0x1a1   : > { %1530 = vmatmul.mubr.f32.vlgmr.msra.gmra.mrb[0].mxu0 %v6497_v17  ;;  %v1019_v16 = vld [vmem:[#allocation5 + $0x1268] sm:$0xff] }
 0x1a2   : > { %4959 = vmatpush1.bf16.msra.mxu0 %v4958_v27  ;;  %2064 = vmatmul.mubr.f32.vlgmr.msra.gmra.mrb[0].mxu1 %v6497_v17  ;;  %v5358_v27 = vpack.c.bf16 %v980_v15, %v976_v59  ;;  %v997_v17 = vld [vmem:[#allocation5 + $0x11b8] sm:$0xff] }
 0x1a3   : > { %5343 = vmatpush1.bf16.msra.mxu1 %v5342_v28  ;;  %4961 = vmatprep.subr.bf16.mxu0 %v4960_v29  ;;  %v4976_v28 = vpack.c.bf16 %v987_v21, %v983_v18  ;;  %v982_v29 = vld [vmem:[#allocation5 + $0x1140] sm:$0xff]  ;;  %v5364_v44 = vpack.c.bf16 %v997_v17, %v993_v37  ;;  %v1021_v59 = vld [vmem:[#allocation5 + $0x1278] sm:$0xff]  ;;  %v1024_v37 = vld [vmem:[#allocation5 + $0x1290] sm:$0xff] }
 0x1a4   : > { %5345 = vmatprep.subr.bf16.mxu1 %v5344_v34  ;;  %1535 = vmatprep.mubr.f32.mxu0 %v7135_v50  ;;  %v988_v34 = vld [vmem:[#allocation5 + $0x1170] sm:$0xff]  ;;  %v4978_v38 = vpack.c.bf16 %v986_v30, %v982_v29  ;;  %v1014_v21 = vld [vmem:[#allocation5 + $0x1240] sm:$0xff]  ;;  %v1025_v29 = vld [vmem:[#allocation5 + $0x1298] sm:$0xff] }
 0x1a5   : > { %2069 = vmatprep.mubr.f32.mxu1 %v7135_v50  ;;  %1536 = vmatmul.mubr.f32.gmra.mrb[2].mxu0 %v7140_v53  ;;  %v5362_v39 = vpack.c.bf16 %v988_v34, %v984_v19  ;;  %v1029_v30 = vld [vmem:[#allocation5 + $0x12b8] sm:$0xff]  ;;  %v4994_v19 = vpack.c.bf16 %v1018_v22, %v1014_v21 }
 0x1a6   : > { %4963 = vmatpush1.bf16.msra.mxu0 %v4962_v40  ;;  %2070 = vmatmul.mubr.f32.gmra.mrb[2].mxu1 %v7140_v53  ;;  %v4980_v40 = vpack.c.bf16 %v995_v36, %v991_v35  ;;  %v1022_v35 = vld [vmem:[#allocation5 + $0x1280] sm:$0xff]  ;;  %v5380_v17 = vpack.c.bf16 %v1029_v30, %v1025_v29  ;;  %v1057_v21 = vld [vmem:[#allocation5 + $0x1398] sm:$0xff]  ;;  %v1056_v29 = vld [vmem:[#allocation5 + $0x1390] sm:$0xff] }
 0x1a7   : > { %5347 = vmatpush1.bf16.msra.mxu1 %v5346_v41  ;;  %4965 = vmatprep.subr.bf16.mxu0 %v4964_v42  ;;  %v990_v41 = vld [vmem:[#allocation5 + $0x1180] sm:$0xff]  ;;  %v1061_v22 = vld [vmem:[#allocation5 + $0x13b8] sm:$0xff] }
 0x1a8   : > { %5349 = vmatprep.subr.bf16.mxu1 %v5348_v46  ;;  %1541 = vmatprep.mubr.f32.mxu0 %v6500_v3  ;;  %v994_v42 = vld [vmem:[#allocation5 + $0x11a0] sm:$0xff]  ;;  %v999_v46 = vld [vmem:[#allocation5 + $0x11c8] sm:$0xff]  ;;  %v5396_v30 = vpack.c.bf16 %v1061_v22, %v1057_v21  ;;  %v7167_v21 = vrot.slane %v7123_v57, 1 }
 0x1a9   : > { %2075 = vmatprep.mubr.f32.mxu1 %v6500_v3  ;;  %1542 = vmatmul.mubr.f32.gmra.mrb[4].mxu0 %v6501_v6  ;;  %v4982_v51 = vpack.c.bf16 %v994_v42, %v990_v41  ;;  %v1026_v36 = vld [vmem:[#allocation5 + $0x12a0] sm:$0xff]  ;;  %v1033_v41 = vld [vmem:[#allocation5 + $0x12d8] sm:$0xff]  ;;  %v1095_v57 = vld [vmem:[#allocation5 + $0x14c8] sm:$0xff] }
 0x1aa   : > { %4967 = vmatpush1.bf16.msra.mxu0 %v4966_v54  ;;  %2076 = vmatmul.mubr.f32.gmra.mrb[4].mxu1 %v6501_v6  ;;  %v4984_v54 = vpack.c.bf16 %v1003_v47, %v999_v46  ;;  %v1006_v6 = vld [vmem:[#allocation5 + $0x1200] sm:$0xff]  ;;  %v1037_v42 = vld [vmem:[#allocation5 + $0x12f8] sm:$0xff]  ;;  %v4998_v43 = vpack.c.bf16 %v1026_v36, %v1022_v35 }
 0x1ab   : > { %5351 = vmatpush1.bf16.msra.mxu1 %v5350_v55  ;;  %4969 = vmatprep.subr.bf16.mxu0 %v4968_v56  ;;  %v998_v55 = vld [vmem:[#allocation5 + $0x11c0] sm:$0xff]  ;;  %v5384_v49 = vpack.c.bf16 %v1037_v42, %v1033_v41  ;;  %v1065_v35 = vld [vmem:[#allocation5 + $0x13d8] sm:$0xff]  ;;  %v1064_v41 = vld [vmem:[#allocation5 + $0x13d0] sm:$0xff] }
 0x1ac   : > { %5353 = vmatprep.subr.bf16.mxu1 %v5352_v63  ;;  %1547 = vmatprep.mubr.f32.mxu0 %v7151_v31  ;;  %v1002_v56 = vld [vmem:[#allocation5 + $0x11e0] sm:$0xff]  ;;  %v1007_v63 = vld [vmem:[#allocation5 + $0x1208] sm:$0xff]  ;;  %v1069_v36 = vld [vmem:[#allocation5 + $0x13f8] sm:$0xff] }
 0x1ad   : > { %2081 = vmatprep.mubr.f32.mxu1 %v7151_v31  ;;  %1548 = vmatmul.mubr.f32.gmra.mrb[6].mxu0 %v7156_v24  ;;  %v4986_v3 = vpack.c.bf16 %v1002_v56, %v998_v55  ;;  %v4988_v5 = vpack.c.bf16 %v1011_v0, %v1007_v63  ;;  %v1030_v46 = vld [vmem:[#allocation5 + $0x12c0] sm:$0xff]  ;;  %v1041_v55 = vld [vmem:[#allocation5 + $0x1318] sm:$0xff]  ;;  %v5400_v42 = vpack.c.bf16 %v1069_v36, %v1065_v35  ;;  %v1099_v35 = vld [vmem:[#allocation5 + $0x14e8] sm:$0xff] }
 0x1ae   : > { %4971 = vmatpush1.bf16.msra.mxu0 %v4970_v10  ;;  %2082 = vmatmul.mubr.f32.gmra.mrb[6].mxu1 %v7156_v24  ;;  %v5372_v10 = vpack.c.bf16 %v1013_v2, %v1009_v1  ;;  %v1034_v47 = vld [vmem:[#allocation5 + $0x12e0] sm:$0xff]  ;;  %v1045_v56 = vld [vmem:[#allocation5 + $0x1338] sm:$0xff]  ;;  %v1040_v1 = vld [vmem:[#allocation5 + $0x1310] sm:$0xff] }
 0x1af   : > { %5355 = vmatpush1.bf16.msra.mxu1 %v5354_v11  ;;  %4973 = vmatprep.subr.bf16.mxu0 %v4972_v12  ;;  %v1012_v11 = vld [vmem:[#allocation5 + $0x1230] sm:$0xff]  ;;  %v1015_v12 = vld [vmem:[#allocation5 + $0x1248] sm:$0xff]  ;;  %v5002_v58 = vpack.c.bf16 %v1034_v47, %v1030_v46  ;;  %v1038_v63 = vld [vmem:[#allocation5 + $0x1300] sm:$0xff]  ;;  %v5388_v2 = vpack.c.bf16 %v1045_v56, %v1041_v55 }
 0x1b0   : > { %5357 = vmatprep.subr.bf16.mxu1 %v5356_v14  ;;  %1618 = vmatprep.mubr.f32.mxu0 %v387_v25  ;;  %v4990_v14 = vpack.c.bf16 %v1010_v7, %v1006_v6  ;;  %v5374_v15 = vpack.c.bf16 %v1012_v11, %v1008_v8  ;;  %v4992_v18 = vpack.c.bf16 %v1019_v16, %v1015_v12  ;;  %v1042_v0 = vld [vmem:[#allocation5 + $0x1320] sm:$0xff]  ;;  %v1049_v6 = vld [vmem:[#allocation5 + $0x1358] sm:$0xff] }
 0x1b1   : > { %2152 = vmatprep.mubr.f32.mxu1 %v387_v25  ;;  %v5376_v25 = vpack.c.bf16 %v1021_v59, %v1017_v13  ;;  %v1053_v7 = vld [vmem:[#allocation5 + $0x1378] sm:$0xff]  ;;  %v5006_v8 = vpack.c.bf16 %v1042_v0, %v1038_v63  ;;  %v1046_v12 = vld [vmem:[#allocation5 + $0x1340] sm:$0xff]  ;;  %v1048_v13 = vld [vmem:[#allocation5 + $0x1350] sm:$0xff] }
 0x1b2   : > { %4975 = vmatpush1.bf16.msra.mxu0 %v4974_v26  ;;  %v1020_v26 = vld [vmem:[#allocation5 + $0x1270] sm:$0xff]  ;;  %v1050_v16 = vld [vmem:[#allocation5 + $0x1360] sm:$0xff]  ;;  %v5392_v59 = vpack.c.bf16 %v1053_v7, %v1049_v6  ;;  %v1073_v46 = vld [vmem:[#allocation5 + $0x1418] sm:$0xff] }
 0x1b3   : > { %5359 = vmatpush1.bf16.msra.mxu1 %v5358_v27  ;;  %4977 = vmatprep.subr.bf16.mxu0 %v4976_v28  ;;  %v1023_v27 = vld [vmem:[#allocation5 + $0x1288] sm:$0xff]  ;;  %v1077_v47 = vld [vmem:[#allocation5 + $0x1438] sm:$0xff]  ;;  %v1070_v56 = vld [vmem:[#allocation5 + $0x1400] sm:$0xff] }
 0x1b4   : > { %5361 = vmatprep.subr.bf16.mxu1 %v5360_v32  ;;  %v1027_v28 = vld [vmem:[#allocation5 + $0x12a8] sm:$0xff]  ;;  %v5378_v32 = vpack.c.bf16 %v1020_v26, %v1016_v23  ;;  %v5010_v23 = vpack.c.bf16 %v1050_v16, %v1046_v12  ;;  %v1076_v63 = vld [vmem:[#allocation5 + $0x1430] sm:$0xff]  ;;  %v1078_v7 = vld [vmem:[#allocation5 + $0x1440] sm:$0xff] }
 0x1b5   : > { %v4996_v34 = vpack.c.bf16 %v1027_v28, %v1023_v27  ;;  %v1054_v27 = vld [vmem:[#allocation5 + $0x1380] sm:$0xff]  ;;  %v1079_v0 = vld [vmem:[#allocation5 + $0x1448] sm:$0xff]  ;;  %v1084_v12 = vld [vmem:[#allocation5 + $0x1470] sm:$0xff] }
 0x1b6   : > { %4979 = vmatpush1.bf16.msra.mxu0 %v4978_v38  ;;  %v1028_v38 = vld [vmem:[#allocation5 + $0x12b0] sm:$0xff]  ;;  %v1058_v28 = vld [vmem:[#allocation5 + $0x13a0] sm:$0xff]  ;;  %v1087_v16 = vld [vmem:[#allocation5 + $0x1488] sm:$0xff] }
 0x1b7   : > { %5363 = vmatpush1.bf16.msra.mxu1 %v5362_v39  ;;  %4981 = vmatprep.subr.bf16.mxu0 %v4980_v40  ;;  %v1031_v39 = vld [vmem:[#allocation5 + $0x12c8] sm:$0xff]  ;;  %v1097_v36 = vld [vmem:[#allocation5 + $0x14d8] sm:$0xff] }
 0x1b8   : > { %5365 = vmatprep.subr.bf16.mxu1 %v5364_v44  ;;  %v1035_v40 = vld [vmem:[#allocation5 + $0x12e8] sm:$0xff]  ;;  %v5382_v44 = vpack.c.bf16 %v1028_v38, %v1024_v37  ;;  %v5014_v37 = vpack.c.bf16 %v1058_v28, %v1054_v27 }
 0x1b9   : > { %v5000_v45 = vpack.c.bf16 %v1035_v40, %v1031_v39  ;;  %v1062_v39 = vld [vmem:[#allocation5 + $0x13c0] sm:$0xff] }
 0x1ba   : > { %4983 = vmatpush1.bf16.msra.mxu0 %v4982_v51  ;;  %v1036_v51 = vld [vmem:[#allocation5 + $0x12f0] sm:$0xff]  ;;  %v1066_v40 = vld [vmem:[#allocation5 + $0x13e0] sm:$0xff] }
 0x1bb   : > { %5367 = vmatpush1.bf16.msra.mxu1 %v5366_v52  ;;  %4985 = vmatprep.subr.bf16.mxu0 %v4984_v54  ;;  %v1039_v52 = vld [vmem:[#allocation5 + $0x1308] sm:$0xff] }
 0x1bc   : > { %5369 = vmatprep.subr.bf16.mxu1 %v5368_v60  ;;  %v1043_v54 = vld [vmem:[#allocation5 + $0x1328] sm:$0xff]  ;;  %v5386_v60 = vpack.c.bf16 %v1036_v51, %v1032_v48  ;;  %v5018_v48 = vpack.c.bf16 %v1066_v40, %v1062_v39  ;;  %v5032_v40 = vpack.c.bf16 %v1099_v35, %v1095_v57  ;;  %v1126_v35 = vld [vmem:[#allocation5 + $0x15c0] sm:$0xff] }
 0x1bd   : > { %v5004_v62 = vpack.c.bf16 %v1043_v54, %v1039_v52  ;;  %v383_v52 = vrot.slane %v7116_v33, 1 }
 0x1be   : > { %4987 = vmatpush1.bf16.msra.mxu0 %v4986_v3  ;;  %v1044_v3 = vld [vmem:[#allocation5 + $0x1330] sm:$0xff] }
 0x1bf   : > { %5371 = vmatpush1.bf16.msra.mxu1 %v5370_v4  ;;  %4989 = vmatprep.subr.bf16.mxu0 %v4988_v5  ;;  %v1047_v4 = vld [vmem:[#allocation5 + $0x1348] sm:$0xff] }
 0x1c0   : > { %5373 = vmatprep.subr.bf16.mxu1 %v5372_v10  ;;  %v1051_v5 = vld [vmem:[#allocation5 + $0x1368] sm:$0xff]  ;;  %v5390_v10 = vpack.c.bf16 %v1044_v3, %v1040_v1  ;;  %v1085_v3 = vld [vmem:[#allocation5 + $0x1478] sm:$0xff] }
 0x1c1   : > { %v5008_v11 = vpack.c.bf16 %v1051_v5, %v1047_v4  ;;  %v1083_v1 = vld [vmem:[#allocation5 + $0x1468] sm:$0xff] }
 0x1c2   : > { %4991 = vmatpush1.bf16.msra.mxu0 %v4990_v14  ;;  %v1052_v14 = vld [vmem:[#allocation5 + $0x1370] sm:$0xff]  ;;  %v5024_v6 = vpack.c.bf16 %v1083_v1, %v1079_v0  ;;  %v1111_v1 = vld [vmem:[#allocation5 + $0x1548] sm:$0xff] }
 0x1c3   : > { %5375 = vmatpush1.bf16.msra.mxu1 %v5374_v15  ;;  %4993 = vmatprep.subr.bf16.mxu0 %v4992_v18  ;;  %v1055_v15 = vld [vmem:[#allocation5 + $0x1388] sm:$0xff]  ;;  %v1108_v0 = vld [vmem:[#allocation5 + $0x1530] sm:$0xff] }
 0x1c4   : > { %5377 = vmatprep.subr.bf16.mxu1 %v5376_v25  ;;  %v1059_v18 = vld [vmem:[#allocation5 + $0x13a8] sm:$0xff]  ;;  %v5394_v25 = vpack.c.bf16 %v1052_v14, %v1048_v13  ;;  %v1093_v14 = vld [vmem:[#allocation5 + $0x14b8] sm:$0xff] }
 0x1c5   : > { %v5012_v26 = vpack.c.bf16 %v1059_v18, %v1055_v15  ;;  %v1091_v13 = vld [vmem:[#allocation5 + $0x14a8] sm:$0xff] }
 0x1c6   : > { %4995 = vmatpush1.bf16.msra.mxu0 %v4994_v19  ;;  %v1060_v19 = vld [vmem:[#allocation5 + $0x13b0] sm:$0xff]  ;;  %v6506_v15 = vld [vmem:[%s7014_s16 + $0x48] sm:$0xff]  ;;  %v5028_v28 = vpack.c.bf16 %v1091_v13, %v1087_v16 }
 0x1c7   : > { %5379 = vmatpush1.bf16.msra.mxu1 %v5378_v32  ;;  %4997 = vmatprep.subr.bf16.mxu0 %v4996_v34  ;;  %v1063_v32 = vld [vmem:[#allocation5 + $0x13c8] sm:$0xff]  ;;  %v397_v18 = vrot.slane %v6506_v15, 1 }
 0x1c8   : > { %5381 = vmatprep.subr.bf16.mxu1 %v5380_v17  ;;  %v1067_v34 = vld [vmem:[#allocation5 + $0x13e8] sm:$0xff]  ;;  %v5398_v17 = vpack.c.bf16 %v1060_v19, %v1056_v29  ;;  %v1086_v29 = vld [vmem:[#allocation5 + $0x1480] sm:$0xff]  ;;  %v1088_v19 = vld [vmem:[#allocation5 + $0x1490] sm:$0xff] }
 0x1c9   : > { %v5016_v38 = vpack.c.bf16 %v1067_v34, %v1063_v32  ;;  %v1092_v34 = vld [vmem:[#allocation5 + $0x14b0] sm:$0xff]  ;;  %v1119_v16 = vld [vmem:[#allocation5 + $0x1588] sm:$0xff] }
 0x1ca   : > { %4999 = vmatpush1.bf16.msra.mxu0 %v4998_v43  ;;  %v1068_v43 = vld [vmem:[#allocation5 + $0x13f0] sm:$0xff]  ;;  %v5414_v39 = vpack.c.bf16 %v1092_v34, %v1088_v19  ;;  %v1123_v13 = vld [vmem:[#allocation5 + $0x15a8] sm:$0xff]  ;;  %v1133_v19 = vld [vmem:[#allocation5 + $0x15f8] sm:$0xff] }
 0x1cb   : > { %5383 = vmatpush1.bf16.msra.mxu1 %v5382_v44  ;;  %5001 = vmatprep.subr.bf16.mxu0 %v5000_v45  ;;  %v1071_v44 = vld [vmem:[#allocation5 + $0x1408] sm:$0xff]  ;;  %v5402_v54 = vpack.c.bf16 %v1068_v43, %v1064_v41  ;;  %v1094_v41 = vld [vmem:[#allocation5 + $0x14c0] sm:$0xff] }
 0x1cc   : > { %5385 = vmatprep.subr.bf16.mxu1 %v5384_v49  ;;  %v1075_v45 = vld [vmem:[#allocation5 + $0x1428] sm:$0xff]  ;;  %v6505_v49 = vld [vmem:[%s7014_s16] sm:$0xff] }
 0x1cd   : > { %v382_v51 = vrot.slane %v6505_v49, 1  ;;  %v5020_v55 = vpack.c.bf16 %v1075_v45, %v1071_v44  ;;  %v1100_v44 = vld [vmem:[#allocation5 + $0x14f0] sm:$0xff]  ;;  %v1103_v45 = vld [vmem:[#allocation5 + $0x1508] sm:$0xff]  ;;  %v6508_v49 = vld [vmem:[%s7014_s16 + $0x18] sm:$0xff] }
 0x1ce   : > { %5003 = vmatpush1.bf16.msra.mxu0 %v5002_v58  ;;  %v1074_v58 = vld [vmem:[#allocation5 + $0x1420] sm:$0xff] }
 0x1cf   : > { %5387 = vmatpush1.bf16.msra.mxu1 %v5386_v60  ;;  %5005 = vmatprep.subr.bf16.mxu0 %v5004_v62  ;;  %v1072_v60 = vld [vmem:[#allocation5 + $0x1410] sm:$0xff]  ;;  %v5404_v62 = vpack.c.bf16 %v1077_v47, %v1073_v46  ;;  %v384_v4 = vsel %vm381_vm2, %v382_v51, %v383_v52  ;;  %v5022_v5 = vpack.c.bf16 %v1074_v58, %v1070_v56  ;;  %v1107_v46 = vld [vmem:[#allocation5 + $0x1528] sm:$0xff]  ;;  %v1105_v47 = vld [vmem:[#allocation5 + $0x1518] sm:$0xff]  ;;  %v391_v51 = vrot.slane %v6508_v49, 1 }
 0x1d0   : > { %5389 = vmatprep.subr.bf16.mxu1 %v5388_v2  ;;  %v1081_v2 = vld [vmem:[#allocation5 + $0x1458] sm:$0xff]  ;;  %v5406_v33 = vpack.c.bf16 %v1076_v63, %v1072_v60  ;;  %v5036_v56 = vpack.c.bf16 %v1107_v46, %v1103_v45  ;;  %v1102_v58 = vld [vmem:[#allocation5 + $0x1500] sm:$0xff]  ;;  %v1136_v46 = vld [vmem:[#allocation5 + $0x1610] sm:$0xff] }
 0x1d1   : > { %v1106_v60 = vld [vmem:[#allocation5 + $0x1520] sm:$0xff]  ;;  %v1143_v49 = vld [vmem:[#allocation5 + $0x1648] sm:$0xff] }
 0x1d2   : > { %5007 = vmatpush1.bf16.msra.mxu0 %v5006_v8  ;;  %v1082_v8 = vld [vmem:[#allocation5 + $0x1460] sm:$0xff] }
 0x1d3   : > { %5391 = vmatpush1.bf16.msra.mxu1 %v5390_v10  ;;  %5009 = vmatprep.subr.bf16.mxu0 %v5008_v11  ;;  %v1080_v10 = vld [vmem:[#allocation5 + $0x1450] sm:$0xff]  ;;  %v5408_v11 = vpack.c.bf16 %v1085_v3, %v1081_v2  ;;  %v5026_v22 = vpack.c.bf16 %v1082_v8, %v1078_v7  ;;  %v1115_v2 = vld [vmem:[#allocation5 + $0x1568] sm:$0xff]  ;;  %v1117_v3 = vld [vmem:[#allocation5 + $0x1578] sm:$0xff] }
 0x1d4   : > { %5393 = vmatprep.subr.bf16.mxu1 %v5392_v59  ;;  %v1089_v59 = vld [vmem:[#allocation5 + $0x1498] sm:$0xff]  ;;  %v5410_v27 = vpack.c.bf16 %v1084_v12, %v1080_v10  ;;  %v1110_v7 = vld [vmem:[#allocation5 + $0x1540] sm:$0xff]  ;;  %v1112_v10 = vld [vmem:[#allocation5 + $0x1550] sm:$0xff] }
 0x1d5   : > { %v5412_v32 = vpack.c.bf16 %v1093_v14, %v1089_v59  ;;  %v1114_v8 = vld [vmem:[#allocation5 + $0x1560] sm:$0xff]  ;;  %v1116_v12 = vld [vmem:[#allocation5 + $0x1570] sm:$0xff]  ;;  %v1121_v59 = vld [vmem:[#allocation5 + $0x1598] sm:$0xff] }
 0x1d6   : > { %5011 = vmatpush1.bf16.msra.mxu0 %v5010_v23  ;;  %v6507_v23 = vld [vmem:[%s7014_s16 + $0x40] sm:$0xff]  ;;  %v1125_v14 = vld [vmem:[#allocation5 + $0x15b8] sm:$0xff]  ;;  %v5042_v15 = vpack.c.bf16 %v1114_v8, %v1110_v7 }
 0x1d7   : > { %5395 = vmatpush1.bf16.msra.mxu1 %v5394_v25  ;;  %5013 = vmatprep.subr.bf16.mxu0 %v5012_v26  ;;  %v394_v25 = vrot.slane %v6507_v23, 1  ;;  %v7171_v26 = vrot.slane %v7128_v61, 1  ;;  %v399_v61 = vsel %vm381_vm2, %v397_v18, %v7167_v21  ;;  %v5426_v18 = vpack.c.bf16 %v1116_v12, %v1112_v10  ;;  %v1122_v23 = vld [vmem:[#allocation5 + $0x15a0] sm:$0xff] }
 0x1d8   : > { %5397 = vmatprep.subr.bf16.mxu1 %v5396_v30  ;;  %v1090_v30 = vld [vmem:[#allocation5 + $0x14a0] sm:$0xff] }
 0x1d9   : > { %v1138_v45 = vld [vmem:[#allocation5 + $0x1620] sm:$0xff] }
 0x1da   : > { %5015 = vmatpush1.bf16.msra.mxu0 %v5014_v37  ;;  %v1101_v37 = vld [vmem:[#allocation5 + $0x14f8] sm:$0xff]  ;;  %v1150_v8 = vld [vmem:[#allocation5 + $0x1680] sm:$0xff] }
 0x1db   : > { %5399 = vmatpush1.bf16.msra.mxu1 %v5398_v17  ;;  %5017 = vmatprep.subr.bf16.mxu0 %v5016_v38  ;;  %v5030_v17 = vpack.c.bf16 %v1090_v30, %v1086_v29  ;;  %v396_v38 = vsel %vm381_vm2, %v394_v25, %v7171_v26  ;;  %v5416_v43 = vpack.c.bf16 %v1101_v37, %v1097_v36  ;;  %v1120_v25 = vld [vmem:[#allocation5 + $0x1590] sm:$0xff]  ;;  %v1131_v29 = vld [vmem:[#allocation5 + $0x15e8] sm:$0xff]  ;;  %v1129_v30 = vld [vmem:[#allocation5 + $0x15d8] sm:$0xff] }
 0x1dc   : > { %5401 = vmatprep.subr.bf16.mxu1 %v5400_v42  ;;  %v1098_v42 = vld [vmem:[#allocation5 + $0x14e0] sm:$0xff]  ;;  %v1128_v37 = vld [vmem:[#allocation5 + $0x15d0] sm:$0xff] }
 0x1dd   : > { %v1130_v36 = vld [vmem:[#allocation5 + $0x15e0] sm:$0xff] }
 0x1de   : > { %5019 = vmatpush1.bf16.msra.mxu0 %v5018_v48  ;;  %v1109_v48 = vld [vmem:[#allocation5 + $0x1538] sm:$0xff]  ;;  %v1154_v10 = vld [vmem:[#allocation5 + $0x16a0] sm:$0xff] }
 0x1df   : > { %5403 = vmatpush1.bf16.msra.mxu1 %v5402_v54  ;;  %5021 = vmatprep.subr.bf16.mxu0 %v5020_v55  ;;  %v5034_v54 = vpack.c.bf16 %v1098_v42, %v1094_v41  ;;  %v5420_v63 = vpack.c.bf16 %v1109_v48, %v1105_v47  ;;  %v1141_v41 = vld [vmem:[#allocation5 + $0x1638] sm:$0xff]  ;;  %v5050_v42 = vpack.c.bf16 %v1130_v36, %v1126_v35  ;;  %v1140_v48 = vld [vmem:[#allocation5 + $0x1630] sm:$0xff]  ;;  %v1166_v36 = vld [vmem:[#allocation5 + $0x1700] sm:$0xff] }
 0x1e0   : > { %5405 = vmatprep.subr.bf16.mxu1 %v5404_v62  ;;  %v1104_v62 = vld [vmem:[#allocation5 + $0x1510] sm:$0xff] }
 0x1e1   : > { %1619 = vmatmul.mubr.f32.vlgmr.msra.gmra.mrb[0].mxu0 %v384_v4 }
 0x1e2   : > { %5023 = vmatpush1.bf16.msra.mxu0 %v5022_v5  ;;  %2153 = vmatmul.mubr.f32.vlgmr.msra.gmra.mrb[0].mxu1 %v384_v4  ;;  %v5038_v5 = vpack.c.bf16 %v1106_v60, %v1102_v58  ;;  %v5438_v58 = vpack.c.bf16 %v1140_v48, %v1136_v46  ;;  %v1178_v46 = vld [vmem:[#allocation5 + $0x1760] sm:$0xff] }
 0x1e3   : > { %5407 = vmatpush1.bf16.msra.mxu1 %v5406_v33  ;;  %5025 = vmatprep.subr.bf16.mxu0 %v5024_v6  ;;  %v5422_v33 = vpack.c.bf16 %v1108_v0, %v1104_v62  ;;  %v5040_v6 = vpack.c.bf16 %v1115_v2, %v1111_v1  ;;  %v1142_v62 = vld [vmem:[#allocation5 + $0x1640] sm:$0xff]  ;;  %v1144_v0 = vld [vmem:[#allocation5 + $0x1650] sm:$0xff] }
 0x1e4   : > { %5409 = vmatprep.subr.bf16.mxu1 %v5408_v11  ;;  %4546 = vmatprep.mubr.msk.f32.mxu0 %vm381_vm2, %v7148_v9  ;;  %v1148_v2 = vld [vmem:[#allocation5 + $0x1670] sm:$0xff] }
 0x1e5   : > { %4570 = vmatprep.mubr.msk.f32.mxu1 %vm381_vm2, %v7148_v9  ;;  %4547 = vmatmul.mubr.msk.f32.gmra.mrb[2].mxu0 %vm381_vm2, %v383_v52  ;;  %v1096_v9 = vld [vmem:[#allocation5 + $0x14d0] sm:$0xff] }
 0x1e6   : > { %5027 = vmatpush1.bf16.msra.mxu0 %v5026_v22  ;;  %4571 = vmatmul.mubr.msk.f32.gmra.mrb[2].mxu1 %vm381_vm2, %v383_v52  ;;  %v7185_v52 = vrot.slane %v7135_v50, 1  ;;  %v5418_v55 = vpack.c.bf16 %v1100_v44, %v1096_v9  ;;  %v1113_v50 = vld [vmem:[#allocation5 + $0x1558] sm:$0xff]  ;;  %v1118_v22 = vld [vmem:[#allocation5 + $0x1580] sm:$0xff] }
 0x1e7   : > { %5411 = vmatpush1.bf16.msra.mxu1 %v5410_v27  ;;  %5029 = vmatprep.subr.bf16.mxu0 %v5028_v28  ;;  %v5424_v11 = vpack.c.bf16 %v1117_v3, %v1113_v50  ;;  %v1124_v27 = vld [vmem:[#allocation5 + $0x15b0] sm:$0xff]  ;;  %v1127_v28 = vld [vmem:[#allocation5 + $0x15c8] sm:$0xff]  ;;  %v1134_v44 = vld [vmem:[#allocation5 + $0x1600] sm:$0xff] }
 0x1e8   : > { %5413 = vmatprep.subr.bf16.mxu1 %v5412_v32  ;;  %1630 = vmatprep.mubr.f32.mxu0 %v399_v61  ;;  %v393_v4 = vsel %vm381_vm2, %v391_v51, %v7185_v52  ;;  %v5046_v32 = vpack.c.bf16 %v1122_v23, %v1118_v22  ;;  %v5430_v34 = vpack.c.bf16 %v1124_v27, %v1120_v25  ;;  %v1147_v51 = vld [vmem:[#allocation5 + $0x1668] sm:$0xff]  ;;  %v1158_v23 = vld [vmem:[#allocation5 + $0x16c0] sm:$0xff] }
 0x1e9   : > { %2164 = vmatprep.mubr.f32.mxu1 %v399_v61  ;;  %1631 = vmatmul.mubr.f32.gmra.mrb[4].mxu0 %v396_v38  ;;  %v5048_v57 = vpack.c.bf16 %v1131_v29, %v1127_v28  ;;  %v5432_v61 = vpack.c.bf16 %v1133_v19, %v1129_v30  ;;  %v5056_v60 = vpack.c.bf16 %v1147_v51, %v1143_v49  ;;  %v1151_v50 = vld [vmem:[#allocation5 + $0x1688] sm:$0xff]  ;;  %v1162_v25 = vld [vmem:[#allocation5 + $0x16e0] sm:$0xff]  ;;  %v1164_v28 = vld [vmem:[#allocation5 + $0x16f0] sm:$0xff] }
 0x1ea   : > { %5031 = vmatpush1.bf16.msra.mxu0 %v5030_v17  ;;  %2165 = vmatmul.mubr.f32.gmra.mrb[4].mxu1 %v396_v38  ;;  %v1132_v17 = vld [vmem:[#allocation5 + $0x15f0] sm:$0xff]  ;;  %v1135_v38 = vld [vmem:[#allocation5 + $0x1608] sm:$0xff]  ;;  %v1169_v19 = vld [vmem:[#allocation5 + $0x1718] sm:$0xff] }
 0x1eb   : > { %5415 = vmatpush1.bf16.msra.mxu1 %v5414_v39  ;;  %5033 = vmatprep.subr.bf16.mxu0 %v5032_v40  ;;  %v1139_v39 = vld [vmem:[#allocation5 + $0x1628] sm:$0xff]  ;;  %v1137_v40 = vld [vmem:[#allocation5 + $0x1618] sm:$0xff]  ;;  %v5434_v9 = vpack.c.bf16 %v1132_v17, %v1128_v37  ;;  %v1170_v37 = vld [vmem:[#allocation5 + $0x1720] sm:$0xff] }
 0x1ec   : > { %5417 = vmatprep.subr.bf16.mxu1 %v5416_v43  ;;  %4548 = vmatprep.mubr.msk.f32.mxu0 %vm381_vm2, %v7167_v21  ;;  %v5052_v43 = vpack.c.bf16 %v1139_v39, %v1135_v38  ;;  %v5436_v47 = vpack.c.bf16 %v1141_v41, %v1137_v40  ;;  %v1155_v3 = vld [vmem:[#allocation5 + $0x16a8] sm:$0xff]  ;;  %v1172_v38 = vld [vmem:[#allocation5 + $0x1730] sm:$0xff]  ;;  %v1177_v41 = vld [vmem:[#allocation5 + $0x1758] sm:$0xff] }
 0x1ed   : > { %4572 = vmatprep.mubr.msk.f32.mxu1 %vm381_vm2, %v7167_v21  ;;  %4549 = vmatmul.mubr.msk.f32.gmra.mrb[6].mxu0 %vm381_vm2, %v7171_v26  ;;  %v5044_v21 = vpack.c.bf16 %v1123_v13, %v1119_v16  ;;  %v5060_v7 = vpack.c.bf16 %v1155_v3, %v1151_v50  ;;  %v1156_v16 = vld [vmem:[#allocation5 + $0x16b0] sm:$0xff]  ;;  %v1159_v13 = vld [vmem:[#allocation5 + $0x16c8] sm:$0xff] }
 0x1ee   : > { %5035 = vmatpush1.bf16.msra.mxu0 %v5034_v54  ;;  %4573 = vmatmul.mubr.msk.f32.gmra.mrb[6].mxu1 %vm381_vm2, %v7171_v26  ;;  %v5428_v26 = vpack.c.bf16 %v1125_v14, %v1121_v59  ;;  %v1145_v54 = vld [vmem:[#allocation5 + $0x1658] sm:$0xff]  ;;  %v1163_v59 = vld [vmem:[#allocation5 + $0x16e8] sm:$0xff]  ;;  %v1180_v49 = vld [vmem:[#allocation5 + $0x1770] sm:$0xff] }
 0x1ef   : > { %5419 = vmatpush1.bf16.msra.mxu1 %v5418_v55  ;;  %5037 = vmatprep.subr.bf16.mxu0 %v5036_v56  ;;  %v1149_v55 = vld [vmem:[#allocation5 + $0x1678] sm:$0xff]  ;;  %v5054_v56 = vpack.c.bf16 %v1138_v45, %v1134_v44  ;;  %v5064_v22 = vpack.c.bf16 %v1163_v59, %v1159_v13  ;;  %v1167_v29 = vld [vmem:[#allocation5 + $0x1708] sm:$0xff]  ;;  %v1174_v45 = vld [vmem:[#allocation5 + $0x1740] sm:$0xff] }
 0x1f0   : > { %5421 = vmatprep.subr.bf16.mxu1 %v5420_v63  ;;  %1707 = vmatprep.mubr.f32.mxu0 %v393_v4  ;;  %v1146_v63 = vld [vmem:[#allocation5 + $0x1660] sm:$0xff]  ;;  %v5440_v1 = vpack.c.bf16 %v1149_v55, %v1145_v54  ;;  %v1161_v14 = vld [vmem:[#allocation5 + $0x16d8] sm:$0xff]  ;;  %v1171_v30 = vld [vmem:[#allocation5 + $0x1728] sm:$0xff] }
 0x1f1   : > { %2241 = vmatprep.mubr.f32.mxu1 %v393_v4  ;;  %v1153_v4 = vld [vmem:[#allocation5 + $0x1698] sm:$0xff]  ;;  %v5068_v35 = vpack.c.bf16 %v1171_v30, %v1167_v29  ;;  %v1175_v39 = vld [vmem:[#allocation5 + $0x1748] sm:$0xff]  ;;  %v1188_v50 = vld [vmem:[#allocation5 + $0x17b0] sm:$0xff] }
 0x1f2   : > { %5039 = vmatpush1.bf16.msra.mxu0 %v5038_v5  ;;  %v1157_v5 = vld [vmem:[#allocation5 + $0x16b8] sm:$0xff]  ;;  %v1179_v40 = vld [vmem:[#allocation5 + $0x1768] sm:$0xff]  ;;  %v1196_v13 = vld [vmem:[#allocation5 + $0x17f0] sm:$0xff] }
 0x1f3   : > { %5423 = vmatpush1.bf16.msra.mxu1 %v5422_v33  ;;  %5041 = vmatprep.subr.bf16.mxu0 %v5040_v6  ;;  %v5058_v33 = vpack.c.bf16 %v1146_v63, %v1142_v62  ;;  %v5442_v6 = vpack.c.bf16 %v1148_v2, %v1144_v0  ;;  %v5444_v12 = vpack.c.bf16 %v1157_v5, %v1153_v4  ;;  %v1183_v51 = vld [vmem:[#allocation5 + $0x1788] sm:$0xff]  ;;  %v1185_v55 = vld [vmem:[#allocation5 + $0x1798] sm:$0xff]  ;;  %v1182_v63 = vld [vmem:[#allocation5 + $0x1780] sm:$0xff] }
 0x1f4   : > { %5425 = vmatprep.subr.bf16.mxu1 %v5424_v11  ;;  %v1152_v11 = vld [vmem:[#allocation5 + $0x1690] sm:$0xff]  ;;  %v5072_v44 = vpack.c.bf16 %v1179_v40, %v1175_v39  ;;  %v1187_v54 = vld [vmem:[#allocation5 + $0x17a8] sm:$0xff]  ;;  %v1186_v0 = vld [vmem:[#allocation5 + $0x17a0] sm:$0xff] }
 0x1f5   : > { %v5076_v62 = vpack.c.bf16 %v1187_v54, %v1183_v51  ;;  %v1191_v3 = vld [vmem:[#allocation5 + $0x17c8] sm:$0xff]  ;;  %v1193_v5 = vld [vmem:[#allocation5 + $0x17d8] sm:$0xff]  ;;  %v2448_v29 = vld [vmem:[#allocation7] sm:$0xff] }
 0x1f6   : > { %5043 = vmatpush1.bf16.msra.mxu0 %v5042_v15  ;;  %v1165_v15 = vld [vmem:[#allocation5 + $0x16f8] sm:$0xff]  ;;  %v1195_v4 = vld [vmem:[#allocation5 + $0x17e8] sm:$0xff]  ;;  %v2452_v30 = vld [vmem:[#allocation7 + $0x20] sm:$0xff] }
 0x1f7   : > { %5427 = vmatpush1.bf16.msra.mxu1 %v5426_v18  ;;  %5045 = vmatprep.subr.bf16.mxu0 %v5044_v21  ;;  %v5062_v18 = vpack.c.bf16 %v1154_v10, %v1150_v8  ;;  %v5446_v21 = vpack.c.bf16 %v1156_v16, %v1152_v11  ;;  %v5448_v27 = vpack.c.bf16 %v1165_v15, %v1161_v14  ;;  %v1190_v10 = vld [vmem:[#allocation5 + $0x17c0] sm:$0xff]  ;;  %v2449_v59 = vld [vmem:[#allocation7 + $0x8] sm:$0xff]  ;;  %v2451_v15 = vld [vmem:[#allocation7 + $0x18] sm:$0xff] }
 0x1f8   : > { %5429 = vmatprep.subr.bf16.mxu1 %v5428_v26  ;;  %v1160_v26 = vld [vmem:[#allocation5 + $0x16d0] sm:$0xff]  ;;  %v5080_v8 = vpack.c.bf16 %v1195_v4, %v1191_v3  ;;  %v1194_v11 = vld [vmem:[#allocation5 + $0x17e0] sm:$0xff]  ;;  %v2453_v14 = vld [vmem:[#allocation7 + $0x28] sm:$0xff] }
 0x1f9   : > { %v2471_v51 = vld [vmem:[#allocation7 + $0xb8] sm:$0xff] }
 0x1fa   : > { %5047 = vmatpush1.bf16.msra.mxu0 %v5046_v32  ;;  %v1173_v32 = vld [vmem:[#allocation5 + $0x1738] sm:$0xff] }
 0x1fb   : > { %5431 = vmatpush1.bf16.msra.mxu1 %v5430_v34  ;;  %5049 = vmatprep.subr.bf16.mxu0 %v5048_v57  ;;  %v5066_v34 = vpack.c.bf16 %v1162_v25, %v1158_v23  ;;  %v5450_v57 = vpack.c.bf16 %v1164_v28, %v1160_v26  ;;  %v5452_v17 = vpack.c.bf16 %v1173_v32, %v1169_v19  ;;  %v389_v25 = vrot.slane %v7140_v53, 1  ;;  %v2450_v19 = vld [vmem:[#allocation7 + $0x10] sm:$0xff]  ;;  %v6510_v53 = vld [vmem:[%s7014_s16 + $0x58] sm:$0xff] }
 0x1fc   : > { %5433 = vmatprep.subr.bf16.mxu1 %v5432_v61  ;;  %v1168_v61 = vld [vmem:[#allocation5 + $0x1710] sm:$0xff]  ;;  %v2479_v3 = vld [vmem:[#allocation7 + $0xf8] sm:$0xff] }
 0x1fd   : > { %v2454_v32 = vld [vmem:[#allocation7 + $0x30] sm:$0xff] }
 0x1fe   : > { %5051 = vmatpush1.bf16.msra.mxu0 %v5050_v42  ;;  %v1181_v42 = vld [vmem:[#allocation5 + $0x1778] sm:$0xff]  ;;  %v5854_v39 = vpack.c.bf16 %v2454_v32, %v2450_v19 }
 0x1ff   : > { %5435 = vmatpush1.bf16.msra.mxu1 %v5434_v9  ;;  %5053 = vmatprep.subr.bf16.mxu0 %v5052_v43  ;;  %v5070_v9 = vpack.c.bf16 %v1170_v37, %v1166_v36  ;;  %v5454_v43 = vpack.c.bf16 %v1172_v38, %v1168_v61  ;;  %v5456_v48 = vpack.c.bf16 %v1181_v42, %v1177_v41  ;;  %v2459_v36 = vld [vmem:[#allocation7 + $0x58] sm:$0xff]  ;;  %v403_v61 = vrot.slane %v6510_v53, 1  ;;  %v2456_v41 = vld [vmem:[#allocation7 + $0x40] sm:$0xff]  ;;  %v2494_v53 = vld [vmem:[#allocation7 + $0x170] sm:$0xff] }
 0x200   : > { %5437 = vmatprep.subr.bf16.mxu1 %v5436_v47  ;;  %v1176_v47 = vld [vmem:[#allocation5 + $0x1750] sm:$0xff]  ;;  %v2463_v37 = vld [vmem:[#allocation7 + $0x78] sm:$0xff]  ;;  %v5470_v38 = vpack.c.bf16 %v2452_v30, %v2448_v29  ;;  %v2460_v42 = vld [vmem:[#allocation7 + $0x60] sm:$0xff] }
 0x201   : > { %v2491_v29 = vld [vmem:[#allocation7 + $0x158] sm:$0xff] }
 0x202   : > { %5055 = vmatpush1.bf16.msra.mxu0 %v5054_v56  ;;  %v1189_v56 = vld [vmem:[#allocation5 + $0x17b8] sm:$0xff] }
 0x203   : > { %5439 = vmatpush1.bf16.msra.mxu1 %v5438_v58  ;;  %5057 = vmatprep.subr.bf16.mxu0 %v5056_v60  ;;  %v5074_v58 = vpack.c.bf16 %v1178_v46, %v1174_v45  ;;  %v5458_v60 = vpack.c.bf16 %v1180_v49, %v1176_v47  ;;  %v5460_v2 = vpack.c.bf16 %v1189_v56, %v1185_v55  ;;  %v2465_v45 = vld [vmem:[#allocation7 + $0x88] sm:$0xff]  ;;  %v2467_v49 = vld [vmem:[#allocation7 + $0x98] sm:$0xff] }
 0x204   : > { %5441 = vmatprep.subr.bf16.mxu1 %v5440_v1  ;;  %v1184_v1 = vld [vmem:[#allocation5 + $0x1790] sm:$0xff]  ;;  %v2469_v46 = vld [vmem:[#allocation7 + $0xa8] sm:$0xff]  ;;  %v5474_v55 = vpack.c.bf16 %v2460_v42, %v2456_v41  ;;  %v2495_v30 = vld [vmem:[#allocation7 + $0x178] sm:$0xff] }
 0x206   : > { %5059 = vmatpush1.bf16.msra.mxu0 %v5058_v33  ;;  %v1197_v33 = vld [vmem:[#allocation5 + $0x17f8] sm:$0xff] }
 0x207   : > { %5443 = vmatpush1.bf16.msra.mxu1 %v5442_v6  ;;  %5061 = vmatprep.subr.bf16.mxu0 %v5060_v7  ;;  %v5078_v6 = vpack.c.bf16 %v1186_v0, %v1182_v63  ;;  %v5462_v7 = vpack.c.bf16 %v1188_v50, %v1184_v1  ;;  %v5464_v16 = vpack.c.bf16 %v1197_v33, %v1193_v5  ;;  %v2466_v63 = vld [vmem:[#allocation7 + $0x90] sm:$0xff]  ;;  %v2473_v1 = vld [vmem:[#allocation7 + $0xc8] sm:$0xff]  ;;  %v2475_v50 = vld [vmem:[#allocation7 + $0xd8] sm:$0xff] }
 0x208   : > { %5445 = vmatprep.subr.bf16.mxu1 %v5444_v12  ;;  %v1192_v12 = vld [vmem:[#allocation5 + $0x17d0] sm:$0xff] }
 0x209   : > { %v5466_v26 = vpack.c.bf16 %v1196_v13, %v1192_v12  ;;  %v2470_v0 = vld [vmem:[#allocation7 + $0xb0] sm:$0xff]  ;;  %v2481_v12 = vld [vmem:[#allocation7 + $0x108] sm:$0xff]  ;;  %v2483_v13 = vld [vmem:[#allocation7 + $0x118] sm:$0xff] }
 0x20a   : > { %5063 = vmatpush1.bf16.msra.mxu0 %v5062_v18  ;;  %v2455_v18 = vld [vmem:[#allocation7 + $0x38] sm:$0xff]  ;;  %v5862_v5 = vpack.c.bf16 %v2470_v0, %v2466_v63  ;;  %v2510_v63 = vld [vmem:[#allocation7 + $0x1f0] sm:$0xff]  ;;  %v2517_v0 = vld [vmem:[#allocation7 + $0x228] sm:$0xff] }
 0x20b   : > { %5447 = vmatpush1.bf16.msra.mxu1 %v5446_v21  ;;  %5065 = vmatprep.subr.bf16.mxu0 %v5064_v22  ;;  %v5082_v21 = vpack.c.bf16 %v1194_v11, %v1190_v10  ;;  %v6509_v22 = vld [vmem:[%s7014_s16 + $0x10] sm:$0xff]  ;;  %v5852_v28 = vpack.c.bf16 %v2455_v18, %v2451_v15  ;;  %v5864_v10 = vpack.c.bf16 %v2479_v3, %v2475_v50 }
 0x20c   : > { %5449 = vmatprep.subr.bf16.mxu1 %v5448_v27  ;;  %v388_v23 = vrot.slane %v6509_v22, 1  ;;  %v5468_v27 = vpack.c.bf16 %v2453_v14, %v2449_v59  ;;  %v2478_v11 = vld [vmem:[#allocation7 + $0xf0] sm:$0xff]  ;;  %v2487_v59 = vld [vmem:[#allocation7 + $0x138] sm:$0xff]  ;;  %v2484_v22 = vld [vmem:[#allocation7 + $0x120] sm:$0xff] }
 0x20e   : > { %5067 = vmatpush1.bf16.msra.mxu0 %v5066_v34  ;;  %v2457_v34 = vld [vmem:[#allocation7 + $0x48] sm:$0xff] }
 0x20f   : > { %5451 = vmatpush1.bf16.msra.mxu1 %v5450_v57  ;;  %5069 = vmatprep.subr.bf16.mxu0 %v5068_v35  ;;  %v2461_v57 = vld [vmem:[#allocation7 + $0x68] sm:$0xff]  ;;  %v390_v35 = vsel %vm381_vm2, %v388_v23, %v389_v25  ;;  %v2482_v23 = vld [vmem:[#allocation7 + $0x110] sm:$0xff] }
 0x210   : > { %5453 = vmatprep.subr.bf16.mxu1 %v5452_v17  ;;  %v7202_v17 = vrot.slane %v7151_v31, 1  ;;  %v5472_v40 = vpack.c.bf16 %v2461_v57, %v2457_v34  ;;  %v6511_v31 = vld [vmem:[%s7014_s16 + $0x50] sm:$0xff]  ;;  %v2488_v57 = vld [vmem:[#allocation7 + $0x140] sm:$0xff] }
 0x211   : > { %v400_v47 = vrot.slane %v6511_v31, 1  ;;  %v2505_v31 = vld [vmem:[#allocation7 + $0x1c8] sm:$0xff] }
 0x212   : > { %5071 = vmatpush1.bf16.msra.mxu0 %v5070_v9  ;;  %v2458_v9 = vld [vmem:[#allocation7 + $0x50] sm:$0xff]  ;;  %v405_v54 = vsel %vm381_vm2, %v403_v61, %v7202_v17  ;;  %v2497_v61 = vld [vmem:[#allocation7 + $0x188] sm:$0xff] }
 0x213   : > { %5455 = vmatpush1.bf16.msra.mxu1 %v5454_v43  ;;  %5073 = vmatprep.subr.bf16.mxu0 %v5072_v44  ;;  %v5856_v43 = vpack.c.bf16 %v2463_v37, %v2459_v36  ;;  %v2462_v44 = vld [vmem:[#allocation7 + $0x70] sm:$0xff]  ;;  %v5872_v37 = vpack.c.bf16 %v2495_v30, %v2491_v29 }
 0x214   : > { %5457 = vmatprep.subr.bf16.mxu1 %v5456_v48  ;;  %v401_v48 = vrot.slane %v7156_v24, 1  ;;  %v5858_v56 = vpack.c.bf16 %v2462_v44, %v2458_v9  ;;  %v5860_v24 = vpack.c.bf16 %v2471_v51, %v2467_v49  ;;  %v2490_v36 = vld [vmem:[#allocation7 + $0x150] sm:$0xff]  ;;  %v2496_v9 = vld [vmem:[#allocation7 + $0x180] sm:$0xff]  ;;  %v2511_v49 = vld [vmem:[#allocation7 + $0x1f8] sm:$0xff] }
 0x215   : > { %v5874_v41 = vpack.c.bf16 %v2494_v53, %v2490_v36  ;;  %v2498_v44 = vld [vmem:[#allocation7 + $0x190] sm:$0xff]  ;;  %v2537_v36 = vld [vmem:[#allocation7 + $0x2c8] sm:$0xff]  ;;  %v2539_v53 = vld [vmem:[#allocation7 + $0x2d8] sm:$0xff] }
 0x216   : > { %5075 = vmatpush1.bf16.msra.mxu0 %v5074_v58  ;;  %v5476_v58 = vpack.c.bf16 %v2469_v46, %v2465_v45  ;;  %v2502_v46 = vld [vmem:[#allocation7 + $0x1b0] sm:$0xff] }
 0x217   : > { %5459 = vmatpush1.bf16.msra.mxu1 %v5458_v60  ;;  %5077 = vmatprep.subr.bf16.mxu0 %v5076_v62  ;;  %v2464_v60 = vld [vmem:[#allocation7 + $0x80] sm:$0xff] }
 0x218   : > { %5461 = vmatprep.subr.bf16.mxu1 %v5460_v2  ;;  %v2468_v62 = vld [vmem:[#allocation7 + $0xa0] sm:$0xff]  ;;  %v2477_v2 = vld [vmem:[#allocation7 + $0xe8] sm:$0xff] }
 0x219   : > { %v5478_v4 = vpack.c.bf16 %v2468_v62, %v2464_v60  ;;  %v5480_v33 = vpack.c.bf16 %v2477_v2, %v2473_v1  ;;  %v2506_v60 = vld [vmem:[#allocation7 + $0x1d0] sm:$0xff]  ;;  %v2515_v1 = vld [vmem:[#allocation7 + $0x218] sm:$0xff] }
 0x21a   : > { %5079 = vmatpush1.bf16.msra.mxu0 %v5078_v6  ;;  %v2472_v6 = vld [vmem:[#allocation7 + $0xc0] sm:$0xff]  ;;  %v2519_v2 = vld [vmem:[#allocation7 + $0x238] sm:$0xff]  ;;  %v5882_v50 = vpack.c.bf16 %v2510_v63, %v2506_v60  ;;  %v2553_v60 = vld [vmem:[#allocation7 + $0x348] sm:$0xff] }
 0x21b   : > { %5463 = vmatpush1.bf16.msra.mxu1 %v5462_v7  ;;  %5081 = vmatprep.subr.bf16.mxu0 %v5080_v8  ;;  %v2476_v7 = vld [vmem:[#allocation7 + $0xe0] sm:$0xff]  ;;  %v2474_v8 = vld [vmem:[#allocation7 + $0xd0] sm:$0xff]  ;;  %v2555_v63 = vld [vmem:[#allocation7 + $0x358] sm:$0xff] }
 0x21c   : > { %5465 = vmatprep.subr.bf16.mxu1 %v5464_v16  ;;  %v2485_v16 = vld [vmem:[#allocation7 + $0x128] sm:$0xff]  ;;  %v5482_v14 = vpack.c.bf16 %v2476_v7, %v2472_v6  ;;  %v5866_v15 = vpack.c.bf16 %v2478_v11, %v2474_v8  ;;  %v5884_v6 = vpack.c.bf16 %v2519_v2, %v2515_v1  ;;  %v2518_v7 = vld [vmem:[#allocation7 + $0x230] sm:$0xff]  ;;  %v2523_v11 = vld [vmem:[#allocation7 + $0x258] sm:$0xff] }
 0x21d   : > { %v5484_v18 = vpack.c.bf16 %v2485_v16, %v2481_v12  ;;  %v2521_v8 = vld [vmem:[#allocation7 + $0x248] sm:$0xff]  ;;  %v2527_v12 = vld [vmem:[#allocation7 + $0x278] sm:$0xff] }
 0x21e   : > { %5083 = vmatpush1.bf16.msra.mxu0 %v5082_v21  ;;  %v2480_v21 = vld [vmem:[#allocation7 + $0x100] sm:$0xff] }
 0x21f   : > { %5467 = vmatpush1.bf16.msra.mxu1 %v5466_v26  ;;  %5469 = vmatprep.subr.bf16.mxu0 %v5468_v27  ;;  %v2486_v26 = vld [vmem:[#allocation7 + $0x130] sm:$0xff]  ;;  %v2489_v27 = vld [vmem:[#allocation7 + $0x148] sm:$0xff]  ;;  %v5486_v19 = vpack.c.bf16 %v2484_v22, %v2480_v21  ;;  %v5888_v21 = vpack.c.bf16 %v2527_v12, %v2523_v11 }
 0x220   : > { %5853 = vmatprep.subr.bf16.mxu1 %v5852_v28  ;;  %v2493_v28 = vld [vmem:[#allocation7 + $0x168] sm:$0xff]  ;;  %v5870_v32 = vpack.c.bf16 %v2486_v26, %v2482_v23  ;;  %v2526_v22 = vld [vmem:[#allocation7 + $0x270] sm:$0xff]  ;;  %v2531_v26 = vld [vmem:[#allocation7 + $0x298] sm:$0xff] }
 0x221   : > { %1708 = vmatmul.mubr.f32.vlgmr.msra.gmra.mrb[0].mxu0 %v390_v35  ;;  %v5488_v34 = vpack.c.bf16 %v2493_v28, %v2489_v27  ;;  %v2529_v23 = vld [vmem:[#allocation7 + $0x288] sm:$0xff]  ;;  %v2535_v27 = vld [vmem:[#allocation7 + $0x2b8] sm:$0xff] }
 0x222   : > { %2242 = vmatmul.mubr.f32.vlgmr.msra.gmra.mrb[0].mxu1 %v390_v35  ;;  %4550 = vmatprep.mubr.msk.f32.mxu0 %vm381_vm2, %v7185_v52  ;;  %v2492_v35 = vld [vmem:[#allocation7 + $0x160] sm:$0xff] }
 0x223   : > { %4574 = vmatprep.mubr.msk.f32.mxu1 %vm381_vm2, %v7185_v52  ;;  %5471 = vmatpush1.bf16.msra.mxu0 %v5470_v38  ;;  %v402_v52 = vsel %vm381_vm2, %v400_v47, %v401_v48  ;;  %v2499_v38 = vld [vmem:[#allocation7 + $0x198] sm:$0xff]  ;;  %v2509_v47 = vld [vmem:[#allocation7 + $0x1e8] sm:$0xff] }
 0x224   : > { %5855 = vmatpush1.bf16.msra.mxu1 %v5854_v39  ;;  %5473 = vmatprep.subr.bf16.mxu0 %v5472_v40  ;;  %v2503_v39 = vld [vmem:[#allocation7 + $0x1b8] sm:$0xff]  ;;  %v5490_v40 = vpack.c.bf16 %v2492_v35, %v2488_v57  ;;  %v5892_v57 = vpack.c.bf16 %v2535_v27, %v2531_v26  ;;  %v2534_v35 = vld [vmem:[#allocation7 + $0x2b0] sm:$0xff] }
 0x225   : > { %4551 = vmatmul.mubr.msk.f32.gmra.mrb[2].mxu0 %vm381_vm2, %v389_v25  ;;  %5857 = vmatprep.subr.bf16.mxu1 %v5856_v43  ;;  %v2500_v43 = vld [vmem:[#allocation7 + $0x1a0] sm:$0xff]  ;;  %v5876_v45 = vpack.c.bf16 %v2503_v39, %v2499_v38  ;;  %v2575_v27 = vld [vmem:[#allocation7 + $0x3f8] sm:$0xff] }
 0x226   : > { %4575 = vmatmul.mubr.msk.f32.gmra.mrb[2].mxu1 %vm381_vm2, %v389_v25  ;;  %1719 = vmatprep.mubr.f32.mxu0 %v405_v54  ;;  %v5868_v25 = vpack.c.bf16 %v2487_v59, %v2483_v13  ;;  %v5494_v51 = vpack.c.bf16 %v2500_v43, %v2496_v9  ;;  %v2542_v43 = vld [vmem:[#allocation7 + $0x2f0] sm:$0xff] }
 0x227   : > { %2253 = vmatprep.mubr.f32.mxu1 %v405_v54  ;;  %5475 = vmatpush1.bf16.msra.mxu0 %v5474_v55  ;;  %v5878_v54 = vpack.c.bf16 %v2502_v46, %v2498_v44  ;;  %v5496_v55 = vpack.c.bf16 %v2509_v47, %v2505_v31  ;;  %v2545_v44 = vld [vmem:[#allocation7 + $0x308] sm:$0xff]  ;;  %v2547_v46 = vld [vmem:[#allocation7 + $0x318] sm:$0xff] }
 0x228   : > { %5859 = vmatpush1.bf16.msra.mxu1 %v5858_v56  ;;  %5477 = vmatprep.subr.bf16.mxu0 %v5476_v58  ;;  %v2504_v56 = vld [vmem:[#allocation7 + $0x1c0] sm:$0xff]  ;;  %v2551_v31 = vld [vmem:[#allocation7 + $0x338] sm:$0xff] }
 0x229   : > { %1720 = vmatmul.mubr.f32.gmra.mrb[4].mxu0 %v402_v52  ;;  %5861 = vmatprep.subr.bf16.mxu1 %v5860_v24  ;;  %v2508_v58 = vld [vmem:[#allocation7 + $0x1e0] sm:$0xff]  ;;  %v2513_v24 = vld [vmem:[#allocation7 + $0x208] sm:$0xff] }
 0x22a   : > { %2254 = vmatmul.mubr.f32.gmra.mrb[4].mxu1 %v402_v52  ;;  %4552 = vmatprep.mubr.msk.f32.mxu0 %vm381_vm2, %v7202_v17  ;;  %v5498_v52 = vpack.c.bf16 %v2508_v58, %v2504_v56  ;;  %v5500_v3 = vpack.c.bf16 %v2517_v0, %v2513_v24  ;;  %v5900_v56 = vpack.c.bf16 %v2551_v31, %v2547_v46  ;;  %v2550_v58 = vld [vmem:[#allocation7 + $0x330] sm:$0xff]  ;;  %v2559_v24 = vld [vmem:[#allocation7 + $0x378] sm:$0xff]  ;;  %v2576_v31 = vld [vmem:[#allocation7 + $0x400] sm:$0xff] }
 0x22b   : > { %4576 = vmatprep.mubr.msk.f32.mxu1 %vm381_vm2, %v7202_v17  ;;  %5479 = vmatpush1.bf16.msra.mxu0 %v5478_v4  ;;  %v2501_v17 = vld [vmem:[#allocation7 + $0x1a8] sm:$0xff]  ;;  %v2512_v4 = vld [vmem:[#allocation7 + $0x200] sm:$0xff] }
 0x22c   : > { %5863 = vmatpush1.bf16.msra.mxu1 %v5862_v5  ;;  %5481 = vmatprep.subr.bf16.mxu0 %v5480_v33  ;;  %v5492_v42 = vpack.c.bf16 %v2501_v17, %v2497_v61  ;;  %v2516_v5 = vld [vmem:[#allocation7 + $0x220] sm:$0xff]  ;;  %v2514_v33 = vld [vmem:[#allocation7 + $0x210] sm:$0xff]  ;;  %v2543_v61 = vld [vmem:[#allocation7 + $0x2f8] sm:$0xff] }
 0x22d   : > { %4553 = vmatmul.mubr.msk.f32.gmra.mrb[6].mxu0 %vm381_vm2, %v401_v48  ;;  %5865 = vmatprep.subr.bf16.mxu1 %v5864_v10  ;;  %v2525_v10 = vld [vmem:[#allocation7 + $0x268] sm:$0xff]  ;;  %v5502_v16 = vpack.c.bf16 %v2516_v5, %v2512_v4  ;;  %v5886_v13 = vpack.c.bf16 %v2518_v7, %v2514_v33  ;;  %v5896_v9 = vpack.c.bf16 %v2543_v61, %v2539_v53  ;;  %v2558_v5 = vld [vmem:[#allocation7 + $0x370] sm:$0xff]  ;;  %v2563_v7 = vld [vmem:[#allocation7 + $0x398] sm:$0xff] }
 0x22e   : > { %4577 = vmatmul.mubr.msk.f32.gmra.mrb[6].mxu1 %vm381_vm2, %v401_v48  ;;  %v2507_v48 = vld [vmem:[#allocation7 + $0x1d8] sm:$0xff]  ;;  %v5504_v59 = vpack.c.bf16 %v2525_v10, %v2521_v8  ;;  %v5904_v4 = vpack.c.bf16 %v2559_v24, %v2555_v63  ;;  %v2561_v33 = vld [vmem:[#allocation7 + $0x388] sm:$0xff] }
 0x22f   : > { %5483 = vmatpush1.bf16.msra.mxu0 %v5482_v14  ;;  %v5880_v62 = vpack.c.bf16 %v2511_v49, %v2507_v48  ;;  %v2520_v14 = vld [vmem:[#allocation7 + $0x240] sm:$0xff]  ;;  %v2567_v8 = vld [vmem:[#allocation7 + $0x3b8] sm:$0xff] }
 0x230   : > { %5867 = vmatpush1.bf16.msra.mxu1 %v5866_v15  ;;  %5485 = vmatprep.subr.bf16.mxu0 %v5484_v18  ;;  %v2524_v15 = vld [vmem:[#allocation7 + $0x260] sm:$0xff]  ;;  %v2522_v18 = vld [vmem:[#allocation7 + $0x250] sm:$0xff]  ;;  %v2583_v61 = vld [vmem:[#allocation7 + $0x438] sm:$0xff] }
 0x231   : > { %5869 = vmatprep.subr.bf16.mxu1 %v5868_v25  ;;  %v2533_v25 = vld [vmem:[#allocation7 + $0x2a8] sm:$0xff]  ;;  %v5506_v28 = vpack.c.bf16 %v2524_v15, %v2520_v14  ;;  %v5890_v29 = vpack.c.bf16 %v2526_v22, %v2522_v18  ;;  %v2562_v14 = vld [vmem:[#allocation7 + $0x390] sm:$0xff]  ;;  %v2587_v63 = vld [vmem:[#allocation7 + $0x458] sm:$0xff] }
 0x232   : > { %v5508_v30 = vpack.c.bf16 %v2533_v25, %v2529_v23  ;;  %v2566_v15 = vld [vmem:[#allocation7 + $0x3b0] sm:$0xff]  ;;  %v2569_v22 = vld [vmem:[#allocation7 + $0x3c8] sm:$0xff]  ;;  %v2571_v25 = vld [vmem:[#allocation7 + $0x3d8] sm:$0xff] }
 0x233   : > { %5487 = vmatpush1.bf16.msra.mxu0 %v5486_v19  ;;  %v2528_v19 = vld [vmem:[#allocation7 + $0x280] sm:$0xff]  ;;  %v2573_v23 = vld [vmem:[#allocation7 + $0x3e8] sm:$0xff]  ;;  %v2591_v24 = vld [vmem:[#allocation7 + $0x478] sm:$0xff] }
 0x234   : > { %5871 = vmatpush1.bf16.msra.mxu1 %v5870_v32  ;;  %5489 = vmatprep.subr.bf16.mxu0 %v5488_v34  ;;  %v2532_v32 = vld [vmem:[#allocation7 + $0x2a0] sm:$0xff]  ;;  %v2530_v34 = vld [vmem:[#allocation7 + $0x290] sm:$0xff]  ;;  %v5528_v26 = vpack.c.bf16 %v2573_v23, %v2569_v22 }
 0x235   : > { %5873 = vmatprep.subr.bf16.mxu1 %v5872_v37  ;;  %v2541_v37 = vld [vmem:[#allocation7 + $0x2e8] sm:$0xff]  ;;  %v5510_v17 = vpack.c.bf16 %v2532_v32, %v2528_v19  ;;  %v5894_v38 = vpack.c.bf16 %v2534_v35, %v2530_v34  ;;  %v2570_v32 = vld [vmem:[#allocation7 + $0x3d0] sm:$0xff] }
 0x236   : > { %v5512_v39 = vpack.c.bf16 %v2541_v37, %v2537_v36  ;;  %v2574_v34 = vld [vmem:[#allocation7 + $0x3f0] sm:$0xff]  ;;  %v2577_v35 = vld [vmem:[#allocation7 + $0x408] sm:$0xff]  ;;  %v2579_v37 = vld [vmem:[#allocation7 + $0x418] sm:$0xff] }
 0x237   : > { %5491 = vmatpush1.bf16.msra.mxu0 %v5490_v40  ;;  %v2536_v40 = vld [vmem:[#allocation7 + $0x2c0] sm:$0xff]  ;;  %v2581_v36 = vld [vmem:[#allocation7 + $0x428] sm:$0xff] }
 0x238   : > { %5875 = vmatpush1.bf16.msra.mxu1 %v5874_v41  ;;  %5493 = vmatprep.subr.bf16.mxu0 %v5492_v42  ;;  %v2540_v41 = vld [vmem:[#allocation7 + $0x2e0] sm:$0xff]  ;;  %v2538_v42 = vld [vmem:[#allocation7 + $0x2d0] sm:$0xff]  ;;  %v5532_v53 = vpack.c.bf16 %v2581_v36, %v2577_v35  ;;  %v7331_v36 = vld [vmem:[#allocation7 + $0x4c8] sm:$0xff] }
 0x239   : > { %5877 = vmatprep.subr.bf16.mxu1 %v5876_v45  ;;  %v2549_v45 = vld [vmem:[#allocation7 + $0x328] sm:$0xff]  ;;  %v5514_v47 = vpack.c.bf16 %v2540_v41, %v2536_v40  ;;  %v5898_v48 = vpack.c.bf16 %v2542_v43, %v2538_v42  ;;  %v7224_v41 = vld [vmem:[#allocation8] sm:$0xf] }
 0x23a   : > { %v5516_v49 = vpack.c.bf16 %v2549_v45, %v2545_v44 }
 0x23b   : > { %5495 = vmatpush1.bf16.msra.mxu0 %v5494_v51  ;;  %v2544_v51 = vld [vmem:[#allocation7 + $0x300] sm:$0xff] }
 0x23c   : > { %5879 = vmatpush1.bf16.msra.mxu1 %v5878_v54  ;;  %5497 = vmatprep.subr.bf16.mxu0 %v5496_v55  ;;  %v2548_v54 = vld [vmem:[#allocation7 + $0x320] sm:$0xff]  ;;  %v2546_v55 = vld [vmem:[#allocation7 + $0x310] sm:$0xff] }
 0x23d   : > { %5881 = vmatprep.subr.bf16.mxu1 %v5880_v62  ;;  %v2557_v62 = vld [vmem:[#allocation7 + $0x368] sm:$0xff]  ;;  %v5518_v0 = vpack.c.bf16 %v2548_v54, %v2544_v51  ;;  %v5902_v1 = vpack.c.bf16 %v2550_v58, %v2546_v55  ;;  %v2578_v51 = vld [vmem:[#allocation7 + $0x410] sm:$0xff] }
 0x23e   : > { %v5520_v2 = vpack.c.bf16 %v2557_v62, %v2553_v60  ;;  %v2582_v54 = vld [vmem:[#allocation7 + $0x430] sm:$0xff]  ;;  %v2585_v55 = vld [vmem:[#allocation7 + $0x448] sm:$0xff] }
 0x23f   : > { %5499 = vmatpush1.bf16.msra.mxu0 %v5498_v52  ;;  %v2552_v52 = vld [vmem:[#allocation7 + $0x340] sm:$0xff]  ;;  %v2589_v62 = vld [vmem:[#allocation7 + $0x468] sm:$0xff] }
 0x240   : > { %5883 = vmatpush1.bf16.msra.mxu1 %v5882_v50  ;;  %5501 = vmatprep.subr.bf16.mxu0 %v5500_v3  ;;  %v2556_v50 = vld [vmem:[#allocation7 + $0x360] sm:$0xff]  ;;  %v2554_v3 = vld [vmem:[#allocation7 + $0x350] sm:$0xff] }
 0x241   : > { %5885 = vmatprep.subr.bf16.mxu1 %v5884_v6  ;;  %v2565_v6 = vld [vmem:[#allocation7 + $0x3a8] sm:$0xff]  ;;  %v5522_v10 = vpack.c.bf16 %v2556_v50, %v2552_v52  ;;  %v5906_v11 = vpack.c.bf16 %v2558_v5, %v2554_v3  ;;  %v5918_v50 = vpack.c.bf16 %v2582_v54, %v2578_v51  ;;  %v2584_v3 = vld [vmem:[#allocation7 + $0x440] sm:$0xff] }
 0x242   : > { %v5524_v12 = vpack.c.bf16 %v2565_v6, %v2561_v33 }
 0x243   : > { %5503 = vmatpush1.bf16.msra.mxu0 %v5502_v16  ;;  %v2560_v16 = vld [vmem:[#allocation7 + $0x380] sm:$0xff] }
 0x244   : > { %5887 = vmatpush1.bf16.msra.mxu1 %v5886_v13  ;;  %5505 = vmatprep.subr.bf16.mxu0 %v5504_v59  ;;  %v2564_v13 = vld [vmem:[#allocation7 + $0x3a0] sm:$0xff]  ;;  %v5908_v59 = vpack.c.bf16 %v2567_v8, %v2563_v7  ;;  %v5536_v7 = vpack.c.bf16 %v2589_v62, %v2585_v55  ;;  %v5920_v8 = vpack.c.bf16 %v2591_v24, %v2587_v63  ;;  %v7348_v55 = vld [vmem:[#allocation7 + $0x4f0] sm:$0xff]  ;;  %v7350_v62 = vld [vmem:[#allocation7 + $0x508] sm:$0xff] }
 0x245   : > { %5889 = vmatprep.subr.bf16.mxu1 %v5888_v21  ;;  %v5526_v18 = vpack.c.bf16 %v2564_v13, %v2560_v16  ;;  %v5910_v21 = vpack.c.bf16 %v2566_v15, %v2562_v14  ;;  %v2597_v13 = vld [vmem:[#allocation7 + $0x4a8] sm:$0xff]  ;;  %v2599_v14 = vld [vmem:[#allocation7 + $0x4b8] sm:$0xff] }
 0x246   : > { %v7352_v63 = vld [vmem:[#allocation7 + $0x528] sm:$0xff] }
 0x247   : > { %5507 = vmatpush1.bf16.msra.mxu0 %v5506_v28  ;;  %v2568_v28 = vld [vmem:[#allocation7 + $0x3c0] sm:$0xff] }
 0x248   : > { %5891 = vmatpush1.bf16.msra.mxu1 %v5890_v29  ;;  %5509 = vmatprep.subr.bf16.mxu0 %v5508_v30  ;;  %v2572_v29 = vld [vmem:[#allocation7 + $0x3e0] sm:$0xff]  ;;  %v5912_v30 = vpack.c.bf16 %v2575_v27, %v2571_v25 }
 0x249   : > { %5893 = vmatprep.subr.bf16.mxu1 %v5892_v57  ;;  %v5530_v19 = vpack.c.bf16 %v2572_v29, %v2568_v28  ;;  %v5914_v57 = vpack.c.bf16 %v2574_v34, %v2570_v32  ;;  %v2592_v25 = vld [vmem:[#allocation7 + $0x480] sm:$0xff]  ;;  %v7321_v34 = vld [vmem:[#allocation7 + $0x490] sm:$0xff] }
 0x24b   : > { %5511 = vmatpush1.bf16.msra.mxu0 %v5510_v17  ;;  %v5916_v17 = vpack.c.bf16 %v2583_v61, %v2579_v37  ;;  %v7333_v37 = vld [vmem:[#allocation7 + $0x4e8] sm:$0xff]  ;;  %v7337_v61 = vld [vmem:[#allocation7 + $0x4f8] sm:$0xff] }
 0x24c   : > { %5895 = vmatpush1.bf16.msra.mxu1 %v5894_v38  ;;  %5513 = vmatprep.subr.bf16.mxu0 %v5512_v39  ;;  %v2268_v38 = vlaneseq }
 0x24d   : > { %5897 = vmatprep.subr.bf16.mxu1 %v5896_v9 }
 0x24e   : > { %v7221_v39 = vshrl.u32 %v2268_v38, 7  ;;  %v7341_v38 = vld [vmem:[#allocation7 + $0x4e0] sm:$0xff] }
 0x24f   : > { %5515 = vmatpush1.bf16.msra.mxu0 %v5514_v47  ;;  %v2580_v47 = vld [vmem:[#allocation7 + $0x420] sm:$0xff] }
 0x250   : > { %5899 = vmatpush1.bf16.msra.mxu1 %v5898_v48  ;;  %5517 = vmatprep.subr.bf16.mxu0 %v5516_v49  ;;  %8003 = vst [vmem:[#allocation16_spill] sm:$0xff] %v7221_v39  ;;  %v7973_v40 = vsub.s32 0, %v7221_v39  ;;  %v7966_v42 = vsub.s32 2, %v7221_v39  ;;  %v7967_v9 = vsub.s32 1, %v7221_v39  ;;  %v5534_v52 = vpack.c.bf16 %v2580_v47, %v2576_v31  ;;  %v7343_v31 = vld [vmem:[#allocation7 + $0x4d0] sm:$0xff] }
 0x251   : > { %5901 = vmatprep.subr.bf16.mxu1 %v5900_v56  ;;  %v7971_v56 = vmov 0.0   ;;  %v7965_v15 = vsub.s32 3, %v7221_v39 }
 0x252   : > { %v7231_v43 = vrot.slane %v7224_v41, %v7973_v40  ;;  %v7236_v44 = vrot.slane %v7224_v41, %v7966_v42  ;;  %v7241_v45 = vrot.slane %v7224_v41, %v7967_v9  ;;  %v2636_v40 = vld [vmem:[#allocation7 + $0x5e0] sm:$0xff] }
 0x253   : > { %5519 = vmatpush1.bf16.msra.mxu0 %v5518_v0  ;;  %v7357_v24 = vrot.slane %v7224_v41, %v7965_v15  ;;  %v7373_v41 = vld [vmem:[#allocation7 + $0x518] sm:$0xff]  ;;  %v7460_v15 = vld [vmem:[#allocation7 + $0x580] sm:$0xff] }
 0x254   : > { %5903 = vmatpush1.bf16.msra.mxu1 %v5902_v1  ;;  %5521 = vmatprep.subr.bf16.mxu0 %v5520_v2 }
 0x255   : > { %5905 = vmatprep.subr.bf16.mxu1 %v5904_v4  ;;  %v2588_v4 = vld [vmem:[#allocation7 + $0x460] sm:$0xff] }
 0x256   : > { %v5538_v22 = vpack.c.bf16 %v2588_v4, %v2584_v3 }
 0x257   : > { %5523 = vmatpush1.bf16.msra.mxu0 %v5522_v10  ;;  %v2586_v10 = vld [vmem:[#allocation7 + $0x450] sm:$0xff] }
 0x258   : > { %5907 = vmatpush1.bf16.msra.mxu1 %v5906_v11  ;;  %5525 = vmatprep.subr.bf16.mxu0 %v5524_v12  ;;  %v2590_v11 = vld [vmem:[#allocation7 + $0x470] sm:$0xff]  ;;  %v2593_v12 = vld [vmem:[#allocation7 + $0x488] sm:$0xff] }
 0x259   : > { %5909 = vmatprep.subr.bf16.mxu1 %v5908_v59  ;;  %v2595_v59 = vld [vmem:[#allocation7 + $0x498] sm:$0xff]  ;;  %v5922_v23 = vpack.c.bf16 %v2590_v11, %v2586_v10  ;;  %v7379_v10 = vld [vmem:[#allocation7 + $0x520] sm:$0xff] }
 0x25a   : > { %v5924_v32 = vpack.c.bf16 %v2599_v14, %v2595_v59  ;;  %v7390_v59 = vld [vmem:[#allocation7 + $0x530] sm:$0xff]  ;;  %v7392_v14 = vld [vmem:[#allocation7 + $0x548] sm:$0xff] }
 0x25b   : > { %5527 = vmatpush1.bf16.msra.mxu0 %v5526_v18 }
 0x25c   : > { %5911 = vmatpush1.bf16.msra.mxu1 %v5910_v21  ;;  %5529 = vmatprep.subr.bf16.mxu0 %v5528_v26  ;;  %v2596_v26 = vld [vmem:[#allocation7 + $0x4a0] sm:$0xff] }
 0x25d   : > { %5913 = vmatprep.subr.bf16.mxu1 %v5912_v30  ;;  %v5542_v54 = vpack.c.bf16 %v2596_v26, %v2592_v25  ;;  %v5930_v26 = vpack.c.bf16 %v7348_v55, %v7343_v31  ;;  %v7442_v31 = vld [vmem:[#allocation7 + $0x588] sm:$0xff] }
 0x25f   : > { %5531 = vmatpush1.bf16.msra.mxu0 %v5530_v19  ;;  %v5540_v19 = vpack.c.bf16 %v2597_v13, %v2593_v12  ;;  %v7388_v13 = vld [vmem:[#allocation7 + $0x510] sm:$0xff] }
 0x260   : > { %5915 = vmatpush1.bf16.msra.mxu1 %v5914_v57  ;;  %5533 = vmatprep.subr.bf16.mxu0 %v5532_v53  ;;  %v7323_v57 = vld [vmem:[#allocation7 + $0x4b0] sm:$0xff]  ;;  %v7335_v53 = vld [vmem:[#allocation7 + $0x4d8] sm:$0xff] }
 0x261   : > { %5917 = vmatprep.subr.bf16.mxu1 %v5916_v17  ;;  %v7339_v17 = vld [vmem:[#allocation7 + $0x4c0] sm:$0xff]  ;;  %v5926_v12 = vpack.c.bf16 %v7323_v57, %v7321_v34 }
 0x262   : > { %v5546_v25 = vpack.c.bf16 %v7341_v38, %v7339_v17  ;;  %v5548_v17 = vpack.c.bf16 %v7352_v63, %v7350_v62  ;;  %v7440_v38 = vld [vmem:[#allocation7 + $0x570] sm:$0xff]  ;;  %v5934_v62 = vpack.c.bf16 %v7390_v59, %v7388_v13  ;;  %v7456_v63 = vld [vmem:[#allocation7 + $0x598] sm:$0xff]  ;;  %v7473_v13 = vld [vmem:[#allocation7 + $0x5e8] sm:$0xff] }
 0x2f4   : > { %v7243_v46 = vpop.f32.mrb[0].mxu0 }
 0x2f5   : > { %vm2288_vm3 = vcmp.ge.f32.partialorder %v7243_v46, %v7231_v43  ;;  %v7247_v48 = vpop.f32.mrb[0].mxu1  ;;  %v7249_v49 = vpop.f32.mrb[1].mxu0 }
 0x2f6   : > { %v7255_v58 = vsel %vm2288_vm3, 1.0, %v7971_v56  ;;  %vm2290_vm4 = vcmp.ge.f32.partialorder %v7247_v48, %v7236_v44  ;;  %vm2289_vm5 = vcmp.ge.f32.partialorder %v7249_v49, %v7241_v45  ;;  %v7261_v60 = vpop.f32.mrb[1].mxu1  ;;  %v2765_v49 = vld [vmem:[#allocation7 + $0x9e8] sm:$0xff] }
 0x2f7   : > { %v7267_v0 = vsel %vm2289_vm5, 1.0, %v7971_v56  ;;  %v7275_v5 = vrot.slane %v7255_v58, 7  ;;  %vm2291_vm15 = vcmp.ge.f32.partialorder %v7261_v60, %v7357_v24  ;;  %v2893_v60 = vld [vmem:[#allocation7 + $0xde8] sm:$0xff] }
 0x2f8   : > { %v7270_v1 = vrot.slane %v7267_v0, 7  ;;  %v7272_v2 = vpop.f32.mrb[2].mxu0 }
 0x2f9   : > { %v7277_v33 = vpop.f32.mrb[2].mxu1  ;;  %v7279_v6 = vpop.f32.mrb[3].mxu0  ;;  %vm2292_vm6 = vcmp.ge.f32.partialorder %v7272_v2, %v7231_v43 }
 0x2fa   : > { %vm7970_vm7 = vcmp.ge.f32.partialorder %v7277_v33, %v7236_v44  ;;  %vm2293_vm8 = vcmp.ge.f32.partialorder %v7279_v6, %v7241_v45  ;;  %v7287_v16 = vpop.f32.mrb[3].mxu1  ;;  %4595 = vmatprep.mubr.msk.f32.mxu0 %vm7035_vm1, %v7270_v1  ;;  %4635 = vmatprep.mubr.msk.f32.mxu1 %vm7035_vm1, %v7270_v1  ;;  %v7314_v27 = vsel %vm2292_vm6, 1.0, %v7971_v56 }
 0x2fb   : > { %4597 = vmatmul.mubr.msk.f32.vlgmr.msra.gmra.mrb[8].mxu0 %vm7035_vm1, %v7275_v5  ;;  %4637 = vmatmul.mubr.msk.f32.vlgmr.msra.gmra.mrb[8].mxu1 %vm7035_vm1, %v7275_v5  ;;  %v7306_v18 = vsel %vm2293_vm8, 1.0, %v7971_v56  ;;  %v2356_v47 = vrot.slane %v7314_v27, 7 }
 0x2fc   : > { %5535 = vmatpush1.bf16.msra.mxu0 %v5534_v52  ;;  %5919 = vmatpush1.bf16.msra.mxu1 %v5918_v50  ;;  %v7308_v21 = vpop.f32.mrb[4].mxu0  ;;  %v2358_v28 = vrot.slane %v7306_v18, 7 }
 0x2fd   : > { %v7317_v29 = vpop.f32.mrb[4].mxu1  ;;  %v7319_v30 = vpop.f32.mrb[5].mxu0  ;;  %5537 = vmatprep.subr.bf16.mxu0 %v5536_v7  ;;  %5921 = vmatprep.subr.bf16.mxu1 %v5920_v8  ;;  %vm2296_vm11 = vcmp.ge.f32.partialorder %v7308_v21, %v7231_v43  ;;  %v7375_v7 = vld [vmem:[#allocation7 + $0x538] sm:$0xff]  ;;  %v7377_v8 = vld [vmem:[#allocation7 + $0x500] sm:$0xff]  ;;  %v2357_v57 = vsel %vm332_vm0, %v7275_v5, %v2356_v47  ;;  %v7444_v47 = vld [vmem:[#allocation7 + $0x5a8] sm:$0xff] }
 0x2fe   : > { %vm2298_vm9 = vcmp.ge.f32.partialorder %v7317_v29, %v7236_v44  ;;  %vm2297_vm10 = vcmp.ge.f32.partialorder %v7319_v30, %v7241_v45  ;;  %v7329_v35 = vpop.f32.mrb[5].mxu1  ;;  %v2359_v50 = vsel %vm332_vm0, %v7270_v1, %v2358_v28  ;;  %v7402_v28 = vld [vmem:[#allocation7 + $0x568] sm:$0xff]  ;;  %v7412_v34 = vsel %vm2296_vm11, 1.0, %v7971_v56 }
 0x2ff   : > { %v7365_v52 = vsel %vm2297_vm10, 1.0, %v7971_v56  ;;  %3286 = vmatprep.mubr.f32.mxu0 %v2359_v50  ;;  %3820 = vmatprep.mubr.f32.mxu1 %v2359_v50  ;;  %v5932_v55 = vpack.c.bf16 %v7375_v7, %v7373_v41  ;;  %v5550_v50 = vpack.c.bf16 %v7379_v10, %v7377_v8  ;;  %v2364_v42 = vrot.slane %v7412_v34, 7  ;;  %v7469_v8 = vld [vmem:[#allocation7 + $0x5a0] sm:$0xff]  ;;  %v7471_v10 = vld [vmem:[#allocation7 + $0x5c8] sm:$0xff] }
 0x300   : > { %5539 = vmatpush1.bf16.msra.mxu0 %v5538_v22  ;;  %5923 = vmatpush1.bf16.msra.mxu1 %v5922_v23  ;;  %v7346_v51 = vpop.f32.mrb[6].mxu0  ;;  %v2365_v11 = vrot.slane %v7365_v52, 7  ;;  %v5544_v22 = vpack.c.bf16 %v7333_v37, %v7331_v36  ;;  %v5928_v23 = vpack.c.bf16 %v7337_v61, %v7335_v53  ;;  %v7420_v36 = vld [vmem:[#allocation7 + $0x540] sm:$0xff]  ;;  %v7424_v53 = vld [vmem:[#allocation7 + $0x550] sm:$0xff]  ;;  %v5552_v9 = vpack.c.bf16 %v7402_v28, %v7392_v14 }
 0x301   : > { %v7369_v3 = vpop.f32.mrb[6].mxu1  ;;  %v7371_v4 = vpop.f32.mrb[7].mxu0  ;;  %5541 = vmatprep.subr.bf16.mxu0 %v5540_v19  ;;  %5925 = vmatprep.subr.bf16.mxu1 %v5924_v32  ;;  %vm7968_vm12 = vcmp.ge.f32.partialorder %v7346_v51, %v7231_v43  ;;  %v7404_v19 = vld [vmem:[#allocation7 + $0x558] sm:$0xff]  ;;  %v7422_v37 = vld [vmem:[#allocation7 + $0x560] sm:$0xff]  ;;  %v5556_v28 = vpack.c.bf16 %v7444_v47, %v7442_v31 }
 0x302   : > { %v7384_v1 = vpop.f32.mrb[7].mxu1  ;;  %v7406_v32 = vld [vmem:[#allocation7 + $0x578] sm:$0xff]  ;;  %vm2302_vm13 = vcmp.ge.f32.partialorder %v7369_v3, %v7236_v44  ;;  %vm7969_vm14 = vcmp.ge.f32.partialorder %v7371_v4, %v7241_v45  ;;  %v7432_v61 = vsel %vm7968_vm12, 1.0, %v7971_v56  ;;  %3287 = vmatmul.mubr.f32.gmra.mrb[10].mxu0 %v2357_v57  ;;  %3821 = vmatmul.mubr.f32.gmra.mrb[10].mxu1 %v2357_v57  ;;  %v5554_v7 = vpack.c.bf16 %v7422_v37, %v7420_v36  ;;  %v3008_v3 = vld [vmem:[#allocation7 + $0x1180] sm:$0xff] }
 0x303   : > { %v4591_v5 = vsel %vm7969_vm14, 1.0, %v7971_v56  ;;  %4599 = vmatprep.mubr.msk.f32.mxu0 %vm7035_vm1, %v2365_v11  ;;  %4639 = vmatprep.mubr.msk.f32.mxu1 %vm7035_vm1, %v2365_v11  ;;  %v7458_v57 = vld [vmem:[#allocation7 + $0x5b8] sm:$0xff]  ;;  %v5936_v41 = vpack.c.bf16 %v7406_v32, %v7404_v19  ;;  %vm2295_vm12 = vcmp.ge.f32.partialorder %v7287_v16, %v7357_v24  ;;  %v2368_v59 = vrot.slane %v7432_v61, 7 }
 0x304   : > { %5543 = vmatpush1.bf16.msra.mxu0 %v5542_v54  ;;  %v2370_v54 = vrot.slane %v4591_v5, 7  ;;  %5927 = vmatpush1.bf16.msra.mxu1 %v5926_v12  ;;  %v7479_v12 = vsel %vm2291_vm15, 1.0, %v7971_v56  ;;  %vm2303_vm14 = vcmp.ge.f32.partialorder %v7384_v1, %v7357_v24  ;;  %v7511_v32 = vsel %vm2290_vm4, 1.0, %v7971_v56 }
 0x305   : > { %5545 = vmatprep.subr.bf16.mxu0 %v5544_v22  ;;  %5929 = vmatprep.subr.bf16.mxu1 %v5928_v23  ;;  %v5938_v22 = vpack.c.bf16 %v7440_v38, %v7424_v53  ;;  %v5940_v23 = vpack.c.bf16 %v7458_v57, %v7456_v63  ;;  %v7514_v36 = vrot.slane %v7479_v12, 7  ;;  %v7520_v37 = vsel %vm2295_vm12, 1.0, %v7971_v56 }
 0x306   : > { %v2371_v14 = vsel %vm332_vm0, %v2365_v11, %v2370_v54  ;;  %4601 = vmatmul.mubr.msk.f32.gmra.mrb[12].mxu0 %vm7035_vm1, %v2364_v42  ;;  %4641 = vmatmul.mubr.msk.f32.gmra.mrb[12].mxu1 %vm7035_vm1, %v2364_v42  ;;  %v7499_v11 = vsel %vm7970_vm7, 1.0, %v7971_v56  ;;  %vm2299_vm7 = vcmp.ge.f32.partialorder %v7329_v35, %v7357_v24  ;;  %v7531_v53 = vsel %vm2302_vm13, 1.0, %v7971_v56  ;;  %v3007_v24 = vld [vmem:[#allocation7 + $0x1178] sm:$0xff] }
 0x307   : > { %3298 = vmatprep.mubr.f32.mxu0 %v2371_v14  ;;  %3832 = vmatprep.mubr.f32.mxu1 %v2371_v14  ;;  %v7537_v38 = vsel %vm2303_vm14, 1.0, %v7971_v56  ;;  %v2369_v31 = vsel %vm332_vm0, %v2364_v42, %v2368_v59  ;;  %v7547_v47 = vrot.slane %v4591_v5, 1  ;;  %v7550_v54 = vrot.slane %v7520_v37, 1  ;;  %v2626_v59 = vld [vmem:[#allocation7 + $0x590] sm:$0xff]  ;;  %v2635_v14 = vld [vmem:[#allocation7 + $0x5d8] sm:$0xff] }
 0x308   : > { %5547 = vmatpush1.bf16.msra.mxu0 %v5546_v25  ;;  %v5558_v25 = vpack.c.bf16 %v7469_v8, %v7460_v15  ;;  %5931 = vmatpush1.bf16.msra.mxu1 %v5930_v26  ;;  %v7525_v15 = vrot.slane %v7306_v18, 1  ;;  %v2403_v26 = vrot.slane %v7267_v0, 1  ;;  %v7542_v18 = vrot.slane %v7314_v27, 1 }
 0x309   : > { %5549 = vmatprep.subr.bf16.mxu0 %v5548_v17  ;;  %5933 = vmatprep.subr.bf16.mxu1 %v5932_v55  ;;  %v7545_v17 = vrot.slane %v7499_v11, 1  ;;  %8004 = vst [vmem:[#allocation17_spill] sm:$0xff] %v7550_v54  ;;  %v7556_v42 = vsel %vm2298_vm9, 1.0, %v7971_v56  ;;  %v7562_v0 = vsel %vm2299_vm7, 1.0, %v7971_v56  ;;  %v7565_v27 = vrot.slane %v7432_v61, 1  ;;  %v2632_v56 = vld [vmem:[#allocation7 + $0x5c0] sm:$0xff] }
 0x30a   : > { %3299 = vmatmul.mubr.f32.gmra.mrb[14].mxu0 %v2369_v31  ;;  %3833 = vmatmul.mubr.f32.gmra.mrb[14].mxu1 %v2369_v31  ;;  %v2400_v5 = vrot.slane %v7255_v58, 1  ;;  %v2415_v55 = vrot.slane %v7365_v52, 1  ;;  %v7579_v63 = vrot.slane %v7537_v38, 1  ;;  %v2406_v61 = vrot.slane %v7511_v32, 1  ;;  %v2630_v58 = vld [vmem:[#allocation7 + $0x5b0] sm:$0xff] }
 0x30b   : > { %8005 = vst [vmem:[#allocation18_spill] sm:$0xff] %v7565_v27  ;;  %4603 = vmatprep.mubr.msk.f32.mxu0 %vm7035_vm1, %v7514_v36  ;;  %4643 = vmatprep.mubr.msk.f32.mxu1 %vm7035_vm1, %v7514_v36  ;;  %v2409_v57 = vrot.slane %v7479_v12, 1  ;;  %v2412_v8 = vrot.slane %v7412_v34, 1  ;;  %v7586_v52 = vsel %vm381_vm2, %v2403_v26, %v7525_v15  ;;  %v2418_v31 = vrot.slane %v7556_v42, 1  ;;  %v2645_v12 = vld [vmem:[#allocation7 + $0x628] sm:$0xff] }
 0x30c   : > { %5551 = vmatpush1.bf16.msra.mxu0 %v5550_v50  ;;  %v7576_v50 = vrot.slane %v7531_v53, 1  ;;  %8007 = vst [vmem:[#allocation20_spill] sm:$0xff] %v7579_v63  ;;  %5935 = vmatpush1.bf16.msra.mxu1 %v5934_v62  ;;  %v2421_v62 = vrot.slane %v7562_v0, 1  ;;  %v7592_v34 = vsel %vm381_vm2, %v2400_v5, %v7542_v18  ;;  %v7608_v19 = vsel %vm381_vm2, %v2406_v61, %v7545_v17 }
 0x30d   : > { %5553 = vmatprep.subr.bf16.mxu0 %v5552_v9  ;;  %5937 = vmatprep.subr.bf16.mxu1 %v5936_v41  ;;  %v2639_v9 = vld [vmem:[#allocation7 + $0x5f8] sm:$0xff]  ;;  %v7596_v41 = vsel %vm381_vm2, %v2415_v55, %v7547_v47  ;;  %v7600_v26 = vsel %vm381_vm2, %v2412_v8, %v7565_v27  ;;  %v5942_v5 = vpack.c.bf16 %v2630_v58, %v2626_v59  ;;  %v2640_v58 = vld [vmem:[#allocation7 + $0x600] sm:$0xff] }
 0x30e   : > { %8006 = vst [vmem:[#allocation19_spill] sm:$0xff] %v7576_v50  ;;  %v7612_v55 = vsel %vm381_vm2, %v2421_v62, %v7579_v63  ;;  %v7616_v39 = vsel %vm381_vm2, %v2418_v31, %v7576_v50  ;;  %v5944_v8 = vpack.c.bf16 %v2639_v9, %v2635_v14  ;;  %v5562_v27 = vpack.c.bf16 %v2636_v40, %v2632_v56  ;;  %v2647_v59 = vld [vmem:[#allocation7 + $0x638] sm:$0xff]  ;;  %v2644_v62 = vld [vmem:[#allocation7 + $0x620] sm:$0xff]  ;;  %v2649_v63 = vld [vmem:[#allocation7 + $0x648] sm:$0xff] }
 0x30f   : > { %8009 = vst [vmem:[#allocation22_spill] sm:$0xff] %v7612_v55  ;;  %8010 = vst [vmem:[#allocation23_spill] sm:$0xff] %v7616_v39  ;;  %v8011_v61 = vpack.c.bf16 %v7473_v13, %v7471_v10  ;;  %v2653_v55 = vld [vmem:[#allocation7 + $0x668] sm:$0xff]  ;;  %v2642_v40 = vld [vmem:[#allocation7 + $0x610] sm:$0xff] }
 0x310   : > { %5555 = vmatpush1.bf16.msra.mxu0 %v5554_v7  ;;  %v2641_v7 = vld [vmem:[#allocation7 + $0x608] sm:$0xff]  ;;  %5939 = vmatpush1.bf16.msra.mxu1 %v5938_v22  ;;  %v2646_v56 = vld [vmem:[#allocation7 + $0x630] sm:$0xff]  ;;  %v2651_v14 = vld [vmem:[#allocation7 + $0x658] sm:$0xff]  ;;  %v5568_v9 = vpack.c.bf16 %v2653_v55, %v2649_v63 }
 0x311   : > { %5557 = vmatprep.subr.bf16.mxu0 %v5556_v28  ;;  %v7604_v28 = vsel %vm381_vm2, %v2409_v57, %v7550_v54  ;;  %5941 = vmatprep.subr.bf16.mxu1 %v5940_v23  ;;  %v2634_v57 = vld [vmem:[#allocation7 + $0x5d0] sm:$0xff]  ;;  %v5564_v22 = vpack.c.bf16 %v2645_v12, %v2641_v7  ;;  %v2655_v50 = vld [vmem:[#allocation7 + $0x678] sm:$0xff]  ;;  %v2648_v10 = vld [vmem:[#allocation7 + $0x640] sm:$0xff] }
 0x312   : > { %8008 = vst [vmem:[#allocation21_spill] sm:$0xff] %v7604_v28  ;;  %v2638_v54 = vld [vmem:[#allocation7 + $0x5f0] sm:$0xff]  ;;  %v2643_v28 = vld [vmem:[#allocation7 + $0x618] sm:$0xff]  ;;  %v2652_v13 = vld [vmem:[#allocation7 + $0x660] sm:$0xff] }
 0x313   : > { %v5946_v31 = vpack.c.bf16 %v2638_v54, %v2634_v57  ;;  %v5948_v23 = vpack.c.bf16 %v2647_v59, %v2643_v28  ;;  %v2657_v7 = vld [vmem:[#allocation7 + $0x688] sm:$0xff]  ;;  %v5570_v54 = vpack.c.bf16 %v2652_v13, %v2648_v10  ;;  %v2659_v28 = vld [vmem:[#allocation7 + $0x698] sm:$0xff]  ;;  %v2664_v10 = vld [vmem:[#allocation7 + $0x6c0] sm:$0xff] }
 0x314   : > { %5559 = vmatpush1.bf16.msra.mxu0 %v5558_v25  ;;  %5943 = vmatpush1.bf16.msra.mxu1 %v5942_v5  ;;  %v5566_v25 = vpack.c.bf16 %v2644_v62, %v2640_v58  ;;  %v2661_v12 = vld [vmem:[#allocation7 + $0x6a8] sm:$0xff]  ;;  %v5952_v5 = vpack.c.bf16 %v2655_v50, %v2651_v14  ;;  %v2663_v59 = vld [vmem:[#allocation7 + $0x6b8] sm:$0xff]  ;;  %v2656_v58 = vld [vmem:[#allocation7 + $0x680] sm:$0xff] }
 0x315   : > { %5561 = vmatprep.subr.bf16.mxu0 %v8011_v61  ;;  %5945 = vmatprep.subr.bf16.mxu1 %v5944_v8  ;;  %v5950_v61 = vpack.c.bf16 %v2646_v56, %v2642_v40  ;;  %v2650_v8 = vld [vmem:[#allocation7 + $0x650] sm:$0xff]  ;;  %v5572_v57 = vpack.c.bf16 %v2661_v12, %v2657_v7  ;;  %v2665_v63 = vld [vmem:[#allocation7 + $0x6c8] sm:$0xff]  ;;  %v2667_v50 = vld [vmem:[#allocation7 + $0x6d8] sm:$0xff] }
 0x316   : > { %v2669_v55 = vld [vmem:[#allocation7 + $0x6e8] sm:$0xff]  ;;  %v2671_v14 = vld [vmem:[#allocation7 + $0x6f8] sm:$0xff] }
 0x317   : > { %v5576_v56 = vpack.c.bf16 %v2669_v55, %v2665_v63  ;;  %v2673_v13 = vld [vmem:[#allocation7 + $0x708] sm:$0xff] }
 0x318   : > { %5563 = vmatpush1.bf16.msra.mxu0 %v5562_v27  ;;  %5947 = vmatpush1.bf16.msra.mxu1 %v5946_v31  ;;  %v2654_v27 = vld [vmem:[#allocation7 + $0x670] sm:$0xff]  ;;  %v5956_v31 = vpack.c.bf16 %v2663_v59, %v2659_v28  ;;  %v2677_v7 = vld [vmem:[#allocation7 + $0x728] sm:$0xff]  ;;  %v2679_v59 = vld [vmem:[#allocation7 + $0x738] sm:$0xff] }
 0x319   : > { %5565 = vmatprep.subr.bf16.mxu0 %v5564_v22  ;;  %5949 = vmatprep.subr.bf16.mxu1 %v5948_v23  ;;  %v2660_v22 = vld [vmem:[#allocation7 + $0x6a0] sm:$0xff]  ;;  %v5954_v62 = vpack.c.bf16 %v2654_v27, %v2650_v8  ;;  %v2658_v23 = vld [vmem:[#allocation7 + $0x690] sm:$0xff]  ;;  %v2675_v27 = vld [vmem:[#allocation7 + $0x718] sm:$0xff]  ;;  %v5580_v28 = vpack.c.bf16 %v2677_v7, %v2673_v13 }
 0x31a   : > { %v5574_v40 = vpack.c.bf16 %v2660_v22, %v2656_v58  ;;  %v2672_v58 = vld [vmem:[#allocation7 + $0x700] sm:$0xff]  ;;  %v2681_v22 = vld [vmem:[#allocation7 + $0x748] sm:$0xff] }
 0x31b   : > { %v2685_v63 = vld [vmem:[#allocation7 + $0x768] sm:$0xff] }
 0x31c   : > { %5567 = vmatpush1.bf16.msra.mxu0 %v5566_v25  ;;  %5951 = vmatpush1.bf16.msra.mxu1 %v5950_v61  ;;  %v2662_v25 = vld [vmem:[#allocation7 + $0x6b0] sm:$0xff]  ;;  %v5960_v61 = vpack.c.bf16 %v2671_v14, %v2667_v50  ;;  %v5584_v50 = vpack.c.bf16 %v2685_v63, %v2681_v22  ;;  %v2687_v14 = vld [vmem:[#allocation7 + $0x778] sm:$0xff]  ;;  %v2693_v13 = vld [vmem:[#allocation7 + $0x7a8] sm:$0xff] }
 0x31d   : > { %5569 = vmatprep.subr.bf16.mxu0 %v5568_v9  ;;  %5953 = vmatprep.subr.bf16.mxu1 %v5952_v5  ;;  %v2668_v9 = vld [vmem:[#allocation7 + $0x6e0] sm:$0xff]  ;;  %v5958_v12 = vpack.c.bf16 %v2662_v25, %v2658_v23  ;;  %v2666_v5 = vld [vmem:[#allocation7 + $0x6d0] sm:$0xff]  ;;  %v2683_v25 = vld [vmem:[#allocation7 + $0x758] sm:$0xff] }
 0x31e   : > { %v5578_v8 = vpack.c.bf16 %v2668_v9, %v2664_v10  ;;  %v2680_v10 = vld [vmem:[#allocation7 + $0x740] sm:$0xff]  ;;  %v2689_v9 = vld [vmem:[#allocation7 + $0x788] sm:$0xff] }
 0x31f   : > { %v2701_v22 = vld [vmem:[#allocation7 + $0x7e8] sm:$0xff] }
 0x320   : > { %5571 = vmatpush1.bf16.msra.mxu0 %v5570_v54  ;;  %5955 = vmatpush1.bf16.msra.mxu1 %v5954_v62  ;;  %v2670_v54 = vld [vmem:[#allocation7 + $0x6f0] sm:$0xff]  ;;  %v5964_v62 = vpack.c.bf16 %v2679_v59, %v2675_v27  ;;  %v5588_v27 = vpack.c.bf16 %v2693_v13, %v2689_v9  ;;  %v2695_v59 = vld [vmem:[#allocation7 + $0x7b8] sm:$0xff]  ;;  %v2709_v9 = vld [vmem:[#allocation7 + $0x828] sm:$0xff] }
 0x321   : > { %5573 = vmatprep.subr.bf16.mxu0 %v5572_v57  ;;  %5957 = vmatprep.subr.bf16.mxu1 %v5956_v31  ;;  %v2676_v57 = vld [vmem:[#allocation7 + $0x720] sm:$0xff]  ;;  %v5962_v55 = vpack.c.bf16 %v2670_v54, %v2666_v5  ;;  %v2674_v31 = vld [vmem:[#allocation7 + $0x710] sm:$0xff]  ;;  %v2691_v54 = vld [vmem:[#allocation7 + $0x798] sm:$0xff] }
 0x322   : > { %v5582_v23 = vpack.c.bf16 %v2676_v57, %v2672_v58  ;;  %v2688_v58 = vld [vmem:[#allocation7 + $0x780] sm:$0xff]  ;;  %v2697_v57 = vld [vmem:[#allocation7 + $0x7c8] sm:$0xff] }
 0x323   : > { %v2717_v39 = vld [vmem:[#allocation7 + $0x868] sm:$0xff] }
 0x324   : > { %5575 = vmatpush1.bf16.msra.mxu0 %v5574_v40  ;;  %5959 = vmatpush1.bf16.msra.mxu1 %v5958_v12  ;;  %v2678_v40 = vld [vmem:[#allocation7 + $0x730] sm:$0xff]  ;;  %v5968_v12 = vpack.c.bf16 %v2687_v14, %v2683_v25  ;;  %v5592_v25 = vpack.c.bf16 %v2701_v22, %v2697_v57  ;;  %v2703_v14 = vld [vmem:[#allocation7 + $0x7f8] sm:$0xff]  ;;  %v2713_v22 = vld [vmem:[#allocation7 + $0x848] sm:$0xff] }
 0x325   : > { %5577 = vmatprep.subr.bf16.mxu0 %v5576_v56  ;;  %5961 = vmatprep.subr.bf16.mxu1 %v5960_v61  ;;  %v2684_v56 = vld [vmem:[#allocation7 + $0x760] sm:$0xff]  ;;  %v5966_v7 = vpack.c.bf16 %v2678_v40, %v2674_v31  ;;  %v2682_v61 = vld [vmem:[#allocation7 + $0x750] sm:$0xff]  ;;  %v2699_v40 = vld [vmem:[#allocation7 + $0x7d8] sm:$0xff] }
 0x326   : > { %v5586_v5 = vpack.c.bf16 %v2684_v56, %v2680_v10  ;;  %v2696_v10 = vld [vmem:[#allocation7 + $0x7c0] sm:$0xff]  ;;  %v2705_v56 = vld [vmem:[#allocation7 + $0x808] sm:$0xff] }
 0x328   : > { %5579 = vmatpush1.bf16.msra.mxu0 %v5578_v8  ;;  %5963 = vmatpush1.bf16.msra.mxu1 %v5962_v55  ;;  %v2686_v8 = vld [vmem:[#allocation7 + $0x770] sm:$0xff]  ;;  %v5972_v55 = vpack.c.bf16 %v2695_v59, %v2691_v54  ;;  %v2707_v54 = vld [vmem:[#allocation7 + $0x818] sm:$0xff] }
 0x329   : > { %5581 = vmatprep.subr.bf16.mxu0 %v5580_v28  ;;  %5965 = vmatprep.subr.bf16.mxu1 %v5964_v62  ;;  %v2692_v28 = vld [vmem:[#allocation7 + $0x7a0] sm:$0xff]  ;;  %v5970_v63 = vpack.c.bf16 %v2686_v8, %v2682_v61  ;;  %v2690_v62 = vld [vmem:[#allocation7 + $0x790] sm:$0xff]  ;;  %v5596_v8 = vpack.c.bf16 %v2709_v9, %v2705_v56  ;;  %v2711_v59 = vld [vmem:[#allocation7 + $0x838] sm:$0xff] }
 0x32a   : > { %v5590_v31 = vpack.c.bf16 %v2692_v28, %v2688_v58  ;;  %v2704_v58 = vld [vmem:[#allocation7 + $0x800] sm:$0xff]  ;;  %v2362_v28 = vrot.slane %v7520_v37, 7  ;;  %v2360_v37 = vrot.slane %v7499_v11, 7 }
 0x32c   : > { %5583 = vmatpush1.bf16.msra.mxu0 %v5582_v23  ;;  %5967 = vmatpush1.bf16.msra.mxu1 %v5966_v7  ;;  %v2694_v23 = vld [vmem:[#allocation7 + $0x7b0] sm:$0xff]  ;;  %v5976_v7 = vpack.c.bf16 %v2703_v14, %v2699_v40  ;;  %v2715_v40 = vld [vmem:[#allocation7 + $0x858] sm:$0xff]  ;;  %v5600_v14 = vpack.c.bf16 %v2717_v39, %v2713_v22  ;;  %v2363_v56 = vsel %vm332_vm0, %v7514_v36, %v2362_v28  ;;  %v2367_v36 = vrot.slane %v7562_v0, 7  ;;  %v2729_v28 = vld [vmem:[#allocation7 + $0x8c8] sm:$0xff] }
 0x32d   : > { %5585 = vmatprep.subr.bf16.mxu0 %v5584_v50  ;;  %5969 = vmatprep.subr.bf16.mxu1 %v5968_v12  ;;  %v2700_v50 = vld [vmem:[#allocation7 + $0x7e0] sm:$0xff]  ;;  %v5974_v13 = vpack.c.bf16 %v2694_v23, %v2690_v62  ;;  %v2698_v12 = vld [vmem:[#allocation7 + $0x7d0] sm:$0xff]  ;;  %v2354_v62 = vrot.slane %v7511_v32, 7  ;;  %v2374_v22 = vrot.slane %v7537_v38, 7  ;;  %v2731_v0 = vld [vmem:[#allocation7 + $0x8d8] sm:$0xff]  ;;  %v2372_v38 = vrot.slane %v7531_v53, 7 }
 0x32e   : > { %v5594_v61 = vpack.c.bf16 %v2700_v50, %v2696_v10  ;;  %v2712_v10 = vld [vmem:[#allocation7 + $0x840] sm:$0xff]  ;;  %v2739_v53 = vld [vmem:[#allocation7 + $0x918] sm:$0xff] }
 0x32f   : > { %v2716_v50 = vld [vmem:[#allocation7 + $0x860] sm:$0xff] }
 0x330   : > { %5587 = vmatpush1.bf16.msra.mxu0 %v5586_v5  ;;  %5971 = vmatpush1.bf16.msra.mxu1 %v5970_v63  ;;  %v2702_v5 = vld [vmem:[#allocation7 + $0x7f0] sm:$0xff]  ;;  %v5980_v63 = vpack.c.bf16 %v2711_v59, %v2707_v54  ;;  %v5602_v39 = vpack.c.bf16 %v2716_v50, %v2712_v10  ;;  %v2720_v54 = vld [vmem:[#allocation7 + $0x880] sm:$0xff] }
 0x331   : > { %5589 = vmatprep.subr.bf16.mxu0 %v5588_v27  ;;  %5973 = vmatprep.subr.bf16.mxu1 %v5972_v55  ;;  %v2708_v27 = vld [vmem:[#allocation7 + $0x820] sm:$0xff]  ;;  %v5978_v57 = vpack.c.bf16 %v2702_v5, %v2698_v12  ;;  %v2706_v55 = vld [vmem:[#allocation7 + $0x810] sm:$0xff]  ;;  %v2723_v5 = vld [vmem:[#allocation7 + $0x898] sm:$0xff] }
 0x332   : > { %v5598_v23 = vpack.c.bf16 %v2708_v27, %v2704_v58  ;;  %v2718_v12 = vld [vmem:[#allocation7 + $0x870] sm:$0xff]  ;;  %v2724_v59 = vld [vmem:[#allocation7 + $0x8a0] sm:$0xff]  ;;  %v2361_v58 = vsel %vm332_vm0, %v2354_v62, %v2360_v37  ;;  %v2737_v37 = vld [vmem:[#allocation7 + $0x908] sm:$0xff] }
 0x333   : > { %v2732_v10 = vld [vmem:[#allocation7 + $0x8e0] sm:$0xff] }
 0x334   : > { %5591 = vmatpush1.bf16.msra.mxu0 %v5590_v31  ;;  %5975 = vmatpush1.bf16.msra.mxu1 %v5974_v13  ;;  %v2710_v31 = vld [vmem:[#allocation7 + $0x830] sm:$0xff]  ;;  %v2721_v13 = vld [vmem:[#allocation7 + $0x888] sm:$0xff] }
 0x335   : > { %5593 = vmatprep.subr.bf16.mxu0 %v5592_v25  ;;  %5977 = vmatprep.subr.bf16.mxu1 %v5976_v7  ;;  %v2719_v25 = vld [vmem:[#allocation7 + $0x878] sm:$0xff]  ;;  %v5982_v9 = vpack.c.bf16 %v2710_v31, %v2706_v55  ;;  %v2725_v7 = vld [vmem:[#allocation7 + $0x8a8] sm:$0xff]  ;;  %v2722_v55 = vld [vmem:[#allocation7 + $0x890] sm:$0xff] }
 0x336   : > { %v5984_v32 = vpack.c.bf16 %v2719_v25, %v2715_v40  ;;  %v5604_v11 = vpack.c.bf16 %v2725_v7, %v2721_v13  ;;  %v2726_v31 = vld [vmem:[#allocation7 + $0x8b0] sm:$0xff]  ;;  %v2735_v40 = vld [vmem:[#allocation7 + $0x8f8] sm:$0xff]  ;;  %v2366_v25 = vrot.slane %v7556_v42, 7  ;;  %v2375_v42 = vsel %vm332_vm0, %v2367_v36, %v2374_v22 }
 0x337   : > { %v5990_v50 = vpack.c.bf16 %v2726_v31, %v2722_v55  ;;  %v2730_v13 = vld [vmem:[#allocation7 + $0x8d0] sm:$0xff]  ;;  %v2751_v22 = vld [vmem:[#allocation7 + $0x978] sm:$0xff]  ;;  %v2744_v55 = vld [vmem:[#allocation7 + $0x940] sm:$0xff] }
 0x338   : > { %5595 = vmatpush1.bf16.msra.mxu0 %v5594_v61  ;;  %5979 = vmatpush1.bf16.msra.mxu1 %v5978_v57  ;;  %v2714_v61 = vld [vmem:[#allocation7 + $0x850] sm:$0xff]  ;;  %v2733_v57 = vld [vmem:[#allocation7 + $0x8e8] sm:$0xff]  ;;  %v2748_v31 = vld [vmem:[#allocation7 + $0x960] sm:$0xff] }
 0x339   : > { %5597 = vmatprep.subr.bf16.mxu0 %v5596_v8  ;;  %5981 = vmatprep.subr.bf16.mxu1 %v5980_v63  ;;  %v2727_v8 = vld [vmem:[#allocation7 + $0x8b8] sm:$0xff]  ;;  %v5986_v27 = vpack.c.bf16 %v2718_v12, %v2714_v61  ;;  %v2734_v7 = vld [vmem:[#allocation7 + $0x8f0] sm:$0xff] }
 0x33a   : > { %v5988_v63 = vpack.c.bf16 %v2727_v8, %v2723_v5  ;;  %v2743_v61 = vld [vmem:[#allocation7 + $0x938] sm:$0xff]  ;;  %v2740_v5 = vld [vmem:[#allocation7 + $0x920] sm:$0xff]  ;;  %v2373_v8 = vsel %vm332_vm0, %v2366_v25, %v2372_v38  ;;  %vm8012_vm0 = vcmp.ge.f32.partialorder %v7371_v4, %v7241_v45 }
 0x33b   : > { %4605 = vmatmul.mubr.msk.f32.vlgmr.msra.gmra.mrb[8].mxu0 %vm7035_vm1, %v2354_v62  ;;  %4645 = vmatmul.mubr.msk.f32.vlgmr.msra.gmra.mrb[8].mxu1 %vm7035_vm1, %v2354_v62  ;;  %v5608_v62 = vpack.c.bf16 %v2733_v57, %v2729_v28  ;;  %v6754_v28 = vmov 1.0   ;;  %v2747_v57 = vld [vmem:[#allocation7 + $0x958] sm:$0xff] }
 0x33c   : > { %3375 = vmatprep.mubr.f32.mxu0 %v2363_v56  ;;  %5599 = vmatpush1.bf16.msra.mxu0 %v5598_v23  ;;  %v5606_v23 = vpack.c.bf16 %v2724_v59, %v2720_v54  ;;  %v2745_v54 = vld [vmem:[#allocation7 + $0x948] sm:$0xff]  ;;  %v2755_v38 = vld [vmem:[#allocation7 + $0x998] sm:$0xff] }
 0x33d   : > { %5601 = vmatprep.subr.bf16.mxu0 %v5600_v14  ;;  %3909 = vmatprep.mubr.f32.mxu1 %v2363_v56  ;;  %v2728_v14 = vld [vmem:[#allocation7 + $0x8c0] sm:$0xff]  ;;  %v2741_v56 = vld [vmem:[#allocation7 + $0x928] sm:$0xff]  ;;  %v2875_v4 = vld [vmem:[#allocation7 + $0xd58] sm:$0xff] }
 0x33e   : > { %5983 = vmatpush1.bf16.msra.mxu1 %v5982_v9  ;;  %v5992_v9 = vpack.c.bf16 %v2735_v40, %v2731_v0  ;;  %v5612_v12 = vpack.c.bf16 %v2741_v56, %v2737_v37  ;;  %v2749_v59 = vld [vmem:[#allocation7 + $0x968] sm:$0xff]  ;;  %v2752_v56 = vld [vmem:[#allocation7 + $0x980] sm:$0xff] }
 0x33f   : > { %3376 = vmatmul.mubr.f32.gmra.mrb[10].mxu0 %v2361_v58  ;;  %5985 = vmatprep.subr.bf16.mxu1 %v5984_v32  ;;  %v5610_v32 = vpack.c.bf16 %v2732_v10, %v2728_v14  ;;  %v2753_v0 = vld [vmem:[#allocation7 + $0x988] sm:$0xff]  ;;  %v2750_v14 = vld [vmem:[#allocation7 + $0x970] sm:$0xff]  ;;  %v5618_v10 = vpack.c.bf16 %v2748_v31, %v2744_v55  ;;  %v2768_v31 = vld [vmem:[#allocation7 + $0xa00] sm:$0xff] }
 0x340   : > { %4607 = vmatprep.mubr.msk.f32.mxu0 %vm7035_vm1, %v2367_v36  ;;  %5603 = vmatpush1.bf16.msra.mxu0 %v5602_v39  ;;  %v2736_v39 = vld [vmem:[#allocation7 + $0x900] sm:$0xff]  ;;  %v2757_v40 = vld [vmem:[#allocation7 + $0x9a8] sm:$0xff] }
 0x341   : > { %3910 = vmatmul.mubr.f32.gmra.mrb[10].mxu1 %v2361_v58  ;;  %5605 = vmatprep.subr.bf16.mxu0 %v5604_v11  ;;  %v5994_v11 = vpack.c.bf16 %v2734_v7, %v2730_v13  ;;  %v2738_v58 = vld [vmem:[#allocation7 + $0x910] sm:$0xff]  ;;  %v5614_v20 = vpack.c.bf16 %v2740_v5, %v2736_v39  ;;  %v5620_v37 = vpack.c.bf16 %v2757_v40, %v2753_v0  ;;  %v2761_v13 = vld [vmem:[#allocation7 + $0x9c8] sm:$0xff]  ;;  %v2767_v39 = vld [vmem:[#allocation7 + $0x9f8] sm:$0xff] }
 0x342   : > { %4647 = vmatprep.mubr.msk.f32.mxu1 %vm7035_vm1, %v2367_v36  ;;  %5987 = vmatpush1.bf16.msra.mxu1 %v5986_v27  ;;  %v5996_v36 = vpack.c.bf16 %v2743_v61, %v2739_v53  ;;  %v2742_v27 = vld [vmem:[#allocation7 + $0x930] sm:$0xff]  ;;  %v5624_v5 = vpack.c.bf16 %v2765_v49, %v2761_v13  ;;  %v2777_v40 = vld [vmem:[#allocation7 + $0xa48] sm:$0xff] }
 0x343   : > { %4609 = vmatmul.mubr.msk.f32.gmra.mrb[12].mxu0 %vm7035_vm1, %v2366_v25  ;;  %5989 = vmatprep.subr.bf16.mxu1 %v5988_v63  ;;  %v5616_v63 = vpack.c.bf16 %v2749_v59, %v2745_v54  ;;  %v2758_v53 = vld [vmem:[#allocation7 + $0x9b0] sm:$0xff]  ;;  %v2769_v59 = vld [vmem:[#allocation7 + $0xa08] sm:$0xff] }
 0x344   : > { %3387 = vmatprep.mubr.f32.mxu0 %v2375_v42  ;;  %5607 = vmatpush1.bf16.msra.mxu0 %v5606_v23  ;;  %v5998_v23 = vpack.c.bf16 %v2742_v27, %v2738_v58  ;;  %v2762_v27 = vld [vmem:[#allocation7 + $0x9d0] sm:$0xff]  ;;  %v2785_v49 = vld [vmem:[#allocation7 + $0xa88] sm:$0xff] }
 0x345   : > { %4649 = vmatmul.mubr.msk.f32.gmra.mrb[12].mxu1 %vm7035_vm1, %v2366_v25  ;;  %5609 = vmatprep.subr.bf16.mxu0 %v5608_v62  ;;  %v6000_v25 = vpack.c.bf16 %v2751_v22, %v2747_v57  ;;  %v2746_v62 = vld [vmem:[#allocation7 + $0x950] sm:$0xff]  ;;  %v2771_v22 = vld [vmem:[#allocation7 + $0xa18] sm:$0xff]  ;;  %vm8013_vm1 = vmmov %vm8012_vm0 }
 0x346   : > { %3921 = vmatprep.mubr.f32.mxu1 %v2375_v42  ;;  %5991 = vmatpush1.bf16.msra.mxu1 %v5990_v50  ;;  %v2759_v50 = vld [vmem:[#allocation7 + $0x9b8] sm:$0xff]  ;;  %v2756_v42 = vld [vmem:[#allocation7 + $0x9a0] sm:$0xff] }
 0x347   : > { %3388 = vmatmul.mubr.f32.gmra.mrb[14].mxu0 %v2373_v8  ;;  %5993 = vmatprep.subr.bf16.mxu1 %v5992_v9  ;;  %v6002_v9 = vpack.c.bf16 %v2750_v14, %v2746_v62  ;;  %v6004_v7 = vpack.c.bf16 %v2759_v50, %v2755_v38  ;;  %v5622_v61 = vpack.c.bf16 %v2756_v42, %v2752_v56  ;;  %v2770_v14 = vld [vmem:[#allocation7 + $0xa10] sm:$0xff]  ;;  %v2779_v50 = vld [vmem:[#allocation7 + $0xa58] sm:$0xff]  ;;  %v2776_v42 = vld [vmem:[#allocation7 + $0xa40] sm:$0xff] }
 0x348   : > { %5611 = vmatpush1.bf16.msra.mxu0 %v5610_v32  ;;  %4610 = vmatprep.mubr.msk.f32.mxu0 %vm2289_vm5, %v6754_v28  ;;  %v2754_v32 = vld [vmem:[#allocation7 + $0x990] sm:$0xff] }
 0x349   : > { %3922 = vmatmul.mubr.f32.gmra.mrb[14].mxu1 %v2373_v8  ;;  %5613 = vmatprep.subr.bf16.mxu0 %v5612_v12  ;;  %v2763_v12 = vld [vmem:[#allocation7 + $0x9d8] sm:$0xff]  ;;  %v2760_v8 = vld [vmem:[#allocation7 + $0x9c0] sm:$0xff]  ;;  %v6006_v54 = vpack.c.bf16 %v2758_v53, %v2754_v32  ;;  %v2778_v53 = vld [vmem:[#allocation7 + $0xa50] sm:$0xff] }
 0x34a   : > { %5995 = vmatpush1.bf16.msra.mxu1 %v5994_v11  ;;  %4650 = vmatprep.mubr.msk.f32.mxu1 %vm2289_vm5, %v6754_v28  ;;  %v2764_v11 = vld [vmem:[#allocation7 + $0x9e0] sm:$0xff]  ;;  %v6008_v58 = vpack.c.bf16 %v2767_v39, %v2763_v12  ;;  %v2787_v39 = vld [vmem:[#allocation7 + $0xa98] sm:$0xff] }
 0x34b   : > { %5997 = vmatprep.subr.bf16.mxu1 %v5996_v36  ;;  %v2773_v36 = vld [vmem:[#allocation7 + $0xa28] sm:$0xff]  ;;  %v5626_v57 = vpack.c.bf16 %v2764_v11, %v2760_v8  ;;  %v2784_v11 = vld [vmem:[#allocation7 + $0xa80] sm:$0xff] }
 0x34c   : > { %5615 = vmatpush1.bf16.msra.mxu0 %v5614_v20  ;;  %v2766_v20 = vld [vmem:[#allocation7 + $0x9f0] sm:$0xff]  ;;  %v5628_v55 = vpack.c.bf16 %v2773_v36, %v2769_v59  ;;  %v2793_v36 = vld [vmem:[#allocation7 + $0xac8] sm:$0xff] }
 0x34d   : > { %5617 = vmatprep.subr.bf16.mxu0 %v5616_v63  ;;  %v2775_v63 = vld [vmem:[#allocation7 + $0xa38] sm:$0xff]  ;;  %v6010_v0 = vpack.c.bf16 %v2766_v20, %v2762_v27  ;;  %v2786_v20 = vld [vmem:[#allocation7 + $0xa90] sm:$0xff] }
 0x34e   : > { %5999 = vmatpush1.bf16.msra.mxu1 %v5998_v23  ;;  %v2772_v23 = vld [vmem:[#allocation7 + $0xa20] sm:$0xff]  ;;  %v6012_v62 = vpack.c.bf16 %v2775_v63, %v2771_v22  ;;  %v2795_v63 = vld [vmem:[#allocation7 + $0xad8] sm:$0xff] }
 0x34f   : > { %6001 = vmatprep.subr.bf16.mxu1 %v6000_v25  ;;  %v2781_v25 = vld [vmem:[#allocation7 + $0xa68] sm:$0xff]  ;;  %v5630_v38 = vpack.c.bf16 %v2772_v23, %v2768_v31  ;;  %v2792_v23 = vld [vmem:[#allocation7 + $0xac0] sm:$0xff] }
 0x350   : > { %5619 = vmatpush1.bf16.msra.mxu0 %v5618_v10  ;;  %v2774_v10 = vld [vmem:[#allocation7 + $0xa30] sm:$0xff]  ;;  %v5632_v56 = vpack.c.bf16 %v2781_v25, %v2777_v40  ;;  %v2801_v25 = vld [vmem:[#allocation7 + $0xb08] sm:$0xff] }
 0x351   : > { %5621 = vmatprep.subr.bf16.mxu0 %v5620_v37  ;;  %v2783_v37 = vld [vmem:[#allocation7 + $0xa78] sm:$0xff]  ;;  %v6014_v13 = vpack.c.bf16 %v2774_v10, %v2770_v14  ;;  %v2794_v10 = vld [vmem:[#allocation7 + $0xad0] sm:$0xff] }
 0x352   : > { %6003 = vmatpush1.bf16.msra.mxu1 %v6002_v9  ;;  %v2780_v9 = vld [vmem:[#allocation7 + $0xa60] sm:$0xff]  ;;  %v6016_v32 = vpack.c.bf16 %v2783_v37, %v2779_v50  ;;  %v2803_v37 = vld [vmem:[#allocation7 + $0xb18] sm:$0xff] }
 0x353   : > { %6005 = vmatprep.subr.bf16.mxu1 %v6004_v7  ;;  %v2789_v7 = vld [vmem:[#allocation7 + $0xaa8] sm:$0xff]  ;;  %v5634_v12 = vpack.c.bf16 %v2780_v9, %v2776_v42  ;;  %v2800_v9 = vld [vmem:[#allocation7 + $0xb00] sm:$0xff] }
 0x354   : > { %5623 = vmatpush1.bf16.msra.mxu0 %v5622_v61  ;;  %v2782_v61 = vld [vmem:[#allocation7 + $0xa70] sm:$0xff]  ;;  %v5636_v8 = vpack.c.bf16 %v2789_v7, %v2785_v49  ;;  %v2809_v7 = vld [vmem:[#allocation7 + $0xb48] sm:$0xff] }
 0x355   : > { %5625 = vmatprep.subr.bf16.mxu0 %v5624_v5  ;;  %v2791_v5 = vld [vmem:[#allocation7 + $0xab8] sm:$0xff]  ;;  %v6018_v59 = vpack.c.bf16 %v2782_v61, %v2778_v53  ;;  %v2802_v61 = vld [vmem:[#allocation7 + $0xb10] sm:$0xff] }
 0x356   : > { %6007 = vmatpush1.bf16.msra.mxu1 %v6006_v54  ;;  %v2788_v54 = vld [vmem:[#allocation7 + $0xaa0] sm:$0xff]  ;;  %v6020_v27 = vpack.c.bf16 %v2791_v5, %v2787_v39  ;;  %v2811_v5 = vld [vmem:[#allocation7 + $0xb58] sm:$0xff] }
 0x357   : > { %6009 = vmatprep.subr.bf16.mxu1 %v6008_v58  ;;  %v2797_v58 = vld [vmem:[#allocation7 + $0xae8] sm:$0xff]  ;;  %v5638_v22 = vpack.c.bf16 %v2788_v54, %v2784_v11  ;;  %v2808_v54 = vld [vmem:[#allocation7 + $0xb40] sm:$0xff] }
 0x358   : > { %5627 = vmatpush1.bf16.msra.mxu0 %v5626_v57  ;;  %v2790_v57 = vld [vmem:[#allocation7 + $0xab0] sm:$0xff]  ;;  %v5640_v31 = vpack.c.bf16 %v2797_v58, %v2793_v36  ;;  %v2817_v58 = vld [vmem:[#allocation7 + $0xb88] sm:$0xff] }
 0x359   : > { %5629 = vmatprep.subr.bf16.mxu0 %v5628_v55  ;;  %v2799_v55 = vld [vmem:[#allocation7 + $0xaf8] sm:$0xff]  ;;  %v6022_v40 = vpack.c.bf16 %v2790_v57, %v2786_v20  ;;  %v2810_v57 = vld [vmem:[#allocation7 + $0xb50] sm:$0xff] }
 0x35a   : > { %6011 = vmatpush1.bf16.msra.mxu1 %v6010_v0  ;;  %v2796_v0 = vld [vmem:[#allocation7 + $0xae0] sm:$0xff]  ;;  %v6024_v14 = vpack.c.bf16 %v2799_v55, %v2795_v63  ;;  %v2819_v55 = vld [vmem:[#allocation7 + $0xb98] sm:$0xff] }
 0x35b   : > { %6013 = vmatprep.subr.bf16.mxu1 %v6012_v62  ;;  %v2805_v62 = vld [vmem:[#allocation7 + $0xb28] sm:$0xff]  ;;  %v5642_v50 = vpack.c.bf16 %v2796_v0, %v2792_v23  ;;  %v2816_v0 = vld [vmem:[#allocation7 + $0xb80] sm:$0xff] }
 0x35c   : > { %5631 = vmatpush1.bf16.msra.mxu0 %v5630_v38  ;;  %v2798_v38 = vld [vmem:[#allocation7 + $0xaf0] sm:$0xff]  ;;  %v5644_v42 = vpack.c.bf16 %v2805_v62, %v2801_v25  ;;  %v2825_v62 = vld [vmem:[#allocation7 + $0xbc8] sm:$0xff] }
 0x35d   : > { %5633 = vmatprep.subr.bf16.mxu0 %v5632_v56  ;;  %v2807_v56 = vld [vmem:[#allocation7 + $0xb38] sm:$0xff]  ;;  %v6026_v49 = vpack.c.bf16 %v2798_v38, %v2794_v10  ;;  %v2818_v38 = vld [vmem:[#allocation7 + $0xb90] sm:$0xff] }
 0x35e   : > { %6015 = vmatpush1.bf16.msra.mxu1 %v6014_v13  ;;  %v2804_v13 = vld [vmem:[#allocation7 + $0xb20] sm:$0xff]  ;;  %v6028_v53 = vpack.c.bf16 %v2807_v56, %v2803_v37  ;;  %v2827_v56 = vld [vmem:[#allocation7 + $0xbd8] sm:$0xff] }
 0x35f   : > { %6017 = vmatprep.subr.bf16.mxu1 %v6016_v32  ;;  %v2813_v32 = vld [vmem:[#allocation7 + $0xb68] sm:$0xff]  ;;  %v5646_v39 = vpack.c.bf16 %v2804_v13, %v2800_v9  ;;  %v2824_v13 = vld [vmem:[#allocation7 + $0xbc0] sm:$0xff] }
 0x360   : > { %5635 = vmatpush1.bf16.msra.mxu0 %v5634_v12  ;;  %v2806_v12 = vld [vmem:[#allocation7 + $0xb30] sm:$0xff]  ;;  %v5648_v11 = vpack.c.bf16 %v2813_v32, %v2809_v7  ;;  %v2833_v32 = vld [vmem:[#allocation7 + $0xc08] sm:$0xff] }
 0x361   : > { %5637 = vmatprep.subr.bf16.mxu0 %v5636_v8  ;;  %v2815_v8 = vld [vmem:[#allocation7 + $0xb78] sm:$0xff]  ;;  %v6030_v36 = vpack.c.bf16 %v2806_v12, %v2802_v61  ;;  %v2826_v12 = vld [vmem:[#allocation7 + $0xbd0] sm:$0xff] }
 0x362   : > { %6019 = vmatpush1.bf16.msra.mxu1 %v6018_v59  ;;  %v2812_v59 = vld [vmem:[#allocation7 + $0xb60] sm:$0xff]  ;;  %v6032_v20 = vpack.c.bf16 %v2815_v8, %v2811_v5  ;;  %v2835_v8 = vld [vmem:[#allocation7 + $0xc18] sm:$0xff] }
 0x363   : > { %6021 = vmatprep.subr.bf16.mxu1 %v6020_v27  ;;  %v2821_v27 = vld [vmem:[#allocation7 + $0xba8] sm:$0xff]  ;;  %v5650_v63 = vpack.c.bf16 %v2812_v59, %v2808_v54  ;;  %v2832_v59 = vld [vmem:[#allocation7 + $0xc00] sm:$0xff] }
 0x364   : > { %5639 = vmatpush1.bf16.msra.mxu0 %v5638_v22  ;;  %v2814_v22 = vld [vmem:[#allocation7 + $0xb70] sm:$0xff]  ;;  %v5652_v23 = vpack.c.bf16 %v2821_v27, %v2817_v58  ;;  %v2841_v27 = vld [vmem:[#allocation7 + $0xc48] sm:$0xff] }
 0x365   : > { %5641 = vmatprep.subr.bf16.mxu0 %v5640_v31  ;;  %v2823_v31 = vld [vmem:[#allocation7 + $0xbb8] sm:$0xff]  ;;  %v6034_v25 = vpack.c.bf16 %v2814_v22, %v2810_v57  ;;  %v2834_v22 = vld [vmem:[#allocation7 + $0xc10] sm:$0xff] }
 0x366   : > { %6023 = vmatpush1.bf16.msra.mxu1 %v6022_v40  ;;  %v2820_v40 = vld [vmem:[#allocation7 + $0xba0] sm:$0xff]  ;;  %v6036_v10 = vpack.c.bf16 %v2823_v31, %v2819_v55  ;;  %v2843_v31 = vld [vmem:[#allocation7 + $0xc58] sm:$0xff] }
 0x367   : > { %6025 = vmatprep.subr.bf16.mxu1 %v6024_v14  ;;  %v2829_v14 = vld [vmem:[#allocation7 + $0xbe8] sm:$0xff]  ;;  %v5654_v37 = vpack.c.bf16 %v2820_v40, %v2816_v0  ;;  %v2840_v40 = vld [vmem:[#allocation7 + $0xc40] sm:$0xff] }
 0x368   : > { %5643 = vmatpush1.bf16.msra.mxu0 %v5642_v50  ;;  %v2822_v50 = vld [vmem:[#allocation7 + $0xbb0] sm:$0xff]  ;;  %v5656_v9 = vpack.c.bf16 %v2829_v14, %v2825_v62  ;;  %v2849_v14 = vld [vmem:[#allocation7 + $0xc88] sm:$0xff] }
 0x369   : > { %5645 = vmatprep.subr.bf16.mxu0 %v5644_v42  ;;  %v2831_v42 = vld [vmem:[#allocation7 + $0xbf8] sm:$0xff]  ;;  %v6038_v7 = vpack.c.bf16 %v2822_v50, %v2818_v38  ;;  %v2842_v50 = vld [vmem:[#allocation7 + $0xc50] sm:$0xff] }
 0x36a   : > { %6027 = vmatpush1.bf16.msra.mxu1 %v6026_v49  ;;  %v2828_v49 = vld [vmem:[#allocation7 + $0xbe0] sm:$0xff]  ;;  %v6040_v61 = vpack.c.bf16 %v2831_v42, %v2827_v56  ;;  %v2851_v42 = vld [vmem:[#allocation7 + $0xc98] sm:$0xff] }
 0x36b   : > { %6029 = vmatprep.subr.bf16.mxu1 %v6028_v53  ;;  %v2837_v53 = vld [vmem:[#allocation7 + $0xc28] sm:$0xff]  ;;  %v5658_v5 = vpack.c.bf16 %v2828_v49, %v2824_v13  ;;  %v2848_v49 = vld [vmem:[#allocation7 + $0xc80] sm:$0xff] }
 0x36c   : > { %5647 = vmatpush1.bf16.msra.mxu0 %v5646_v39  ;;  %v2830_v39 = vld [vmem:[#allocation7 + $0xbf0] sm:$0xff]  ;;  %v5660_v54 = vpack.c.bf16 %v2837_v53, %v2833_v32  ;;  %v2857_v53 = vld [vmem:[#allocation7 + $0xcc8] sm:$0xff] }
 0x36d   : > { %5649 = vmatprep.subr.bf16.mxu0 %v5648_v11  ;;  %v2839_v11 = vld [vmem:[#allocation7 + $0xc38] sm:$0xff]  ;;  %v6042_v58 = vpack.c.bf16 %v2830_v39, %v2826_v12  ;;  %v2850_v12 = vld [vmem:[#allocation7 + $0xc90] sm:$0xff] }
 0x36e   : > { %6031 = vmatpush1.bf16.msra.mxu1 %v6030_v36  ;;  %v2836_v36 = vld [vmem:[#allocation7 + $0xc20] sm:$0xff]  ;;  %v6044_v57 = vpack.c.bf16 %v2839_v11, %v2835_v8  ;;  %v2854_v39 = vld [vmem:[#allocation7 + $0xcb0] sm:$0xff]  ;;  %v2863_v8 = vld [vmem:[#allocation7 + $0xcf8] sm:$0xff] }
 0x36f   : > { %6033 = vmatprep.subr.bf16.mxu1 %v6032_v20  ;;  %v2845_v20 = vld [vmem:[#allocation7 + $0xc68] sm:$0xff]  ;;  %v5662_v55 = vpack.c.bf16 %v2836_v36, %v2832_v59  ;;  %v2860_v59 = vld [vmem:[#allocation7 + $0xce0] sm:$0xff]  ;;  %v6054_v36 = vpack.c.bf16 %v2854_v39, %v2850_v12 }
 0x370   : > { %5651 = vmatpush1.bf16.msra.mxu0 %v5650_v63  ;;  %v2838_v63 = vld [vmem:[#allocation7 + $0xc30] sm:$0xff]  ;;  %v5664_v0 = vpack.c.bf16 %v2845_v20, %v2841_v27  ;;  %v2869_v27 = vld [vmem:[#allocation7 + $0xd28] sm:$0xff] }
 0x371   : > { %5653 = vmatprep.subr.bf16.mxu0 %v5652_v23  ;;  %v2847_v23 = vld [vmem:[#allocation7 + $0xc78] sm:$0xff]  ;;  %v6046_v62 = vpack.c.bf16 %v2838_v63, %v2834_v22  ;;  %v2858_v20 = vld [vmem:[#allocation7 + $0xcd0] sm:$0xff]  ;;  %v2889_v39 = vld [vmem:[#allocation7 + $0xdc8] sm:$0xff] }
 0x372   : > { %6035 = vmatpush1.bf16.msra.mxu1 %v6034_v25  ;;  %v2844_v25 = vld [vmem:[#allocation7 + $0xc60] sm:$0xff]  ;;  %v6048_v38 = vpack.c.bf16 %v2847_v23, %v2843_v31  ;;  %v2867_v22 = vld [vmem:[#allocation7 + $0xd18] sm:$0xff] }
 0x373   : > { %6037 = vmatprep.subr.bf16.mxu1 %v6036_v10  ;;  %v2853_v10 = vld [vmem:[#allocation7 + $0xca8] sm:$0xff]  ;;  %v5666_v56 = vpack.c.bf16 %v2844_v25, %v2840_v40  ;;  %v2871_v63 = vld [vmem:[#allocation7 + $0xd38] sm:$0xff]  ;;  %v2864_v31 = vld [vmem:[#allocation7 + $0xd00] sm:$0xff] }
 0x374   : > { %5655 = vmatpush1.bf16.msra.mxu0 %v5654_v37  ;;  %v2846_v37 = vld [vmem:[#allocation7 + $0xc70] sm:$0xff]  ;;  %v5668_v13 = vpack.c.bf16 %v2853_v10, %v2849_v14  ;;  %v2868_v23 = vld [vmem:[#allocation7 + $0xd20] sm:$0xff]  ;;  %v2873_v40 = vld [vmem:[#allocation7 + $0xd48] sm:$0xff]  ;;  %v6060_v21 = vpack.c.bf16 %v2871_v63, %v2867_v22 }
 0x375   : > { %5657 = vmatprep.subr.bf16.mxu0 %v5656_v9  ;;  %v2855_v9 = vld [vmem:[#allocation7 + $0xcb8] sm:$0xff]  ;;  %v6050_v32 = vpack.c.bf16 %v2846_v37, %v2842_v50  ;;  %v2877_v25 = vld [vmem:[#allocation7 + $0xd68] sm:$0xff]  ;;  %v2870_v14 = vld [vmem:[#allocation7 + $0xd30] sm:$0xff]  ;;  %v5678_v45 = vpack.c.bf16 %v2868_v23, %v2864_v31 }
 0x376   : > { %6039 = vmatpush1.bf16.msra.mxu1 %v6038_v7  ;;  %v2852_v7 = vld [vmem:[#allocation7 + $0xca0] sm:$0xff]  ;;  %v6052_v46 = vpack.c.bf16 %v2855_v9, %v2851_v42  ;;  %v2879_v10 = vld [vmem:[#allocation7 + $0xd78] sm:$0xff]  ;;  %v2881_v42 = vld [vmem:[#allocation7 + $0xd88] sm:$0xff] }
 0x377   : > { %6041 = vmatprep.subr.bf16.mxu1 %v6040_v61  ;;  %v2861_v61 = vld [vmem:[#allocation7 + $0xce8] sm:$0xff]  ;;  %v5670_v6 = vpack.c.bf16 %v2852_v7, %v2848_v49  ;;  %v2872_v50 = vld [vmem:[#allocation7 + $0xd40] sm:$0xff]  ;;  %v2874_v49 = vld [vmem:[#allocation7 + $0xd50] sm:$0xff] }
 0x378   : > { %5659 = vmatpush1.bf16.msra.mxu0 %v5658_v5  ;;  %v2859_v5 = vld [vmem:[#allocation7 + $0xcd8] sm:$0xff]  ;;  %v5672_v11 = vpack.c.bf16 %v2861_v61, %v2857_v53  ;;  %v2876_v37 = vld [vmem:[#allocation7 + $0xd60] sm:$0xff]  ;;  %v2885_v9 = vld [vmem:[#allocation7 + $0xda8] sm:$0xff] }
 0x379   : > { %5661 = vmatprep.subr.bf16.mxu0 %v5660_v54  ;;  %v2856_v54 = vld [vmem:[#allocation7 + $0xcc0] sm:$0xff]  ;;  %v6056_v2 = vpack.c.bf16 %v2863_v8, %v2859_v5  ;;  %v2878_v7 = vld [vmem:[#allocation7 + $0xd70] sm:$0xff]  ;;  %v5684_v53 = vpack.c.bf16 %v2885_v9, %v2881_v42  ;;  %v2899_v31 = vld [vmem:[#allocation7 + $0xe18] sm:$0xff] }
 0x37a   : > { %6043 = vmatpush1.bf16.msra.mxu1 %v6042_v58  ;;  %v2865_v58 = vld [vmem:[#allocation7 + $0xd08] sm:$0xff]  ;;  %v5674_v30 = vpack.c.bf16 %v2860_v59, %v2856_v54  ;;  %v2880_v61 = vld [vmem:[#allocation7 + $0xd80] sm:$0xff]  ;;  %v6066_v12 = vpack.c.bf16 %v2878_v7, %v2874_v49  ;;  %v2882_v5 = vld [vmem:[#allocation7 + $0xd90] sm:$0xff] }
 0x37b   : > { %4611 = vmatmul.mubr.msk.f32.vlgmr.msra.gmra.mrb[8].mxu0 %vm2288_vm3, %v6754_v28  ;;  %6045 = vmatprep.subr.bf16.mxu1 %v6044_v57  ;;  %v2862_v57 = vld [vmem:[#allocation7 + $0xcf0] sm:$0xff]  ;;  %v2891_v54 = vld [vmem:[#allocation7 + $0xdd8] sm:$0xff]  ;;  %v2904_v42 = vld [vmem:[#allocation7 + $0xe40] sm:$0xff] }
 0x37c   : > { %4612 = vmatprep.mubr.msk.f32.mxu0 %vm2293_vm8, %v6754_v28  ;;  %5663 = vmatpush1.bf16.msra.mxu0 %v5662_v55  ;;  %v5676_v55 = vpack.c.bf16 %v2869_v27, %v2865_v58  ;;  %v2886_v8 = vld [vmem:[#allocation7 + $0xdb0] sm:$0xff]  ;;  %v2895_v59 = vld [vmem:[#allocation7 + $0xdf8] sm:$0xff]  ;;  %v2888_v58 = vld [vmem:[#allocation7 + $0xdc0] sm:$0xff] }
 0x37d   : > { %4651 = vmatmul.mubr.msk.f32.vlgmr.msra.gmra.mrb[8].mxu1 %vm2288_vm3, %v6754_v28  ;;  %5665 = vmatprep.subr.bf16.mxu0 %v5664_v0  ;;  %v6058_v0 = vpack.c.bf16 %v2862_v57, %v2858_v20  ;;  %vm8014_vm3 = vcmp.ge.f32.partialorder %v7346_v51, %v7231_v43  ;;  %v5682_v43 = vpack.c.bf16 %v2876_v37, %v2872_v50  ;;  %v2883_v51 = vld [vmem:[#allocation7 + $0xd98] sm:$0xff]  ;;  %v2892_v27 = vld [vmem:[#allocation7 + $0xde0] sm:$0xff]  ;;  %v2897_v20 = vld [vmem:[#allocation7 + $0xe08] sm:$0xff] }
 0x37e   : > { %4652 = vmatprep.mubr.msk.f32.mxu1 %vm2293_vm8, %v6754_v28  ;;  %6047 = vmatpush1.bf16.msra.mxu1 %v6046_v62  ;;  %v2866_v62 = vld [vmem:[#allocation7 + $0xd10] sm:$0xff]  ;;  %vm8015_vm5 = vmmov %vm8014_vm3  ;;  %v2901_v57 = vld [vmem:[#allocation7 + $0xe28] sm:$0xff] }
 0x37f   : > { %4613 = vmatmul.mubr.msk.f32.gmra.mrb[10].mxu0 %vm2292_vm6, %v6754_v28  ;;  %6049 = vmatprep.subr.bf16.mxu1 %v6048_v38  ;;  %v5680_v38 = vpack.c.bf16 %v2877_v25, %v2873_v40  ;;  %v2890_v22 = vld [vmem:[#allocation7 + $0xdd0] sm:$0xff]  ;;  %v2903_v23 = vld [vmem:[#allocation7 + $0xe38] sm:$0xff]  ;;  %v2896_v40 = vld [vmem:[#allocation7 + $0xe00] sm:$0xff] }
 0x380   : > { %4614 = vmatprep.mubr.msk.f32.mxu0 %vm2297_vm10, %v6754_v28  ;;  %5667 = vmatpush1.bf16.msra.mxu0 %v5666_v56  ;;  %v6062_v56 = vpack.c.bf16 %v2870_v14, %v2866_v62  ;;  %v2894_v63 = vld [vmem:[#allocation7 + $0xdf0] sm:$0xff]  ;;  %v2900_v25 = vld [vmem:[#allocation7 + $0xe20] sm:$0xff]  ;;  %v2905_v62 = vld [vmem:[#allocation7 + $0xe48] sm:$0xff] }
 0x381   : > { %4653 = vmatmul.mubr.msk.f32.gmra.mrb[10].mxu1 %vm2292_vm6, %v6754_v28  ;;  %5669 = vmatprep.subr.bf16.mxu0 %v5668_v13  ;;  %v6064_v13 = vpack.c.bf16 %v2879_v10, %v2875_v4  ;;  %v2909_v14 = vld [vmem:[#allocation7 + $0xe68] sm:$0xff]  ;;  %v2898_v4 = vld [vmem:[#allocation7 + $0xe10] sm:$0xff]  ;;  %v2907_v50 = vld [vmem:[#allocation7 + $0xe58] sm:$0xff]  ;;  %vm8016_vm6 = vcmp.ge.f32.partialorder %v7277_v33, %v7236_v44 }
 0x382   : > { %4654 = vmatprep.mubr.msk.f32.mxu1 %vm2297_vm10, %v6754_v28  ;;  %6051 = vmatpush1.bf16.msra.mxu1 %v6050_v32  ;;  %v2887_v32 = vld [vmem:[#allocation7 + $0xdb8] sm:$0xff]  ;;  %v2902_v10 = vld [vmem:[#allocation7 + $0xe30] sm:$0xff]  ;;  %v2908_v9 = vld [vmem:[#allocation7 + $0xe60] sm:$0xff] }
 0x383   : > { %4615 = vmatmul.mubr.msk.f32.gmra.mrb[12].mxu0 %vm2296_vm11, %v6754_v28  ;;  %6053 = vmatprep.subr.bf16.mxu1 %v6052_v46  ;;  %v2884_v46 = vld [vmem:[#allocation7 + $0xda0] sm:$0xff]  ;;  %v2911_v37 = vld [vmem:[#allocation7 + $0xe78] sm:$0xff]  ;;  %v2913_v49 = vld [vmem:[#allocation7 + $0xe88] sm:$0xff] }
 0x384   : > { %4616 = vmatprep.mubr.msk.f32.mxu0 %vm8012_vm0, %v6754_v28  ;;  %5671 = vmatpush1.bf16.msra.mxu0 %v5670_v6  ;;  %v6068_v6 = vpack.c.bf16 %v2887_v32, %v2883_v51  ;;  %v2917_v7 = vld [vmem:[#allocation7 + $0xea8] sm:$0xff]  ;;  %v2906_v51 = vld [vmem:[#allocation7 + $0xe50] sm:$0xff] }
 0x385   : > { %4655 = vmatmul.mubr.msk.f32.gmra.mrb[12].mxu1 %vm2296_vm11, %v6754_v28  ;;  %5673 = vmatprep.subr.bf16.mxu0 %v5672_v11  ;;  %v5686_v11 = vpack.c.bf16 %v2884_v46, %v2880_v61  ;;  %v2910_v32 = vld [vmem:[#allocation7 + $0xe70] sm:$0xff]  ;;  %v2915_v61 = vld [vmem:[#allocation7 + $0xe98] sm:$0xff] }
 0x386   : > { %4656 = vmatprep.mubr.msk.f32.mxu1 %vm8013_vm1, %v6754_v28  ;;  %6055 = vmatpush1.bf16.msra.mxu1 %v6054_v36  ;;  %v5688_v36 = vpack.c.bf16 %v2893_v60, %v2889_v39  ;;  %v2919_v46 = vld [vmem:[#allocation7 + $0xeb8] sm:$0xff]  ;;  %v2912_v39 = vld [vmem:[#allocation7 + $0xe80] sm:$0xff] }
 0x387   : > { %4617 = vmatmul.mubr.msk.f32.gmra.mrb[14].mxu0 %vm8014_vm3, %v6754_v28  ;;  %6057 = vmatprep.subr.bf16.mxu1 %v6056_v2  ;;  %v6070_v2 = vpack.c.bf16 %v2886_v8, %v2882_v5  ;;  %v2916_v60 = vld [vmem:[#allocation7 + $0xea0] sm:$0xff]  ;;  %v2921_v5 = vld [vmem:[#allocation7 + $0xec8] sm:$0xff] }
 0x388   : > { %5675 = vmatpush1.bf16.msra.mxu0 %v5674_v30  ;;  %4618 = vmatprep.mubr.msk.f32.mxu0 %vm2291_vm15, %v6754_v28  ;;  %v6072_v30 = vpack.c.bf16 %v2895_v59, %v2891_v54  ;;  %v2925_v8 = vld [vmem:[#allocation7 + $0xee8] sm:$0xff]  ;;  %v2914_v54 = vld [vmem:[#allocation7 + $0xe90] sm:$0xff] }
 0x389   : > { %4657 = vmatmul.mubr.msk.f32.gmra.mrb[14].mxu1 %vm8015_vm5, %v6754_v28  ;;  %5677 = vmatprep.subr.bf16.mxu0 %v5676_v55  ;;  %v5690_v55 = vpack.c.bf16 %v2892_v27, %v2888_v58  ;;  %v2918_v59 = vld [vmem:[#allocation7 + $0xeb0] sm:$0xff]  ;;  %v2923_v58 = vld [vmem:[#allocation7 + $0xed8] sm:$0xff] }
 0x38a   : > { %6059 = vmatpush1.bf16.msra.mxu1 %v6058_v0  ;;  %4658 = vmatprep.mubr.msk.f32.mxu1 %vm2291_vm15, %v6754_v28  ;;  %v5692_v0 = vpack.c.bf16 %v2901_v57, %v2897_v20  ;;  %v2927_v27 = vld [vmem:[#allocation7 + $0xef8] sm:$0xff]  ;;  %v2920_v20 = vld [vmem:[#allocation7 + $0xec0] sm:$0xff] }
 0x38b   : > { %6061 = vmatprep.subr.bf16.mxu1 %v6060_v21  ;;  %v6074_v21 = vpack.c.bf16 %v2894_v63, %v2890_v22  ;;  %v2924_v57 = vld [vmem:[#allocation7 + $0xee0] sm:$0xff]  ;;  %v2929_v22 = vld [vmem:[#allocation7 + $0xf08] sm:$0xff] }
 0x38c   : > { %5679 = vmatpush1.bf16.msra.mxu0 %v5678_v45  ;;  %v6076_v45 = vpack.c.bf16 %v2903_v23, %v2899_v31  ;;  %v2933_v63 = vld [vmem:[#allocation7 + $0xf28] sm:$0xff]  ;;  %v2922_v31 = vld [vmem:[#allocation7 + $0xed0] sm:$0xff] }
 0x38d   : > { %5681 = vmatprep.subr.bf16.mxu0 %v5680_v38  ;;  %v5694_v38 = vpack.c.bf16 %v2900_v25, %v2896_v40  ;;  %v2926_v23 = vld [vmem:[#allocation7 + $0xef0] sm:$0xff]  ;;  %v2931_v40 = vld [vmem:[#allocation7 + $0xf18] sm:$0xff] }
 0x38e   : > { %6063 = vmatpush1.bf16.msra.mxu1 %v6062_v56  ;;  %v5696_v56 = vpack.c.bf16 %v2909_v14, %v2905_v62  ;;  %v2935_v25 = vld [vmem:[#allocation7 + $0xf38] sm:$0xff]  ;;  %v2928_v62 = vld [vmem:[#allocation7 + $0xf00] sm:$0xff] }
 0x38f   : > { %6065 = vmatprep.subr.bf16.mxu1 %v6064_v13  ;;  %v6078_v13 = vpack.c.bf16 %v2902_v10, %v2898_v4  ;;  %v2932_v14 = vld [vmem:[#allocation7 + $0xf20] sm:$0xff]  ;;  %v2937_v4 = vld [vmem:[#allocation7 + $0xf48] sm:$0xff] }
 0x390   : > { %5683 = vmatpush1.bf16.msra.mxu0 %v5682_v43  ;;  %v6080_v43 = vpack.c.bf16 %v2911_v37, %v2907_v50  ;;  %v2941_v10 = vld [vmem:[#allocation7 + $0xf68] sm:$0xff]  ;;  %v2930_v50 = vld [vmem:[#allocation7 + $0xf10] sm:$0xff] }
 0x391   : > { %5685 = vmatprep.subr.bf16.mxu0 %v5684_v53  ;;  %v5698_v53 = vpack.c.bf16 %v2908_v9, %v2904_v42  ;;  %v2934_v37 = vld [vmem:[#allocation7 + $0xf30] sm:$0xff]  ;;  %v2939_v42 = vld [vmem:[#allocation7 + $0xf58] sm:$0xff] }
 0x392   : > { %6067 = vmatpush1.bf16.msra.mxu1 %v6066_v12  ;;  %v5700_v12 = vpack.c.bf16 %v2917_v7, %v2913_v49  ;;  %v2943_v9 = vld [vmem:[#allocation7 + $0xf78] sm:$0xff]  ;;  %v2936_v49 = vld [vmem:[#allocation7 + $0xf40] sm:$0xff] }
 0x393   : > { %6069 = vmatprep.subr.bf16.mxu1 %v6068_v6  ;;  %v6082_v6 = vpack.c.bf16 %v2910_v32, %v2906_v51  ;;  %v2940_v7 = vld [vmem:[#allocation7 + $0xf60] sm:$0xff]  ;;  %v2945_v51 = vld [vmem:[#allocation7 + $0xf88] sm:$0xff] }
 0x394   : > { %5687 = vmatpush1.bf16.msra.mxu0 %v5686_v11  ;;  %v6084_v11 = vpack.c.bf16 %v2919_v46, %v2915_v61  ;;  %v2949_v32 = vld [vmem:[#allocation7 + $0xfa8] sm:$0xff]  ;;  %v2938_v61 = vld [vmem:[#allocation7 + $0xf50] sm:$0xff] }
 0x395   : > { %5689 = vmatprep.subr.bf16.mxu0 %v5688_v36  ;;  %v5702_v36 = vpack.c.bf16 %v2916_v60, %v2912_v39  ;;  %v2942_v46 = vld [vmem:[#allocation7 + $0xf70] sm:$0xff]  ;;  %v2947_v39 = vld [vmem:[#allocation7 + $0xf98] sm:$0xff] }
 0x396   : > { %6071 = vmatpush1.bf16.msra.mxu1 %v6070_v2  ;;  %v5704_v2 = vpack.c.bf16 %v2925_v8, %v2921_v5  ;;  %v2951_v60 = vld [vmem:[#allocation7 + $0xfb8] sm:$0xff]  ;;  %v2944_v5 = vld [vmem:[#allocation7 + $0xf80] sm:$0xff] }
 0x397   : > { %6073 = vmatprep.subr.bf16.mxu1 %v6072_v30  ;;  %v6086_v30 = vpack.c.bf16 %v2918_v59, %v2914_v54  ;;  %v2948_v8 = vld [vmem:[#allocation7 + $0xfa0] sm:$0xff]  ;;  %v2953_v54 = vld [vmem:[#allocation7 + $0xfc8] sm:$0xff] }
 0x398   : > { %5691 = vmatpush1.bf16.msra.mxu0 %v5690_v55  ;;  %v6088_v55 = vpack.c.bf16 %v2927_v27, %v2923_v58  ;;  %v2957_v59 = vld [vmem:[#allocation7 + $0xfe8] sm:$0xff]  ;;  %v2946_v58 = vld [vmem:[#allocation7 + $0xf90] sm:$0xff] }
 0x399   : > { %5693 = vmatprep.subr.bf16.mxu0 %v5692_v0  ;;  %v5706_v0 = vpack.c.bf16 %v2924_v57, %v2920_v20  ;;  %v2950_v27 = vld [vmem:[#allocation7 + $0xfb0] sm:$0xff]  ;;  %v2955_v20 = vld [vmem:[#allocation7 + $0xfd8] sm:$0xff] }
 0x39a   : > { %6075 = vmatpush1.bf16.msra.mxu1 %v6074_v21  ;;  %v5708_v21 = vpack.c.bf16 %v2933_v63, %v2929_v22  ;;  %v2959_v57 = vld [vmem:[#allocation7 + $0xff8] sm:$0xff]  ;;  %v2952_v22 = vld [vmem:[#allocation7 + $0xfc0] sm:$0xff] }
 0x39b   : > { %6077 = vmatprep.subr.bf16.mxu1 %v6076_v45  ;;  %v6090_v45 = vpack.c.bf16 %v2926_v23, %v2922_v31  ;;  %v2956_v63 = vld [vmem:[#allocation7 + $0xfe0] sm:$0xff]  ;;  %v2961_v31 = vld [vmem:[#allocation7 + $0x1008] sm:$0xff] }
 0x39c   : > { %5695 = vmatpush1.bf16.msra.mxu0 %v5694_v38  ;;  %v6092_v38 = vpack.c.bf16 %v2935_v25, %v2931_v40  ;;  %v2965_v23 = vld [vmem:[#allocation7 + $0x1028] sm:$0xff]  ;;  %v2954_v40 = vld [vmem:[#allocation7 + $0xfd0] sm:$0xff] }
 0x39d   : > { %5697 = vmatprep.subr.bf16.mxu0 %v5696_v56  ;;  %v5710_v56 = vpack.c.bf16 %v2932_v14, %v2928_v62  ;;  %v2958_v25 = vld [vmem:[#allocation7 + $0xff0] sm:$0xff]  ;;  %v2963_v62 = vld [vmem:[#allocation7 + $0x1018] sm:$0xff] }
 0x39e   : > { %6079 = vmatpush1.bf16.msra.mxu1 %v6078_v13  ;;  %v5712_v13 = vpack.c.bf16 %v2941_v10, %v2937_v4  ;;  %v2967_v14 = vld [vmem:[#allocation7 + $0x1038] sm:$0xff]  ;;  %v2960_v4 = vld [vmem:[#allocation7 + $0x1000] sm:$0xff] }
 0x39f   : > { %6081 = vmatprep.subr.bf16.mxu1 %v6080_v43  ;;  %v6094_v43 = vpack.c.bf16 %v2934_v37, %v2930_v50  ;;  %v2964_v10 = vld [vmem:[#allocation7 + $0x1020] sm:$0xff]  ;;  %v2969_v50 = vld [vmem:[#allocation7 + $0x1048] sm:$0xff] }
 0x3a0   : > { %5699 = vmatpush1.bf16.msra.mxu0 %v5698_v53  ;;  %v6096_v53 = vpack.c.bf16 %v2943_v9, %v2939_v42  ;;  %v2973_v37 = vld [vmem:[#allocation7 + $0x1068] sm:$0xff]  ;;  %v2962_v42 = vld [vmem:[#allocation7 + $0x1010] sm:$0xff] }
 0x3a1   : > { %5701 = vmatprep.subr.bf16.mxu0 %v5700_v12  ;;  %v5714_v12 = vpack.c.bf16 %v2940_v7, %v2936_v49  ;;  %v2966_v9 = vld [vmem:[#allocation7 + $0x1030] sm:$0xff]  ;;  %v2971_v49 = vld [vmem:[#allocation7 + $0x1058] sm:$0xff] }
 0x3a2   : > { %6083 = vmatpush1.bf16.msra.mxu1 %v6082_v6  ;;  %v5716_v6 = vpack.c.bf16 %v2949_v32, %v2945_v51  ;;  %v2975_v7 = vld [vmem:[#allocation7 + $0x1078] sm:$0xff]  ;;  %v2968_v51 = vld [vmem:[#allocation7 + $0x1040] sm:$0xff] }
 0x3a3   : > { %6085 = vmatprep.subr.bf16.mxu1 %v6084_v11  ;;  %v6098_v11 = vpack.c.bf16 %v2942_v46, %v2938_v61  ;;  %v2972_v32 = vld [vmem:[#allocation7 + $0x1060] sm:$0xff]  ;;  %v2977_v61 = vld [vmem:[#allocation7 + $0x1088] sm:$0xff] }
 0x3a4   : > { %5703 = vmatpush1.bf16.msra.mxu0 %v5702_v36  ;;  %v6100_v36 = vpack.c.bf16 %v2951_v60, %v2947_v39  ;;  %v2981_v46 = vld [vmem:[#allocation7 + $0x10a8] sm:$0xff]  ;;  %v2970_v39 = vld [vmem:[#allocation7 + $0x1050] sm:$0xff] }
 0x3a5   : > { %5705 = vmatprep.subr.bf16.mxu0 %v5704_v2  ;;  %v5718_v2 = vpack.c.bf16 %v2948_v8, %v2944_v5  ;;  %v2974_v60 = vld [vmem:[#allocation7 + $0x1070] sm:$0xff]  ;;  %v2979_v5 = vld [vmem:[#allocation7 + $0x1098] sm:$0xff] }
 0x3a6   : > { %6087 = vmatpush1.bf16.msra.mxu1 %v6086_v30  ;;  %v5720_v30 = vpack.c.bf16 %v2957_v59, %v2953_v54  ;;  %v2983_v8 = vld [vmem:[#allocation7 + $0x10b8] sm:$0xff]  ;;  %v2976_v54 = vld [vmem:[#allocation7 + $0x1080] sm:$0xff] }
 0x3a7   : > { %6089 = vmatprep.subr.bf16.mxu1 %v6088_v55  ;;  %v6102_v55 = vpack.c.bf16 %v2950_v27, %v2946_v58  ;;  %v2980_v59 = vld [vmem:[#allocation7 + $0x10a0] sm:$0xff]  ;;  %v2985_v58 = vld [vmem:[#allocation7 + $0x10c8] sm:$0xff]  ;;  %v6116_v48 = vpack.c.bf16 %v2983_v8, %v2979_v5  ;;  %v3010_v8 = vld [vmem:[#allocation7 + $0x1190] sm:$0xff] }
 0x3a8   : > { %5707 = vmatpush1.bf16.msra.mxu0 %v5706_v0  ;;  %v6104_v0 = vpack.c.bf16 %v2959_v57, %v2955_v20  ;;  %v2989_v27 = vld [vmem:[#allocation7 + $0x10e8] sm:$0xff]  ;;  %v2982_v20 = vld [vmem:[#allocation7 + $0x10b0] sm:$0xff]  ;;  %v5734_v16 = vpack.c.bf16 %v2980_v59, %v2976_v54  ;;  %v2987_v57 = vld [vmem:[#allocation7 + $0x10d8] sm:$0xff] }
 0x3a9   : > { %5709 = vmatprep.subr.bf16.mxu0 %v5708_v21  ;;  %v5722_v21 = vpack.c.bf16 %v2956_v63, %v2952_v22  ;;  %v5736_v22 = vpack.c.bf16 %v2989_v27, %v2985_v58  ;;  %v2984_v63 = vld [vmem:[#allocation7 + $0x10c0] sm:$0xff]  ;;  %v3021_v5 = vld [vmem:[#allocation7 + $0x11e8] sm:$0xff]  ;;  %v3019_v59 = vld [vmem:[#allocation7 + $0x11d8] sm:$0xff] }
 0x3aa   : > { %6091 = vmatpush1.bf16.msra.mxu1 %v6090_v45  ;;  %v5724_v45 = vpack.c.bf16 %v2965_v23, %v2961_v31  ;;  %v2993_v23 = vld [vmem:[#allocation7 + $0x1108] sm:$0xff]  ;;  %v3016_v27 = vld [vmem:[#allocation7 + $0x11c0] sm:$0xff] }
 0x3ab   : > { %6093 = vmatprep.subr.bf16.mxu1 %v6092_v38  ;;  %v6106_v38 = vpack.c.bf16 %v2958_v25, %v2954_v40  ;;  %v2986_v40 = vld [vmem:[#allocation7 + $0x10d0] sm:$0xff] }
 0x3ac   : > { %5711 = vmatpush1.bf16.msra.mxu0 %v5710_v56  ;;  %v6108_v56 = vpack.c.bf16 %v2967_v14, %v2963_v62  ;;  %v2990_v25 = vld [vmem:[#allocation7 + $0x10f0] sm:$0xff]  ;;  %v2999_v62 = vld [vmem:[#allocation7 + $0x1138] sm:$0xff] }
 0x3ad   : > { %5713 = vmatprep.subr.bf16.mxu0 %v5712_v13  ;;  %v5726_v13 = vpack.c.bf16 %v2964_v10, %v2960_v4  ;;  %v2996_v4 = vld [vmem:[#allocation7 + $0x1120] sm:$0xff]  ;;  %v6122_v10 = vpack.c.bf16 %v2990_v25, %v2986_v40  ;;  %v3033_v25 = vld [vmem:[#allocation7 + $0x1248] sm:$0xff] }
 0x3ae   : > { %6095 = vmatpush1.bf16.msra.mxu1 %v6094_v43  ;;  %v5728_v43 = vpack.c.bf16 %v2973_v37, %v2969_v50  ;;  %v3005_v50 = vld [vmem:[#allocation7 + $0x1168] sm:$0xff]  ;;  %v2994_v37 = vld [vmem:[#allocation7 + $0x1110] sm:$0xff] }
 0x3af   : > { %6097 = vmatprep.subr.bf16.mxu1 %v6096_v53  ;;  %v6110_v53 = vpack.c.bf16 %v2966_v9, %v2962_v42  ;;  %v3003_v9 = vld [vmem:[#allocation7 + $0x1158] sm:$0xff] }
 0x3b0   : > { %5715 = vmatpush1.bf16.msra.mxu0 %v5714_v12  ;;  %v6112_v12 = vpack.c.bf16 %v2975_v7, %v2971_v49  ;;  %v3004_v49 = vld [vmem:[#allocation7 + $0x1160] sm:$0xff] }
 0x3b1   : > { %5717 = vmatprep.subr.bf16.mxu0 %v5716_v6  ;;  %v5730_v6 = vpack.c.bf16 %v2972_v32, %v2968_v51  ;;  %v3013_v51 = vld [vmem:[#allocation7 + $0x11a8] sm:$0xff]  ;;  %v6128_v32 = vpack.c.bf16 %v3007_v24, %v3003_v9  ;;  %v3034_v24 = vld [vmem:[#allocation7 + $0x1250] sm:$0xff] }
 0x3b2   : > { %6099 = vmatpush1.bf16.msra.mxu1 %v6098_v11  ;;  %v5732_v11 = vpack.c.bf16 %v2981_v46, %v2977_v61  ;;  %v3006_v61 = vld [vmem:[#allocation7 + $0x1170] sm:$0xff] }
 0x3b3   : > { %6101 = vmatprep.subr.bf16.mxu1 %v6100_v36  ;;  %v6114_v36 = vpack.c.bf16 %v2974_v60, %v2970_v39  ;;  %v3015_v39 = vld [vmem:[#allocation7 + $0x11b8] sm:$0xff] }
 0x3b4   : > { %5719 = vmatpush1.bf16.msra.mxu0 %v5718_v2  ;;  %v2978_v2 = vld [vmem:[#allocation7 + $0x1090] sm:$0xff] }
 0x3b5   : > { %5721 = vmatprep.subr.bf16.mxu0 %v5720_v30  ;;  %v2991_v30 = vld [vmem:[#allocation7 + $0x10f8] sm:$0xff]  ;;  %v6118_v31 = vpack.c.bf16 %v2982_v20, %v2978_v2  ;;  %v3025_v20 = vld [vmem:[#allocation7 + $0x1208] sm:$0xff] }
 0x3b6   : > { %6103 = vmatpush1.bf16.msra.mxu1 %v6102_v55  ;;  %v2988_v55 = vld [vmem:[#allocation7 + $0x10e0] sm:$0xff]  ;;  %v6120_v33 = vpack.c.bf16 %v2991_v30, %v2987_v57  ;;  %v3018_v30 = vld [vmem:[#allocation7 + $0x11d0] sm:$0xff] }
 0x3b7   : > { %6105 = vmatprep.subr.bf16.mxu1 %v6104_v0  ;;  %v2997_v0 = vld [vmem:[#allocation7 + $0x1128] sm:$0xff]  ;;  %v5738_v35 = vpack.c.bf16 %v2988_v55, %v2984_v63  ;;  %v3027_v55 = vld [vmem:[#allocation7 + $0x1218] sm:$0xff] }
 0x3b8   : > { %5723 = vmatpush1.bf16.msra.mxu0 %v5722_v21  ;;  %v2995_v21 = vld [vmem:[#allocation7 + $0x1118] sm:$0xff]  ;;  %v5740_v14 = vpack.c.bf16 %v2997_v0, %v2993_v23  ;;  %v3024_v0 = vld [vmem:[#allocation7 + $0x1200] sm:$0xff] }
 0x3b9   : > { %5725 = vmatprep.subr.bf16.mxu0 %v5724_v45  ;;  %v2992_v45 = vld [vmem:[#allocation7 + $0x1100] sm:$0xff]  ;;  %v6124_v29 = vpack.c.bf16 %v2999_v62, %v2995_v21  ;;  %v3026_v62 = vld [vmem:[#allocation7 + $0x1210] sm:$0xff] }
 0x3ba   : > { %6107 = vmatpush1.bf16.msra.mxu1 %v6106_v38  ;;  %v3001_v38 = vld [vmem:[#allocation7 + $0x1148] sm:$0xff]  ;;  %v5742_v42 = vpack.c.bf16 %v2996_v4, %v2992_v45  ;;  %v3035_v4 = vld [vmem:[#allocation7 + $0x1258] sm:$0xff] }
 0x3bb   : > { %4619 = vmatmul.mubr.msk.f32.vlgmr.msra.gmra.mrb[8].mxu0 %vm2290_vm4, %v6754_v28  ;;  %6109 = vmatprep.subr.bf16.mxu1 %v6108_v56  ;;  %v2998_v56 = vld [vmem:[#allocation7 + $0x1130] sm:$0xff]  ;;  %v5744_v1 = vpack.c.bf16 %v3005_v50, %v3001_v38  ;;  %v3032_v50 = vld [vmem:[#allocation7 + $0x1240] sm:$0xff] }
 0x3bc   : > { %4620 = vmatprep.mubr.msk.f32.mxu0 %vm2295_vm12, %v6754_v28  ;;  %5727 = vmatpush1.bf16.msra.mxu0 %v5726_v13  ;;  %v3000_v13 = vld [vmem:[#allocation7 + $0x1140] sm:$0xff]  ;;  %v6126_v7 = vpack.c.bf16 %v2998_v56, %v2994_v37  ;;  %v3041_v56 = vld [vmem:[#allocation7 + $0x1288] sm:$0xff] }
 0x3bd   : > { %4659 = vmatmul.mubr.msk.f32.vlgmr.msra.gmra.mrb[8].mxu1 %vm2290_vm4, %v6754_v28  ;;  %5729 = vmatprep.subr.bf16.mxu0 %v5728_v43  ;;  %vm8017_vm4 = vmmov %vm8016_vm6  ;;  %v3009_v43 = vld [vmem:[#allocation7 + $0x1188] sm:$0xff]  ;;  %v5746_v46 = vpack.c.bf16 %v3004_v49, %v3000_v13  ;;  %v3043_v49 = vld [vmem:[#allocation7 + $0x1298] sm:$0xff] }
 0x3be   : > { %4660 = vmatprep.mubr.msk.f32.mxu1 %vm2295_vm12, %v6754_v28  ;;  %6111 = vmatpush1.bf16.msra.mxu1 %v6110_v53  ;;  %v3002_v53 = vld [vmem:[#allocation7 + $0x1150] sm:$0xff]  ;;  %v5748_v44 = vpack.c.bf16 %v3013_v51, %v3009_v43  ;;  %v3040_v51 = vld [vmem:[#allocation7 + $0x1280] sm:$0xff] }
 0x3bf   : > { %4621 = vmatmul.mubr.msk.f32.gmra.mrb[10].mxu0 %vm8016_vm6, %v6754_v28  ;;  %6113 = vmatprep.subr.bf16.mxu1 %v6112_v12  ;;  %v3011_v12 = vld [vmem:[#allocation7 + $0x1198] sm:$0xff]  ;;  %v6130_v60 = vpack.c.bf16 %v3006_v61, %v3002_v53  ;;  %v3049_v61 = vld [vmem:[#allocation7 + $0x12c8] sm:$0xff] }
 0x3c0   : > { %4622 = vmatprep.mubr.msk.f32.mxu0 %vm2299_vm7, %v6754_v28  ;;  %5731 = vmatpush1.bf16.msra.mxu0 %v5730_v6  ;;  %v3017_v6 = vld [vmem:[#allocation7 + $0x11c8] sm:$0xff] }
 0x3c1   : > { %4661 = vmatmul.mubr.msk.f32.gmra.mrb[10].mxu1 %vm8017_vm4, %v6754_v28  ;;  %5733 = vmatprep.subr.bf16.mxu0 %v5732_v11  ;;  %v3014_v11 = vld [vmem:[#allocation7 + $0x11b0] sm:$0xff]  ;;  %v5752_v58 = vpack.c.bf16 %v3021_v5, %v3017_v6  ;;  %v3048_v5 = vld [vmem:[#allocation7 + $0x12c0] sm:$0xff] }
 0x3c2   : > { %4662 = vmatprep.mubr.msk.f32.mxu1 %vm2299_vm7, %v6754_v28  ;;  %6115 = vmatpush1.bf16.msra.mxu1 %v6114_v36  ;;  %v3023_v36 = vld [vmem:[#allocation7 + $0x11f8] sm:$0xff]  ;;  %v6134_v2 = vpack.c.bf16 %v3014_v11, %v3010_v8  ;;  %v3057_v11 = vld [vmem:[#allocation7 + $0x1308] sm:$0xff] }
 0x3c3   : > { %4623 = vmatmul.mubr.msk.f32.gmra.mrb[12].mxu0 %vm2298_vm9, %v6754_v28  ;;  %6117 = vmatprep.subr.bf16.mxu1 %v6116_v48  ;;  %v3020_v48 = vld [vmem:[#allocation7 + $0x11e0] sm:$0xff]  ;;  %v6136_v57 = vpack.c.bf16 %v3023_v36, %v3019_v59  ;;  %v3050_v36 = vld [vmem:[#allocation7 + $0x12d0] sm:$0xff] }
 0x3c4   : > { %4624 = vmatprep.mubr.msk.f32.mxu0 %vm2303_vm14, %v6754_v28  ;;  %5735 = vmatpush1.bf16.msra.mxu0 %v5734_v16  ;;  %v3029_v16 = vld [vmem:[#allocation7 + $0x1228] sm:$0xff]  ;;  %v5754_v63 = vpack.c.bf16 %v3020_v48, %v3016_v27  ;;  %v3059_v48 = vld [vmem:[#allocation7 + $0x1318] sm:$0xff] }
 0x3c5   : > { %4663 = vmatmul.mubr.msk.f32.gmra.mrb[12].mxu1 %vm2298_vm9, %v6754_v28  ;;  %5737 = vmatprep.subr.bf16.mxu0 %v5736_v22  ;;  %v3022_v22 = vld [vmem:[#allocation7 + $0x11f0] sm:$0xff]  ;;  %v5756_v23 = vpack.c.bf16 %v3029_v16, %v3025_v20  ;;  %v3056_v16 = vld [vmem:[#allocation7 + $0x1300] sm:$0xff] }
 0x3c6   : > { %4664 = vmatprep.mubr.msk.f32.mxu1 %vm2303_vm14, %v6754_v28  ;;  %6119 = vmatpush1.bf16.msra.mxu1 %v6118_v31  ;;  %v3031_v31 = vld [vmem:[#allocation7 + $0x1238] sm:$0xff]  ;;  %v6138_v40 = vpack.c.bf16 %v3022_v22, %v3018_v30  ;;  %v3065_v22 = vld [vmem:[#allocation7 + $0x1348] sm:$0xff] }
 0x3c7   : > { %4625 = vmatmul.mubr.msk.f32.gmra.mrb[14].mxu0 %vm2302_vm13, %v6754_v28  ;;  %6121 = vmatprep.subr.bf16.mxu1 %v6120_v33  ;;  %v3028_v33 = vld [vmem:[#allocation7 + $0x1220] sm:$0xff]  ;;  %v6140_v21 = vpack.c.bf16 %v3031_v31, %v3027_v55  ;;  %v3058_v31 = vld [vmem:[#allocation7 + $0x1310] sm:$0xff] }
 0x3c8   : > { %5739 = vmatpush1.bf16.msra.mxu0 %v5738_v35  ;;  %3636 = vmatprep.mubr.f32.mxu0 %v7586_v52  ;;  %v3037_v35 = vld [vmem:[#allocation7 + $0x1268] sm:$0xff]  ;;  %v5758_v45 = vpack.c.bf16 %v3028_v33, %v3024_v0  ;;  %v3067_v33 = vld [vmem:[#allocation7 + $0x1358] sm:$0xff] }
 0x3c9   : > { %4665 = vmatmul.mubr.msk.f32.gmra.mrb[14].mxu1 %vm2302_vm13, %v6754_v28  ;;  %5741 = vmatprep.subr.bf16.mxu0 %v5740_v14  ;;  %v3012_v28 = vld [vmem:[#allocation7 + $0x11a0] sm:$0xff]  ;;  %v3030_v14 = vld [vmem:[#allocation7 + $0x1230] sm:$0xff]  ;;  %v5760_v38 = vpack.c.bf16 %v3037_v35, %v3033_v25 }
 0x3ca   : > { %6123 = vmatpush1.bf16.msra.mxu1 %v6122_v10  ;;  %4170 = vmatprep.mubr.f32.mxu1 %v7586_v52  ;;  %v6132_v52 = vpack.c.bf16 %v3015_v39, %v3011_v12  ;;  %v5750_v54 = vpack.c.bf16 %v3012_v28, %v3008_v3  ;;  %v3039_v10 = vld [vmem:[#allocation7 + $0x1278] sm:$0xff]  ;;  %v6142_v37 = vpack.c.bf16 %v3030_v14, %v3026_v62  ;;  %v3042_v39 = vld [vmem:[#allocation7 + $0x1290] sm:$0xff]  ;;  %v3064_v35 = vld [vmem:[#allocation7 + $0x1340] sm:$0xff] }
 0x3cb   : > { %6125 = vmatprep.subr.bf16.mxu1 %v6124_v29  ;;  %v3036_v29 = vld [vmem:[#allocation7 + $0x1260] sm:$0xff]  ;;  %v6144_v9 = vpack.c.bf16 %v3039_v10, %v3035_v4  ;;  %v3051_v28 = vld [vmem:[#allocation7 + $0x12d8] sm:$0xff]  ;;  %v3073_v14 = vld [vmem:[#allocation7 + $0x1388] sm:$0xff] }
 0x3cc   : > { %5743 = vmatpush1.bf16.msra.mxu0 %v5742_v42  ;;  %v3045_v42 = vld [vmem:[#allocation7 + $0x12a8] sm:$0xff]  ;;  %v5762_v13 = vpack.c.bf16 %v3036_v29, %v3032_v50  ;;  %v3066_v10 = vld [vmem:[#allocation7 + $0x1350] sm:$0xff]  ;;  %v3075_v29 = vld [vmem:[#allocation7 + $0x1398] sm:$0xff] }
 0x3cd   : > { %5745 = vmatprep.subr.bf16.mxu0 %v5744_v1  ;;  %v3038_v1 = vld [vmem:[#allocation7 + $0x1270] sm:$0xff]  ;;  %v5764_v43 = vpack.c.bf16 %v3045_v42, %v3041_v56  ;;  %v3072_v42 = vld [vmem:[#allocation7 + $0x1380] sm:$0xff] }
 0x3ce   : > { %6127 = vmatpush1.bf16.msra.mxu1 %v6126_v7  ;;  %v3047_v7 = vld [vmem:[#allocation7 + $0x12b8] sm:$0xff]  ;;  %v6146_v53 = vpack.c.bf16 %v3038_v1, %v3034_v24  ;;  %v3081_v1 = vld [vmem:[#allocation7 + $0x13c8] sm:$0xff] }
 0x3cf   : > { %6129 = vmatprep.subr.bf16.mxu1 %v6128_v32  ;;  %v3044_v32 = vld [vmem:[#allocation7 + $0x12a0] sm:$0xff]  ;;  %v6148_v12 = vpack.c.bf16 %v3047_v7, %v3043_v49  ;;  %v3074_v7 = vld [vmem:[#allocation7 + $0x1390] sm:$0xff] }
 0x3d0   : > { %5747 = vmatpush1.bf16.msra.mxu0 %v5746_v46  ;;  %v3053_v46 = vld [vmem:[#allocation7 + $0x12e8] sm:$0xff]  ;;  %v5766_v3 = vpack.c.bf16 %v3044_v32, %v3040_v51  ;;  %v3083_v32 = vld [vmem:[#allocation7 + $0x13d8] sm:$0xff] }
 0x3d1   : > { %5749 = vmatprep.subr.bf16.mxu0 %v5748_v44  ;;  %v3046_v44 = vld [vmem:[#allocation7 + $0x12b0] sm:$0xff]  ;;  %v5768_v6 = vpack.c.bf16 %v3053_v46, %v3049_v61  ;;  %v3080_v46 = vld [vmem:[#allocation7 + $0x13c0] sm:$0xff] }
 0x3d2   : > { %6131 = vmatpush1.bf16.msra.mxu1 %v6130_v60  ;;  %v3055_v60 = vld [vmem:[#allocation7 + $0x12f8] sm:$0xff]  ;;  %v6150_v8 = vpack.c.bf16 %v3046_v44, %v3042_v39  ;;  %v3089_v44 = vld [vmem:[#allocation7 + $0x1408] sm:$0xff] }
 0x3d3   : > { %6133 = vmatprep.subr.bf16.mxu1 %v6132_v52  ;;  %v3052_v52 = vld [vmem:[#allocation7 + $0x12e0] sm:$0xff]  ;;  %v6152_v59 = vpack.c.bf16 %v3055_v60, %v3051_v28  ;;  %v3082_v60 = vld [vmem:[#allocation7 + $0x13d0] sm:$0xff] }
 0x3d4   : > { %5751 = vmatpush1.bf16.msra.mxu0 %v5750_v54  ;;  %v3061_v54 = vld [vmem:[#allocation7 + $0x1328] sm:$0xff]  ;;  %v5770_v27 = vpack.c.bf16 %v3052_v52, %v3048_v5  ;;  %v3091_v52 = vld [vmem:[#allocation7 + $0x1418] sm:$0xff] }
 0x3d5   : > { %5753 = vmatprep.subr.bf16.mxu0 %v5752_v58  ;;  %v3054_v58 = vld [vmem:[#allocation7 + $0x12f0] sm:$0xff]  ;;  %v5772_v20 = vpack.c.bf16 %v3061_v54, %v3057_v11  ;;  %v3088_v54 = vld [vmem:[#allocation7 + $0x1400] sm:$0xff] }
 0x3d6   : > { %6135 = vmatpush1.bf16.msra.mxu1 %v6134_v2  ;;  %v3063_v2 = vld [vmem:[#allocation7 + $0x1338] sm:$0xff]  ;;  %v6154_v30 = vpack.c.bf16 %v3054_v58, %v3050_v36  ;;  %v3097_v58 = vld [vmem:[#allocation7 + $0x1448] sm:$0xff] }
 0x3d7   : > { %6137 = vmatprep.subr.bf16.mxu1 %v6136_v57  ;;  %v3060_v57 = vld [vmem:[#allocation7 + $0x1320] sm:$0xff]  ;;  %v6156_v55 = vpack.c.bf16 %v3063_v2, %v3059_v48  ;;  %v3090_v2 = vld [vmem:[#allocation7 + $0x1410] sm:$0xff] }
 0x3d8   : > { %5755 = vmatpush1.bf16.msra.mxu0 %v5754_v63  ;;  %v3069_v63 = vld [vmem:[#allocation7 + $0x1368] sm:$0xff]  ;;  %v5774_v0 = vpack.c.bf16 %v3060_v57, %v3056_v16  ;;  %v3099_v57 = vld [vmem:[#allocation7 + $0x1458] sm:$0xff] }
 0x3d9   : > { %5757 = vmatprep.subr.bf16.mxu0 %v5756_v23  ;;  %v3062_v23 = vld [vmem:[#allocation7 + $0x1330] sm:$0xff]  ;;  %v5776_v25 = vpack.c.bf16 %v3069_v63, %v3065_v22  ;;  %v3096_v63 = vld [vmem:[#allocation7 + $0x1440] sm:$0xff] }
 0x3da   : > { %6139 = vmatpush1.bf16.msra.mxu1 %v6138_v40  ;;  %v3071_v40 = vld [vmem:[#allocation7 + $0x1378] sm:$0xff]  ;;  %v6158_v62 = vpack.c.bf16 %v3062_v23, %v3058_v31  ;;  %v3105_v23 = vld [vmem:[#allocation7 + $0x1488] sm:$0xff] }
 0x3db   : > { %6141 = vmatprep.subr.bf16.mxu1 %v6140_v21  ;;  %v3068_v21 = vld [vmem:[#allocation7 + $0x1360] sm:$0xff]  ;;  %v6160_v4 = vpack.c.bf16 %v3071_v40, %v3067_v33  ;;  %v3098_v40 = vld [vmem:[#allocation7 + $0x1450] sm:$0xff] }
 0x3dc   : > { %5759 = vmatpush1.bf16.msra.mxu0 %v5758_v45  ;;  %v3077_v45 = vld [vmem:[#allocation7 + $0x13a8] sm:$0xff]  ;;  %v5778_v50 = vpack.c.bf16 %v3068_v21, %v3064_v35  ;;  %v3107_v21 = vld [vmem:[#allocation7 + $0x1498] sm:$0xff] }
 0x3dd   : > { %5761 = vmatprep.subr.bf16.mxu0 %v5760_v38  ;;  %v3070_v38 = vld [vmem:[#allocation7 + $0x1370] sm:$0xff]  ;;  %v5780_v56 = vpack.c.bf16 %v3077_v45, %v3073_v14  ;;  %v3104_v45 = vld [vmem:[#allocation7 + $0x1480] sm:$0xff] }
 0x3de   : > { %6143 = vmatpush1.bf16.msra.mxu1 %v6142_v37  ;;  %v3079_v37 = vld [vmem:[#allocation7 + $0x13b8] sm:$0xff]  ;;  %v6162_v24 = vpack.c.bf16 %v3070_v38, %v3066_v10  ;;  %v3113_v38 = vld [vmem:[#allocation7 + $0x14c8] sm:$0xff] }
 0x3df   : > { %6145 = vmatprep.subr.bf16.mxu1 %v6144_v9  ;;  %v3076_v9 = vld [vmem:[#allocation7 + $0x13a0] sm:$0xff]  ;;  %v6164_v49 = vpack.c.bf16 %v3079_v37, %v3075_v29  ;;  %v3106_v37 = vld [vmem:[#allocation7 + $0x1490] sm:$0xff] }
 0x3e0   : > { %5763 = vmatpush1.bf16.msra.mxu0 %v5762_v13  ;;  %v3085_v13 = vld [vmem:[#allocation7 + $0x13e8] sm:$0xff]  ;;  %v5782_v51 = vpack.c.bf16 %v3076_v9, %v3072_v42  ;;  %v3115_v42 = vld [vmem:[#allocation7 + $0x14d8] sm:$0xff] }
 0x3e1   : > { %5765 = vmatprep.subr.bf16.mxu0 %v5764_v43  ;;  %v3078_v43 = vld [vmem:[#allocation7 + $0x13b0] sm:$0xff]  ;;  %v5784_v61 = vpack.c.bf16 %v3085_v13, %v3081_v1  ;;  %v3119_v9 = vld [vmem:[#allocation7 + $0x14f8] sm:$0xff]  ;;  %v3116_v1 = vld [vmem:[#allocation7 + $0x14e0] sm:$0xff] }
 0x3e2   : > { %6147 = vmatpush1.bf16.msra.mxu1 %v6146_v53  ;;  %v3087_v53 = vld [vmem:[#allocation7 + $0x13f8] sm:$0xff]  ;;  %v6166_v39 = vpack.c.bf16 %v3078_v43, %v3074_v7  ;;  %v3125_v7 = vld [vmem:[#allocation7 + $0x1528] sm:$0xff]  ;;  %v6184_v43 = vpack.c.bf16 %v3119_v9, %v3115_v42 }
 0x3e3   : > { %6149 = vmatprep.subr.bf16.mxu1 %v6148_v12  ;;  %v3084_v12 = vld [vmem:[#allocation7 + $0x13e0] sm:$0xff]  ;;  %v6168_v28 = vpack.c.bf16 %v3087_v53, %v3083_v32  ;;  %v3118_v32 = vld [vmem:[#allocation7 + $0x14f0] sm:$0xff]  ;;  %v3123_v53 = vld [vmem:[#allocation7 + $0x1518] sm:$0xff] }
 0x3e4   : > { %5767 = vmatpush1.bf16.msra.mxu0 %v5766_v3  ;;  %v3093_v3 = vld [vmem:[#allocation7 + $0x1428] sm:$0xff]  ;;  %v5786_v5 = vpack.c.bf16 %v3084_v12, %v3080_v46  ;;  %v3120_v46 = vld [vmem:[#allocation7 + $0x1500] sm:$0xff]  ;;  %v3155_v42 = vld [vmem:[#allocation7 + $0x1618] sm:$0xff] }
 0x3e5   : > { %5769 = vmatprep.subr.bf16.mxu0 %v5768_v6  ;;  %v3086_v6 = vld [vmem:[#allocation7 + $0x13f0] sm:$0xff]  ;;  %v5788_v11 = vpack.c.bf16 %v3093_v3, %v3089_v44  ;;  %v3124_v12 = vld [vmem:[#allocation7 + $0x1520] sm:$0xff]  ;;  %v3129_v44 = vld [vmem:[#allocation7 + $0x1548] sm:$0xff] }
 0x3e6   : > { %6151 = vmatpush1.bf16.msra.mxu1 %v6150_v8  ;;  %v3095_v8 = vld [vmem:[#allocation7 + $0x1438] sm:$0xff]  ;;  %v6170_v36 = vpack.c.bf16 %v3086_v6, %v3082_v60  ;;  %v3133_v3 = vld [vmem:[#allocation7 + $0x1568] sm:$0xff]  ;;  %v3122_v6 = vld [vmem:[#allocation7 + $0x1510] sm:$0xff] }
 0x3e7   : > { %6153 = vmatprep.subr.bf16.mxu1 %v6152_v59  ;;  %v3092_v59 = vld [vmem:[#allocation7 + $0x1420] sm:$0xff]  ;;  %v6172_v48 = vpack.c.bf16 %v3095_v8, %v3091_v52  ;;  %v5806_v52 = vpack.c.bf16 %v3124_v12, %v3120_v46  ;;  %v3131_v8 = vld [vmem:[#allocation7 + $0x1558] sm:$0xff] }
 0x3e8   : > { %5771 = vmatpush1.bf16.msra.mxu0 %v5770_v27  ;;  %v3101_v27 = vld [vmem:[#allocation7 + $0x1468] sm:$0xff]  ;;  %v5790_v16 = vpack.c.bf16 %v3092_v59, %v3088_v54  ;;  %v3128_v54 = vld [vmem:[#allocation7 + $0x1540] sm:$0xff]  ;;  %v3159_v9 = vld [vmem:[#allocation7 + $0x1638] sm:$0xff] }
 0x3e9   : > { %5773 = vmatprep.subr.bf16.mxu0 %v5772_v20  ;;  %v3094_v20 = vld [vmem:[#allocation7 + $0x1430] sm:$0xff]  ;;  %v5792_v22 = vpack.c.bf16 %v3101_v27, %v3097_v58  ;;  %v3132_v59 = vld [vmem:[#allocation7 + $0x1560] sm:$0xff]  ;;  %v3137_v58 = vld [vmem:[#allocation7 + $0x1588] sm:$0xff] }
 0x3ea   : > { %6155 = vmatpush1.bf16.msra.mxu1 %v6154_v30  ;;  %v3103_v30 = vld [vmem:[#allocation7 + $0x1478] sm:$0xff]  ;;  %v6174_v31 = vpack.c.bf16 %v3094_v20, %v3090_v2  ;;  %v3141_v27 = vld [vmem:[#allocation7 + $0x15a8] sm:$0xff]  ;;  %v3130_v2 = vld [vmem:[#allocation7 + $0x1550] sm:$0xff] }
 0x3eb   : > { %6157 = vmatprep.subr.bf16.mxu1 %v6156_v55  ;;  %v3100_v55 = vld [vmem:[#allocation7 + $0x1460] sm:$0xff]  ;;  %v6176_v33 = vpack.c.bf16 %v3103_v30, %v3099_v57  ;;  %v3134_v20 = vld [vmem:[#allocation7 + $0x1570] sm:$0xff]  ;;  %v3139_v57 = vld [vmem:[#allocation7 + $0x1598] sm:$0xff] }
 0x3ec   : > { %5775 = vmatpush1.bf16.msra.mxu0 %v5774_v0  ;;  %v3109_v0 = vld [vmem:[#allocation7 + $0x14a8] sm:$0xff]  ;;  %v5794_v35 = vpack.c.bf16 %v3100_v55, %v3096_v63  ;;  %v3143_v30 = vld [vmem:[#allocation7 + $0x15b8] sm:$0xff]  ;;  %v3136_v63 = vld [vmem:[#allocation7 + $0x1580] sm:$0xff] }
 0x3ed   : > { %5777 = vmatprep.subr.bf16.mxu0 %v5776_v25  ;;  %v3102_v25 = vld [vmem:[#allocation7 + $0x1470] sm:$0xff]  ;;  %v5796_v14 = vpack.c.bf16 %v3109_v0, %v3105_v23  ;;  %v3140_v55 = vld [vmem:[#allocation7 + $0x15a0] sm:$0xff]  ;;  %v3145_v23 = vld [vmem:[#allocation7 + $0x15c8] sm:$0xff] }
 0x3ee   : > { %6159 = vmatpush1.bf16.msra.mxu1 %v6158_v62  ;;  %v3111_v62 = vld [vmem:[#allocation7 + $0x14b8] sm:$0xff]  ;;  %v6178_v10 = vpack.c.bf16 %v3102_v25, %v3098_v40  ;;  %v3149_v0 = vld [vmem:[#allocation7 + $0x15e8] sm:$0xff]  ;;  %v3138_v40 = vld [vmem:[#allocation7 + $0x1590] sm:$0xff] }
 0x3ef   : > { %6161 = vmatprep.subr.bf16.mxu1 %v6160_v4  ;;  %v3108_v4 = vld [vmem:[#allocation7 + $0x14a0] sm:$0xff]  ;;  %v6180_v29 = vpack.c.bf16 %v3111_v62, %v3107_v21  ;;  %v3142_v25 = vld [vmem:[#allocation7 + $0x15b0] sm:$0xff]  ;;  %v3147_v21 = vld [vmem:[#allocation7 + $0x15d8] sm:$0xff] }
 0x3f0   : > { %5779 = vmatpush1.bf16.msra.mxu0 %v5778_v50  ;;  %v3117_v50 = vld [vmem:[#allocation7 + $0x14e8] sm:$0xff]  ;;  %v3151_v62 = vld [vmem:[#allocation7 + $0x15f8] sm:$0xff]  ;;  %v3160_v46 = vld [vmem:[#allocation7 + $0x1640] sm:$0xff] }
 0x3f1   : > { %5781 = vmatprep.subr.bf16.mxu0 %v5780_v56  ;;  %v3110_v56 = vld [vmem:[#allocation7 + $0x14b0] sm:$0xff]  ;;  %v3164_v12 = vld [vmem:[#allocation7 + $0x1660] sm:$0xff] }
 0x3f2   : > { %6163 = vmatpush1.bf16.msra.mxu1 %v6162_v24  ;;  %v3112_v24 = vld [vmem:[#allocation7 + $0x14c0] sm:$0xff]  ;;  %v6182_v13 = vpack.c.bf16 %v3110_v56, %v3106_v37  ;;  %v3146_v37 = vld [vmem:[#allocation7 + $0x15d0] sm:$0xff] }
 0x3f3   : > { %6165 = vmatprep.subr.bf16.mxu1 %v6164_v49  ;;  %v3121_v49 = vld [vmem:[#allocation7 + $0x1508] sm:$0xff]  ;;  %v3150_v56 = vld [vmem:[#allocation7 + $0x15f0] sm:$0xff] }
 0x3f4   : > { %5783 = vmatpush1.bf16.msra.mxu0 %v5782_v51  ;;  %v3114_v51 = vld [vmem:[#allocation7 + $0x14d0] sm:$0xff] }
 0x3f5   : > { %5785 = vmatprep.subr.bf16.mxu0 %v5784_v61  ;;  %v3127_v61 = vld [vmem:[#allocation7 + $0x1538] sm:$0xff] }
 0x3f6   : > { %6167 = vmatpush1.bf16.msra.mxu1 %v6166_v39  ;;  %v6186_v39 = vpack.c.bf16 %v3118_v32, %v3114_v51  ;;  %v6188_v60 = vpack.c.bf16 %v3127_v61, %v3123_v53  ;;  %v3154_v51 = vld [vmem:[#allocation7 + $0x1610] sm:$0xff]  ;;  %v3163_v53 = vld [vmem:[#allocation7 + $0x1658] sm:$0xff] }
 0x3f7   : > { %6169 = vmatprep.subr.bf16.mxu1 %v6168_v28  ;;  %v8018_v28 = vld [vmem:[#allocation18_spill] sm:$0xff]  ;;  %v3158_v32 = vld [vmem:[#allocation7 + $0x1630] sm:$0xff] }
 0x3f8   : > { %5787 = vmatpush1.bf16.msra.mxu0 %v5786_v5  ;;  %v3126_v5 = vld [vmem:[#allocation7 + $0x1530] sm:$0xff]  ;;  %v3167_v61 = vld [vmem:[#allocation7 + $0x1678] sm:$0xff] }
 0x3f9   : > { %5789 = vmatprep.subr.bf16.mxu0 %v5788_v11  ;;  %v3135_v11 = vld [vmem:[#allocation7 + $0x1578] sm:$0xff] }
 0x3fa   : > { %6171 = vmatpush1.bf16.msra.mxu1 %v6170_v36  ;;  %v6190_v36 = vpack.c.bf16 %v3126_v5, %v3122_v6  ;;  %v3166_v6 = vld [vmem:[#allocation7 + $0x1670] sm:$0xff]  ;;  %v5826_v5 = vpack.c.bf16 %v3164_v12, %v3160_v46  ;;  %v3209_v12 = vld [vmem:[#allocation7 + $0x17c8] sm:$0xff] }
 0x3fb   : > { %3637 = vmatmul.mubr.f32.vlgmr.msra.gmra.mrb[8].mxu0 %v7592_v34  ;;  %6173 = vmatprep.subr.bf16.mxu1 %v6172_v48  ;;  %v6192_v48 = vpack.c.bf16 %v3135_v11, %v3131_v8  ;;  %v3168_v11 = vld [vmem:[#allocation7 + $0x1680] sm:$0xff] }
 0x3fc   : > { %4626 = vmatprep.mubr.msk.f32.mxu0 %vm381_vm2, %v7525_v15  ;;  %5791 = vmatpush1.bf16.msra.mxu0 %v5790_v16  ;;  %v5810_v16 = vpack.c.bf16 %v3132_v59, %v3128_v54  ;;  %v3177_v59 = vld [vmem:[#allocation7 + $0x16c8] sm:$0xff] }
 0x3fd   : > { %4171 = vmatmul.mubr.f32.vlgmr.msra.gmra.mrb[8].mxu1 %v7592_v34  ;;  %5793 = vmatprep.subr.bf16.mxu0 %v5792_v22  ;;  %v5798_v34 = vpack.c.bf16 %v3108_v4, %v3104_v45  ;;  %v5812_v22 = vpack.c.bf16 %v3141_v27, %v3137_v58  ;;  %v3144_v45 = vld [vmem:[#allocation7 + $0x15c0] sm:$0xff]  ;;  %v3170_v27 = vld [vmem:[#allocation7 + $0x1690] sm:$0xff] }
 0x3fe   : > { %4666 = vmatprep.mubr.msk.f32.mxu1 %vm381_vm2, %v7525_v15  ;;  %6175 = vmatpush1.bf16.msra.mxu1 %v6174_v31  ;;  %v5800_v15 = vpack.c.bf16 %v3117_v50, %v3113_v38  ;;  %v6194_v31 = vpack.c.bf16 %v3134_v20, %v3130_v2  ;;  %v3148_v4 = vld [vmem:[#allocation7 + $0x15e0] sm:$0xff]  ;;  %v3153_v38 = vld [vmem:[#allocation7 + $0x1608] sm:$0xff]  ;;  %v3179_v20 = vld [vmem:[#allocation7 + $0x16d8] sm:$0xff] }
 0x3ff   : > { %4627 = vmatmul.mubr.msk.f32.gmra.mrb[10].mxu0 %vm381_vm2, %v7542_v18  ;;  %6177 = vmatprep.subr.bf16.mxu1 %v6176_v33  ;;  %v6196_v33 = vpack.c.bf16 %v3143_v30, %v3139_v57  ;;  %v3157_v50 = vld [vmem:[#allocation7 + $0x1628] sm:$0xff]  ;;  %v3176_v30 = vld [vmem:[#allocation7 + $0x16c0] sm:$0xff] }
 0x400   : > { %3648 = vmatprep.mubr.f32.mxu0 %v7596_v41  ;;  %5795 = vmatpush1.bf16.msra.mxu0 %v5794_v35  ;;  %v5814_v35 = vpack.c.bf16 %v3140_v55, %v3136_v63  ;;  %v3185_v55 = vld [vmem:[#allocation7 + $0x1708] sm:$0xff] }
 0x401   : > { %4667 = vmatmul.mubr.msk.f32.gmra.mrb[10].mxu1 %vm381_vm2, %v7542_v18  ;;  %5797 = vmatprep.subr.bf16.mxu0 %v5796_v14  ;;  %v5802_v18 = vpack.c.bf16 %v3116_v1, %v3112_v24  ;;  %v5816_v14 = vpack.c.bf16 %v3149_v0, %v3145_v23  ;;  %v3152_v24 = vld [vmem:[#allocation7 + $0x1600] sm:$0xff]  ;;  %v3178_v0 = vld [vmem:[#allocation7 + $0x16d0] sm:$0xff] }
 0x402   : > { %4182 = vmatprep.mubr.f32.mxu1 %v7596_v41  ;;  %6179 = vmatpush1.bf16.msra.mxu1 %v6178_v10  ;;  %v5804_v41 = vpack.c.bf16 %v3125_v7, %v3121_v49  ;;  %v6198_v10 = vpack.c.bf16 %v3142_v25, %v3138_v40  ;;  %v3156_v1 = vld [vmem:[#allocation7 + $0x1620] sm:$0xff]  ;;  %v3161_v49 = vld [vmem:[#allocation7 + $0x1648] sm:$0xff]  ;;  %v3187_v25 = vld [vmem:[#allocation7 + $0x1718] sm:$0xff] }
 0x403   : > { %3649 = vmatmul.mubr.f32.gmra.mrb[12].mxu0 %v7600_v26  ;;  %6181 = vmatprep.subr.bf16.mxu1 %v6180_v29  ;;  %v6200_v29 = vpack.c.bf16 %v3151_v62, %v3147_v21  ;;  %v3165_v7 = vld [vmem:[#allocation7 + $0x1668] sm:$0xff]  ;;  %v3184_v62 = vld [vmem:[#allocation7 + $0x1700] sm:$0xff] }
 0x404   : > { %4628 = vmatprep.mubr.msk.f32.mxu0 %vm381_vm2, %v7547_v47  ;;  %5799 = vmatpush1.bf16.msra.mxu0 %v5798_v34  ;;  %v5818_v34 = vpack.c.bf16 %v3148_v4, %v3144_v45  ;;  %v3193_v4 = vld [vmem:[#allocation7 + $0x1748] sm:$0xff] }
 0x405   : > { %4183 = vmatmul.mubr.f32.gmra.mrb[12].mxu1 %v7600_v26  ;;  %5801 = vmatprep.subr.bf16.mxu0 %v5800_v15  ;;  %v8019_v26 = vld [vmem:[#allocation21_spill] sm:$0xff]  ;;  %v5820_v15 = vpack.c.bf16 %v3157_v50, %v3153_v38 }
 0x406   : > { %4668 = vmatprep.mubr.msk.f32.mxu1 %vm381_vm2, %v7547_v47  ;;  %6183 = vmatpush1.bf16.msra.mxu1 %v6182_v13  ;;  %v5808_v47 = vpack.c.bf16 %v3133_v3, %v3129_v44  ;;  %v6202_v13 = vpack.c.bf16 %v3150_v56, %v3146_v37  ;;  %v3169_v44 = vld [vmem:[#allocation7 + $0x1688] sm:$0xff]  ;;  %v3186_v50 = vld [vmem:[#allocation7 + $0x1710] sm:$0xff]  ;;  %v3195_v56 = vld [vmem:[#allocation7 + $0x1758] sm:$0xff] }
 0x407   : > { %4629 = vmatmul.mubr.msk.f32.gmra.mrb[14].mxu0 %vm381_vm2, %v8018_v28  ;;  %6185 = vmatprep.subr.bf16.mxu1 %v6184_v43  ;;  %v6204_v43 = vpack.c.bf16 %v3159_v9, %v3155_v42  ;;  %v3173_v3 = vld [vmem:[#allocation7 + $0x16a8] sm:$0xff]  ;;  %v3192_v9 = vld [vmem:[#allocation7 + $0x1740] sm:$0xff] }
 0x408   : > { %5803 = vmatpush1.bf16.msra.mxu0 %v5802_v18  ;;  %3725 = vmatprep.mubr.f32.mxu0 %v8019_v26  ;;  %v5822_v18 = vpack.c.bf16 %v3156_v1, %v3152_v24  ;;  %v5828_v8 = vpack.c.bf16 %v3173_v3, %v3169_v44  ;;  %v3201_v1 = vld [vmem:[#allocation7 + $0x1788] sm:$0xff]  ;;  %v3202_v3 = vld [vmem:[#allocation7 + $0x1790] sm:$0xff] }
 0x409   : > { %4669 = vmatmul.mubr.msk.f32.gmra.mrb[14].mxu1 %vm381_vm2, %v8018_v28  ;;  %5805 = vmatprep.subr.bf16.mxu0 %v5804_v41  ;;  %v5824_v41 = vpack.c.bf16 %v3165_v7, %v3161_v49  ;;  %v6208_v28 = vpack.c.bf16 %v3167_v61, %v3163_v53  ;;  %v3194_v7 = vld [vmem:[#allocation7 + $0x1750] sm:$0xff]  ;;  %v3200_v61 = vld [vmem:[#allocation7 + $0x1780] sm:$0xff] }
 0x40a   : > { %6187 = vmatpush1.bf16.msra.mxu1 %v6186_v39  ;;  %4259 = vmatprep.mubr.f32.mxu1 %v8019_v26  ;;  %v6206_v39 = vpack.c.bf16 %v3158_v32, %v3154_v51  ;;  %v3171_v26 = vld [vmem:[#allocation7 + $0x1698] sm:$0xff] }
 0x40b   : > { %6189 = vmatprep.subr.bf16.mxu1 %v6188_v60  ;;  %v3162_v60 = vld [vmem:[#allocation7 + $0x1650] sm:$0xff]  ;;  %v3203_v32 = vld [vmem:[#allocation7 + $0x1798] sm:$0xff] }
 0x40c   : > { %5807 = vmatpush1.bf16.msra.mxu0 %v5806_v52  ;;  %v3175_v52 = vld [vmem:[#allocation7 + $0x16b8] sm:$0xff]  ;;  %v6210_v54 = vpack.c.bf16 %v3166_v6, %v3162_v60 }
 0x40d   : > { %5809 = vmatprep.subr.bf16.mxu0 %v5808_v47  ;;  %v3172_v47 = vld [vmem:[#allocation7 + $0x16a0] sm:$0xff]  ;;  %v6212_v58 = vpack.c.bf16 %v3175_v52, %v3171_v26  ;;  %v3211_v6 = vld [vmem:[#allocation7 + $0x17d8] sm:$0xff] }
 0x40e   : > { %6191 = vmatpush1.bf16.msra.mxu1 %v6190_v36  ;;  %v3181_v36 = vld [vmem:[#allocation7 + $0x16e8] sm:$0xff]  ;;  %v5830_v2 = vpack.c.bf16 %v3172_v47, %v3168_v11  ;;  %v3208_v52 = vld [vmem:[#allocation7 + $0x17c0] sm:$0xff] }
 0x40f   : > { %6193 = vmatprep.subr.bf16.mxu1 %v6192_v48  ;;  %v3174_v48 = vld [vmem:[#allocation7 + $0x16b0] sm:$0xff]  ;;  %v5832_v57 = vpack.c.bf16 %v3181_v36, %v3177_v59 }
 0x410   : > { %5811 = vmatpush1.bf16.msra.mxu0 %v5810_v16  ;;  %v3183_v16 = vld [vmem:[#allocation7 + $0x16f8] sm:$0xff]  ;;  %v6214_v63 = vpack.c.bf16 %v3174_v48, %v3170_v27  ;;  %v3214_v59 = vld [vmem:[#allocation7 + $0x17f0] sm:$0xff] }
 0x411   : > { %5813 = vmatprep.subr.bf16.mxu0 %v5812_v22  ;;  %v3180_v22 = vld [vmem:[#allocation7 + $0x16e0] sm:$0xff]  ;;  %v6216_v23 = vpack.c.bf16 %v3183_v16, %v3179_v20  ;;  %v8020_v27 = vld [vmem:[#allocation17_spill] sm:$0xff]  ;;  %v8021_v48 = vld [vmem:[#allocation22_spill] sm:$0xff] }
 0x412   : > { %6195 = vmatpush1.bf16.msra.mxu1 %v6194_v31  ;;  %v3189_v31 = vld [vmem:[#allocation7 + $0x1728] sm:$0xff]  ;;  %v5834_v40 = vpack.c.bf16 %v3180_v22, %v3176_v30 }
 0x413   : > { %6197 = vmatprep.subr.bf16.mxu1 %v6196_v33  ;;  %v3182_v33 = vld [vmem:[#allocation7 + $0x16f0] sm:$0xff]  ;;  %v5836_v21 = vpack.c.bf16 %v3189_v31, %v3185_v55  ;;  %v8023_v20 = vld [vmem:[#allocation20_spill] sm:$0xff] }
 0x414   : > { %5815 = vmatpush1.bf16.msra.mxu0 %v5814_v35  ;;  %v3191_v35 = vld [vmem:[#allocation7 + $0x1738] sm:$0xff]  ;;  %v6218_v45 = vpack.c.bf16 %v3182_v33, %v3178_v0  ;;  %v8025_v16 = vld [vmem:[#allocation16_spill] sm:$0xff] }
 0x415   : > { %5817 = vmatprep.subr.bf16.mxu0 %v5816_v14  ;;  %v3188_v14 = vld [vmem:[#allocation7 + $0x1720] sm:$0xff]  ;;  %v6220_v38 = vpack.c.bf16 %v3191_v35, %v3187_v25  ;;  %v8027_v22 = vsub.s32 1, %v8025_v16  ;;  %v8028_v55 = vsub.s32 2, %v8025_v16  ;;  %v8029_v0 = vsub.s32 3, %v8025_v16 }
 0x416   : > { %6199 = vmatpush1.bf16.msra.mxu1 %v6198_v10  ;;  %v3197_v10 = vld [vmem:[#allocation7 + $0x1768] sm:$0xff]  ;;  %v5838_v37 = vpack.c.bf16 %v3188_v14, %v3184_v62  ;;  %v8030_v25 = vmov 0.0   ;;  %v6512_v62 = vld [vmem:[%s7014_s16] sm:$0xff] }
 0x417   : > { %6201 = vmatprep.subr.bf16.mxu1 %v6200_v29  ;;  %v3190_v29 = vld [vmem:[#allocation7 + $0x1730] sm:$0xff]  ;;  %v5840_v42 = vpack.c.bf16 %v3197_v10, %v3193_v4 }
 0x418   : > { %5819 = vmatpush1.bf16.msra.mxu0 %v5818_v34  ;;  %v3199_v34 = vld [vmem:[#allocation7 + $0x1778] sm:$0xff]  ;;  %v6222_v24 = vpack.c.bf16 %v3190_v29, %v3186_v50 }
 0x419   : > { %5821 = vmatprep.subr.bf16.mxu0 %v5820_v15  ;;  %v3196_v15 = vld [vmem:[#allocation7 + $0x1760] sm:$0xff]  ;;  %v6224_v49 = vpack.c.bf16 %v3199_v34, %v3195_v56 }
 0x41a   : > { %6203 = vmatpush1.bf16.msra.mxu1 %v6202_v13  ;;  %v3205_v13 = vld [vmem:[#allocation7 + $0x17a8] sm:$0xff]  ;;  %v5842_v51 = vpack.c.bf16 %v3196_v15, %v3192_v9  ;;  %v6515_v9 = vld [vmem:[%s7014_s16 + $0x18] sm:$0xff] }
 0x41b   : > { %6205 = vmatprep.subr.bf16.mxu1 %v6204_v43  ;;  %v3198_v43 = vld [vmem:[#allocation7 + $0x1770] sm:$0xff]  ;;  %v5844_v53 = vpack.c.bf16 %v3205_v13, %v3201_v1  ;;  %v6516_v13 = vld [vmem:[%s7014_s16 + $0x20] sm:$0xff] }
 0x41c   : > { %5823 = vmatpush1.bf16.msra.mxu0 %v5822_v18  ;;  %v3207_v18 = vld [vmem:[#allocation7 + $0x17b8] sm:$0xff]  ;;  %v6226_v46 = vpack.c.bf16 %v3198_v43, %v3194_v7 }
 0x41d   : > { %5825 = vmatprep.subr.bf16.mxu0 %v5824_v41  ;;  %v3204_v41 = vld [vmem:[#allocation7 + $0x17a0] sm:$0xff]  ;;  %v6228_v44 = vpack.c.bf16 %v3207_v18, %v3203_v32  ;;  %v6517_v32 = vld [vmem:[%s7014_s16 + $0x28] sm:$0xff] }
 0x41e   : > { %6207 = vmatpush1.bf16.msra.mxu1 %v6206_v39  ;;  %v3213_v39 = vld [vmem:[#allocation7 + $0x17e8] sm:$0xff]  ;;  %v5846_v60 = vpack.c.bf16 %v3204_v41, %v3200_v61  ;;  %v6518_v61 = vld [vmem:[%s7014_s16 + $0x30] sm:$0xff] }
 0x41f   : > { %6209 = vmatprep.subr.bf16.mxu1 %v6208_v28  ;;  %v3206_v28 = vld [vmem:[#allocation7 + $0x17b0] sm:$0xff]  ;;  %v5848_v26 = vpack.c.bf16 %v3213_v39, %v3209_v12  ;;  %v6519_v39 = vld [vmem:[%s7014_s16 + $0x38] sm:$0xff] }
 0x420   : > { %5827 = vmatpush1.bf16.msra.mxu0 %v5826_v5  ;;  %v3215_v5 = vld [vmem:[#allocation7 + $0x17f8] sm:$0xff]  ;;  %v6230_v11 = vpack.c.bf16 %v3206_v28, %v3202_v3 }
 0x421   : > { %5829 = vmatprep.subr.bf16.mxu0 %v5828_v8  ;;  %v3212_v8 = vld [vmem:[#allocation7 + $0x17e0] sm:$0xff]  ;;  %v6232_v47 = vpack.c.bf16 %v3215_v5, %v3211_v6 }
 0x422   : > { %6211 = vmatpush1.bf16.msra.mxu1 %v6210_v54  ;;  %v3210_v54 = vld [vmem:[#allocation7 + $0x17d0] sm:$0xff]  ;;  %v5850_v36 = vpack.c.bf16 %v3212_v8, %v3208_v52  ;;  %v6521_v8 = vld [vmem:[%s7014_s16 + $0x48] sm:$0xff] }
 0x423   : > { %6213 = vmatprep.subr.bf16.mxu1 %v6212_v58  ;;  %v6234_v58 = vpack.c.bf16 %v3214_v59, %v3210_v54  ;;  %v6522_v54 = vld [vmem:[%s7014_s16 + $0x50] sm:$0xff] }
 0x424   : > { %5831 = vmatpush1.bf16.msra.mxu0 %v5830_v2  ;;  %v8022_v2 = vld [vmem:[#allocation23_spill] sm:$0xff] }
 0x425   : > { %5833 = vmatprep.subr.bf16.mxu0 %v5832_v57  ;;  %v8026_v57 = vsub.s32 0, %v8025_v16 }
 0x426   : > { %6215 = vmatpush1.bf16.msra.mxu1 %v6214_v63 }
 0x427   : > { %6217 = vmatprep.subr.bf16.mxu1 %v6216_v23 }
 0x428   : > { %5835 = vmatpush1.bf16.msra.mxu0 %v5834_v40 }
 0x429   : > { %5837 = vmatprep.subr.bf16.mxu0 %v5836_v21 }
 0x42a   : > { %6219 = vmatpush1.bf16.msra.mxu1 %v6218_v45 }
 0x42b   : > { %6221 = vmatprep.subr.bf16.mxu1 %v6220_v38  ;;  %v6513_v38 = vld [vmem:[%s7014_s16 + $0x8] sm:$0xff] }
 0x42c   : > { %5839 = vmatpush1.bf16.msra.mxu0 %v5838_v37  ;;  %v6514_v37 = vld [vmem:[%s7014_s16 + $0x10] sm:$0xff] }
 0x42d   : > { %5841 = vmatprep.subr.bf16.mxu0 %v5840_v42 }
 0x42e   : > { %6223 = vmatpush1.bf16.msra.mxu1 %v6222_v24 }
 0x42f   : > { %6225 = vmatprep.subr.bf16.mxu1 %v6224_v49 }
 0x430   : > { %5843 = vmatpush1.bf16.msra.mxu0 %v5842_v51 }
 0x431   : > { %5845 = vmatprep.subr.bf16.mxu0 %v5844_v53 }
 0x432   : > { %6227 = vmatpush1.bf16.msra.mxu1 %v6226_v46 }
 0x433   : > { %6229 = vmatprep.subr.bf16.mxu1 %v6228_v44 }
 0x434   : > { %5847 = vmatpush1.bf16.msra.mxu0 %v5846_v60  ;;  %v6520_v60 = vld [vmem:[%s7014_s16 + $0x40] sm:$0xff] }
 0x435   : > { %5849 = vmatprep.subr.bf16.mxu0 %v5848_v26 }
 0x436   : > { %6231 = vmatpush1.bf16.msra.mxu1 %v6230_v11 }
 0x437   : > { %6233 = vmatprep.subr.bf16.mxu1 %v6232_v47 }
 0x438   : > { %5851 = vmatpush1.bf16.msra.mxu0 %v5850_v36 }
 0x43a   : > { %6235 = vmatpush1.bf16.msra.mxu1 %v6234_v58 }
 0x43b   : > { %3726 = vmatmul.mubr.f32.vlgmr.msra.gmra.mrb[8].mxu0 %v7608_v19 }
 0x43c   : > { %4630 = vmatprep.mubr.msk.f32.mxu0 %vm381_vm2, %v8020_v27 }
 0x43d   : > { %4260 = vmatmul.mubr.f32.vlgmr.msra.gmra.mrb[8].mxu1 %v7608_v19  ;;  %v8024_v19 = vld [vmem:[#allocation19_spill] sm:$0xff] }
 0x43e   : > { %4670 = vmatprep.mubr.msk.f32.mxu1 %vm381_vm2, %v8020_v27  ;;  %v6523_v27 = vld [vmem:[%s7014_s16 + $0x58] sm:$0xff] }
 0x43f   : > { %4631 = vmatmul.mubr.msk.f32.gmra.mrb[10].mxu0 %vm381_vm2, %v7545_v17 }
 0x440   : > { %3737 = vmatprep.mubr.f32.mxu0 %v8021_v48 }
 0x441   : > { %4671 = vmatmul.mubr.msk.f32.gmra.mrb[10].mxu1 %vm381_vm2, %v7545_v17  ;;  %v4284_v17 = vld [vmem:[#allocation10] sm:$0xf] }
 0x442   : > { %4271 = vmatprep.mubr.f32.mxu1 %v8021_v48  ;;  %v7823_v30 = vrot.slane %v4284_v17, %v8026_v57  ;;  %v7827_v63 = vrot.slane %v4284_v17, %v8027_v22  ;;  %v7831_v31 = vrot.slane %v4284_v17, %v8028_v55  ;;  %v7835_v33 = vrot.slane %v4284_v17, %v8029_v0  ;;  %v6525_v22 = vld [vmem:[%s7014_s16 + $0x68] sm:$0xff]  ;;  %v6526_v55 = vld [vmem:[%s7014_s16 + $0x70] sm:$0xff] }
 0x443   : > { %3738 = vmatmul.mubr.f32.gmra.mrb[12].mxu0 %v8022_v2 }
 0x444   : > { %4632 = vmatprep.mubr.msk.f32.mxu0 %vm381_vm2, %v8023_v20 }
 0x445   : > { %4272 = vmatmul.mubr.f32.gmra.mrb[12].mxu1 %v8022_v2 }
 0x446   : > { %4672 = vmatprep.mubr.msk.f32.mxu1 %vm381_vm2, %v8023_v20 }
 0x447   : > { %4633 = vmatmul.mubr.msk.f32.gmra.mrb[14].mxu0 %vm381_vm2, %v8024_v19 }
 0x449   : > { %4673 = vmatmul.mubr.msk.f32.gmra.mrb[14].mxu1 %vm381_vm2, %v8024_v19  ;;  %v6524_v19 = vld [vmem:[%s7014_s16 + $0x60] sm:$0xff] }
 0x50e   : > { %v3727_v23 = vpop.f32.mrb[8].mxu0 }
 0x50f   : > { %vm4306_vm2 = vcmp.ge.f32.partialorder %v3727_v23, %v7823_v30  ;;  %v3729_v40 = vpop.f32.mrb[9].mxu0 }
 0x510   : > { %v4674_v35 = vsel %vm4306_vm2, 1.0, %v8030_v25  ;;  %v4261_v21 = vpop.f32.mrb[8].mxu1  ;;  %vm4307_vm7 = vcmp.ge.f32.partialorder %v3729_v40, %v7827_v63 }
 0x511   : > { %v4354_v14 = vadd.f32 %v6512_v62, %v4674_v35  ;;  %vm4308_vm8 = vcmp.ge.f32.partialorder %v4261_v21, %v7831_v31  ;;  %v4675_v45 = vsel %vm4307_vm7, 1.0, %v8030_v25  ;;  %v4263_v4 = vpop.f32.mrb[9].mxu1 }
 0x512   : > { %v4676_v10 = vsel %vm4308_vm8, 1.0, %v8030_v25  ;;  %v4355_v50 = vadd.f32 %v6513_v38, %v4675_v45  ;;  %vm4309_vm9 = vcmp.ge.f32.partialorder %v4263_v4, %v7835_v33  ;;  %v3733_v29 = vpop.f32.mrb[10].mxu0 }
 0x513   : > { %4370 = vst [vmem:[%s7848_s24] sm:$0xff] %v4354_v14  ;;  %v4356_v56 = vadd.f32 %v6514_v37, %v4676_v10  ;;  %v4677_v34 = vsel %vm4309_vm9, 1.0, %v8030_v25  ;;  %vm4310_vm10 = vcmp.ge.f32.partialorder %v3733_v29, %v7823_v30  ;;  %v3735_v42 = vpop.f32.mrb[11].mxu0 }
 0x514   : > { %4371 = vst [vmem:[%s7848_s24 + $0x8] sm:$0xff] %v4355_v50  ;;  %v4357_v15 = vadd.f32 %v6515_v9, %v4677_v34  ;;  %v4678_v24 = vsel %vm4310_vm10, 1.0, %v8030_v25  ;;  %v4267_v1 = vpop.f32.mrb[10].mxu1  ;;  %vm4311_vm11 = vcmp.ge.f32.partialorder %v3735_v42, %v7827_v63 }
 0x515   : > { %4372 = vst [vmem:[%s7848_s24 + $0x10] sm:$0xff] %v4356_v56  ;;  %v4358_v49 = vadd.f32 %v6516_v13, %v4678_v24  ;;  %vm4312_vm12 = vcmp.ge.f32.partialorder %v4267_v1, %v7831_v31  ;;  %v4679_v7 = vsel %vm4311_vm11, 1.0, %v8030_v25  ;;  %v4269_v43 = vpop.f32.mrb[11].mxu1 }
 0x516   : > { %4373 = vst [vmem:[%s7848_s24 + $0x18] sm:$0xff] %v4357_v15  ;;  %v4680_v51 = vsel %vm4312_vm12, 1.0, %v8030_v25  ;;  %v4359_v18 = vadd.f32 %v6517_v32, %v4679_v7  ;;  %vm4313_vm13 = vcmp.ge.f32.partialorder %v4269_v43, %v7835_v33  ;;  %v3739_v53 = vpop.f32.mrb[12].mxu0 }
 0x517   : > { %4374 = vst [vmem:[%s7848_s24 + $0x20] sm:$0xff] %v4358_v49  ;;  %v4360_v41 = vadd.f32 %v6518_v61, %v4680_v51  ;;  %v4681_v46 = vsel %vm4313_vm13, 1.0, %v8030_v25  ;;  %vm4314_vm14 = vcmp.ge.f32.partialorder %v3739_v53, %v7823_v30  ;;  %v3741_v12 = vpop.f32.mrb[13].mxu0 }
 0x518   : > { %4375 = vst [vmem:[%s7848_s24 + $0x28] sm:$0xff] %v4359_v18  ;;  %v4361_v44 = vadd.f32 %v6519_v39, %v4681_v46  ;;  %v4682_v3 = vsel %vm4314_vm14, 1.0, %v8030_v25  ;;  %v4273_v28 = vpop.f32.mrb[12].mxu1  ;;  %vm4315_vm15 = vcmp.ge.f32.partialorder %v3741_v12, %v7827_v63 }
 0x519   : > { %4376 = vst [vmem:[%s7848_s24 + $0x30] sm:$0xff] %v4360_v41  ;;  %v4362_v6 = vadd.f32 %v6520_v60, %v4682_v3  ;;  %vm4316_vm0 = vcmp.ge.f32.partialorder %v4273_v28, %v7831_v31  ;;  %v4683_v5 = vsel %vm4315_vm15, 1.0, %v8030_v25  ;;  %v4275_v26 = vpop.f32.mrb[13].mxu1 }
 0x51a   : > { %4377 = vst [vmem:[%s7848_s24 + $0x38] sm:$0xff] %v4361_v44  ;;  %v4684_v52 = vsel %vm4316_vm0, 1.0, %v8030_v25  ;;  %v4363_v11 = vadd.f32 %v6521_v8, %v4683_v5  ;;  %vm4317_vm1 = vcmp.ge.f32.partialorder %v4275_v26, %v7835_v33  ;;  %v3745_v47 = vpop.f32.mrb[14].mxu0 }
 0x51b   : > { %4378 = vst [vmem:[%s7848_s24 + $0x40] sm:$0xff] %v4362_v6  ;;  %v4364_v59 = vadd.f32 %v6522_v54, %v4684_v52  ;;  %v4685_v36 = vsel %vm4317_vm1, 1.0, %v8030_v25  ;;  %vm4318_vm3 = vcmp.ge.f32.partialorder %v3745_v47, %v7823_v30  ;;  %v3747_v58 = vpop.f32.mrb[15].mxu0 }
 0x51c   : > { %4379 = vst [vmem:[%s7848_s24 + $0x48] sm:$0xff] %v4363_v11  ;;  %v4365_v48 = vadd.f32 %v6523_v27, %v4685_v36  ;;  %v4686_v2 = vsel %vm4318_vm3, 1.0, %v8030_v25  ;;  %v4279_v20 = vpop.f32.mrb[14].mxu1  ;;  %vm4319_vm5 = vcmp.ge.f32.partialorder %v3747_v58, %v7827_v63 }
 0x51d   : > { %4380 = vst [vmem:[%s7848_s24 + $0x50] sm:$0xff] %v4364_v59  ;;  %v4366_v17 = vadd.f32 %v6524_v19, %v4686_v2  ;;  %vm4320_vm6 = vcmp.ge.f32.partialorder %v4279_v20, %v7831_v31  ;;  %v4687_v16 = vsel %vm4319_vm5, 1.0, %v8030_v25  ;;  %v4281_v57 = vpop.f32.mrb[15].mxu1  ;;  %v6527_v31 = vld [vmem:[%s7014_s16 + $0x78] sm:$0xff] }
 0x51e   : > { %4381 = vst [vmem:[%s7848_s24 + $0x58] sm:$0xff] %v4365_v48  ;;  %v4688_v30 = vsel %vm4320_vm6, 1.0, %v8030_v25  ;;  %v4367_v63 = vadd.f32 %v6525_v22, %v4687_v16  ;;  %vm4321_vm4 = vcmp.ge.f32.partialorder %v4281_v57, %v7835_v33 }
 0x51f   : > { %4382 = vst [vmem:[%s7848_s24 + $0x60] sm:$0xff] %v4366_v17  ;;  %v4368_v23 = vadd.f32 %v6526_v55, %v4688_v30  ;;  %v4689_v0 = vsel %vm4321_vm4, 1.0, %v8030_v25 }
 0x520   : > { %4383 = vst [vmem:[%s7848_s24 + $0x68] sm:$0xff] %v4367_v63  ;;  %v4369_v40 = vadd.f32 %v6527_v31, %v4689_v0 }
 0x521   : > { %4384 = vst [vmem:[%s7848_s24 + $0x70] sm:$0xff] %v4368_v23 }
 0x522   : > { %4385 = vst [vmem:[%s7848_s24 + $0x78] sm:$0xff] %v4369_v40 }
 0x523   : > { %6683 = shalt.err (!%p6680_p13)
}
 0x524   : > { %s6684_s29 = scalar_lea.hbm %s7906_s13, 2048  ;;  %s6688_s11 = scalar_lea.hbm %s7961_s5, 4096 }
 0x525   : > { %p6685_p9 = scmp.ne.s32.totalorder %s7906_s13, %s6684_s29  ;;  %p6689_p4 = scmp.lt.u32.totalorder %s7906_s13, %s7961_s5 }
 0x526   : > { %p6690_p8 = scmp.lt.u32.totalorder %s6688_s11, %s6684_s29  ;;  %p6692_p3 = scmp.lt.u32.totalorder %s6684_s29, %s7906_s13 }
 0x527   : > { %p6686_p0 = pnand %p6685_p9, %p6953_p10 }
 0x528   : > { %p6691_p6 = por %p6690_p8, %p6689_p4 }
 0x529   : > { %p6687_p11 = pneg %p6686_p0 }
 0x52a   : > { %p6693_p5 = por %p6692_p3, %p6691_p6 }
 0x52c   : > { %p6694_p7 = pnand %p6693_p5, %p6687_p11 }
 0x52e   : > { %6697 = shalt.err (!%p6694_p7)
}
 0x52f   : > { %s6756_s26 = smov 512   ;;  %s6757_s22 = smov 32  }
 0x530   : > { %6414 = dma.vmem_to_hbm [thread:$0]  (%p6953_p10), %s7908_s23, 2048, %s7906_s13, %s4387_s8, %s6756_s26, %s6756_s26, %s6757_s22  }
 0x531 PF: > { %s4416_s27 = sand.u32 1, %s6732_s18   ;;  %p8031_p12 = scmp.ne.s32.totalorder %s7988_s25, 0 }
 0x532   : > { %p8032_p1 = scmp.ge.s32.totalorder %s6744_s21, 2  ;;  %s4417_s6 = scalar_lea.sflag [#allocation4], %s4416_s27 }
 0x534   : > { %p6434_p2 = pnand %p8032_p1, %p8031_p12 }
 0x536   : > { %6727 = dma.done.wait (!%p6434_p2), %s4417_s6, 2048  }
 0x537   : > { %6729 = vsyncadd (!%p6434_p2), %s4417_s6, 4294965248  ;;  %p20_p13 = scmp.ge.s32.totalorder %s6943_s14, 4   ;;  %s8033_s18 = smov %s6736_s19 }
 0x538   : > { %s8034_s19 = smov %s6740_s20  ;;  %s8035_s20 = smov %s6959_s7 }
 0x539   : > { %s8036_s21 = smov %s6943_s14  ;;  %22 = sbr.rel (!%p20_p13) target bundleno = 7 (0x7), region = 101 }
 0x540   :  { %4422 = vsyncpa [#allocation3], 1 }
 0x541   :  { %4424 = vsyncpa [#allocation3 + $0x1], 1 }
 0x542   :  { %4425 = vsyncpa [#allocation6], 1 }
 0x543   :  { %4426 = vsyncpa [#allocation9], 1 }
 0x544   :  { %4427 = vsyncpa [#allocation4], 1 }
 0x545   :  { %4429 = vsyncpa [#allocation4 + $0x1], 1 }

</bundles_post_ra>
